<compile_context>
chip_gen: v6e
topology: v6e:2x2x1
jax: 0.10.0
libtpu: 0.0.40
codegen_flags: <defaults>
</compile_context>

<pallas_src>
import jax
import jax.numpy as jnp
from jax.experimental import pallas as pl
from jax.experimental.pallas import tpu as pltpu

LN_EPS = 1e-5  # torch.nn.LayerNorm default


def _layer_norm_f32(y, gamma, beta):
    """LayerNorm over the last axis, f32 math, two-pass (mean-centered) variance."""
    inv_d = 1.0 / y.shape[-1]
    mu = jnp.sum(y, axis=-1, keepdims=True) * inv_d
    yc = y - mu
    var = jnp.sum(yc * yc, axis=-1, keepdims=True) * inv_d
    return yc * jax.lax.rsqrt(var + LN_EPS) * gamma + beta


def _make_encoder_kernel(batch_tile, num_nodes, hidden_dim, ffn_dim):
    bt, n, d, f = batch_tile, num_nodes, hidden_dim, ffn_dim

    def kernel(x_ref, adj_ref, wg_ref, w1_ref, w2_ref, vec_ref, o_ref, m_ref):
        layer = pl.program_id(1)

        # ---- layer 0 of each batch tile: build the normalized adjacency once
        #      (fully batched, no N x N transpose), keep it resident in VMEM
        #      scratch; seed the carry (resident output block) with the input.
        @pl.when(layer == 0)
        def _init():
            row = jax.lax.broadcasted_iota(jnp.int32, (bt, n, n), 1)
            col = jax.lax.broadcasted_iota(jnp.int32, (bt, n, n), 2)
            # binarized adjacency with forced self-loops
            # (add_remaining_self_loops semantics of PyG gcn_norm).
            a_hat = jnp.where(row == col, 1.0,
                              (adj_ref[...] != 0.0).astype(jnp.float32))
            # in-degree deg[i] = sum_s A_hat[s, i] (PyG gcn_norm, src->tgt flow),
            # needed in both broadcast orientations WITHOUT a transpose:
            #   lane-oriented via a sublane reduction, sublane-oriented via a
            #   tiny batched ones-matmul on the MXU.
            deg_lane = jnp.sum(a_hat, axis=1, keepdims=True)              # (bt,1,n)
            deg_sub = jnp.einsum('bst,bso->bto', a_hat,                    # (bt,n,1)
                                 jnp.ones((bt, n, 1), jnp.float32),
                                 preferred_element_type=jnp.float32)
            dinv_lane = jnp.where(deg_lane > 0, jax.lax.rsqrt(deg_lane), 0.0)
            dinv_sub = jnp.where(deg_sub > 0, jax.lax.rsqrt(deg_sub), 0.0)
            # M stored UN-transposed: M[s, t] = A_hat[s, t]/sqrt(deg[s]*deg[t]).
            m_ref[...] = (a_hat * dinv_lane * dinv_sub).astype(m_ref.dtype)
            o_ref[...] = x_ref[...]

        # ---- per-layer parameters (bf16 MXU operands, f32 small vectors)
        wg = wg_ref[0]                      # (D, D) bf16
        w1 = w1_ref[0]                      # (D, F) bf16
        w2 = w2_ref[0]                      # (F, D) bf16
        vec = vec_ref[0]                    # (8, F) f32 packed small vectors
        bg, b1, b2 = vec[0:1, :d], vec[1:2, :], vec[2:3, :d]
        g1, be1 = vec[3:4, :d], vec[4:5, :d]
        g2, be2 = vec[5:6, :d], vec[6:7, :d]

        # carry lives in the resident output block (indexed only by batch axis)
        x = o_ref[...].reshape(bt * n, d)   # (Bt*N, D) f32, layout-free (N % 8 == 0)

        # ---- GCNConv: tall-LHS shared-weight matmul, then ONE batched
        #      propagation over the source axis (out[t] = sum_s M[s,t] * xw[s]).
        xw = jnp.dot(x.astype(jnp.bfloat16), wg,
                     preferred_element_type=jnp.float32)            # (Bt*N, D)
        h = jnp.einsum('bst,bsd->btd',
                       m_ref[...], xw.astype(jnp.bfloat16).reshape(bt, n, d),
                       preferred_element_type=jnp.float32).reshape(bt * n, d)
        h = h + bg

        # dropout1 = identity (inference); residual + LayerNorm1 (f32 VPU math)
        y = _layer_norm_f32(h + x, g1, be1)

        # ---- feedforward: Linear -> SiLU -> (dropout identity) -> Linear
        ff = jnp.dot(y.astype(jnp.bfloat16), w1,
                     preferred_element_type=jnp.float32) + b1       # (Bt*N, F)
        ff = ff * jax.nn.sigmoid(ff)                                # SiLU (EUP), f32
        ff = jnp.dot(ff.astype(jnp.bfloat16), w2,
                     preferred_element_type=jnp.float32) + b2       # (Bt*N, D)

        # dropout2 = identity; residual + LayerNorm2; write carry back
        o_ref[...] = _layer_norm_f32(ff + y, g2, be2).reshape(bt, n, d)

    return kernel


def _vmem_bytes(bt, n, d, f):
    """Rough per-grid-step VMEM footprint estimate (bytes)."""
    f32, bf16 = 4, 2
    resident = (2 * bt * n * d * f32      # output carry (+ writeback slack)
                + bt * n * d * f32        # x block (single-buffered)
                + bt * n * n * f32        # adj block (single-buffered)
                + bt * n * n * bf16)      # resident normalized adjacency M
    weights = 2 * ((d * d + 2 * d * f) * bf16 + 8 * f * f32)   # double-buffered
    temps = bt * n * (4 * d * f32 + 2 * f * f32 + n * f32)     # layer temporaries
    return resident + weights + temps


def _choose_batch_tile(B, n, d, f, vmem_budget):
    divisors = [t for t in range(1, B + 1) if B % t == 0]
    fitting = [t for t in divisors if _vmem_bytes(t, n, d, f) <= vmem_budget] or [1]
    bt = max(fitting)
    # Keep the "parallel" batch grid axis >= 2 when B allows it so v7x's two
    # TensorCores both get work; on 1-TC chips the cost is one extra weight
    # re-stream, negligible once bt*n is already MXU-sized.
    if B >= 4 and bt == B:
        bt = max(t for t in fitting if t <= B // 2)
    return bt


def graph_conv_encoder(x, adj, params, *, batch_tile=None):
    """Full GraphConvEncoder forward (all layers fused in one pallas_call)."""
    B, N, D = x.shape
    L, _, F = params["w1"].shape
    assert N % 8 == 0, "pad num_nodes to a multiple of 8 (16 preferred for bf16)"
    assert D % 128 == 0, "hidden_dim should be a multiple of 128 (lane axis)"

    # generation-aware VMEM budget (v5e/v6e: 128 MiB physical, v7x: 64 MiB)
    try:
        vmem_cap = int(pltpu.get_tpu_info().vmem_capacity_bytes)
    except Exception:
        vmem_cap = 128 << 20

    if batch_tile is None:
        batch_tile = _choose_batch_tile(B, N, D, F, int(0.6 * vmem_cap))
    bt = batch_tile
    assert B % bt == 0, "batch must be divisible by batch_tile"

    est = _vmem_bytes(bt, N, D, F)
    vmem_limit = int(min(max(int(1.5 * est), 16 << 20), int(0.75 * vmem_cap)))

    kernel = _make_encoder_kernel(bt, N, D, F)

    # pack the seven small per-layer vectors into one (L, 8, F) operand
    def _pad(v):
        return jnp.pad(v, ((0, 0), (0, 0), (0, F - v.shape[-1])))
    vecs = jnp.concatenate(
        [_pad(params["bg"]), params["b1"], _pad(params["b2"]),
         _pad(params["g1"]), _pad(params["be1"]),
         _pad(params["g2"]), _pad(params["be2"]),
         jnp.zeros((L, 1, F), jnp.float32)], axis=1).astype(jnp.float32)

    batch_idx = lambda b, l: (b, 0, 0)
    layer_idx = lambda b, l: (l, 0, 0)

    args = (x.astype(jnp.float32), adj.astype(jnp.float32),
            params["wg"].astype(jnp.bfloat16),
            params["w1"].astype(jnp.bfloat16),
            params["w2"].astype(jnp.bfloat16),
            vecs)

    def _run(single_buffer_const_blocks):
        const_kw = (dict(pipeline_mode=pl.Buffered(1))
                    if single_buffer_const_blocks else {})
        in_specs = [
            # x / adj: block index constant along the layer axis -> single-buffer
            pl.BlockSpec((bt, N, D), batch_idx, **const_kw),
            pl.BlockSpec((bt, N, N), batch_idx, **const_kw),
            pl.BlockSpec((1, D, D), layer_idx),   # GCN weight    (bf16)
            pl.BlockSpec((1, D, F), layer_idx),   # FF linear 1 W (bf16)
            pl.BlockSpec((1, F, D), layer_idx),   # FF linear 2 W (bf16)
            pl.BlockSpec((1, 8, F), layer_idx),   # packed biases / LN vectors
        ]
        return pl.pallas_call(
            kernel,
            out_shape=jax.ShapeDtypeStruct((B, N, D), jnp.float32),
            grid_spec=pltpu.PrefetchScalarGridSpec(
                num_scalar_prefetch=0,
                grid=(B // bt, L),
                in_specs=in_specs,
                out_specs=pl.BlockSpec((bt, N, D), batch_idx),
                scratch_shapes=[pltpu.VMEM((bt, N, N), jnp.bfloat16)],  # resident M
            ),
            compiler_params=pltpu.CompilerParams(
                dimension_semantics=("parallel", "arbitrary"),
                vmem_limit_bytes=vmem_limit,
            ),
            input_output_aliases={0: 0},   # donate x's HBM buffer to the output
        )(*args)

    try:
        return _run(True)
    except Exception:
        # Fallback if this JAX build rejects pipeline_mode=pl.Buffered(1) on
        # top-level pallas_call BlockSpecs; only costs some extra VMEM.
        return _run(False)


def init_params(key, num_layers, hidden_dim, dim_feedforward_mult=4):
    """Deterministic synthetic parameters, stacked across layers as [L, ...]."""
    D = hidden_dim
    F = D * dim_feedforward_mult

    def glorot(k, shape):
        fan_in, fan_out = shape[-2], shape[-1]
        lim = jnp.sqrt(6.0 / (fan_in + fan_out))
        return jax.random.uniform(k, shape, jnp.float32, -lim, lim)

    k1, k2, k3 = jax.random.split(key, 3)
    return dict(
        wg=glorot(k1, (num_layers, D, D)),
        bg=jnp.zeros((num_layers, 1, D), jnp.float32),   # PyG GCNConv bias init = zeros
        g1=jnp.ones((num_layers, 1, D), jnp.float32),
        be1=jnp.zeros((num_layers, 1, D), jnp.float32),
        w1=glorot(k2, (num_layers, D, F)),
        b1=jnp.zeros((num_layers, 1, F), jnp.float32),
        w2=glorot(k3, (num_layers, F, D)),
        b2=jnp.zeros((num_layers, 1, D), jnp.float32),
        g2=jnp.ones((num_layers, 1, D), jnp.float32),
        be2=jnp.zeros((num_layers, 1, D), jnp.float32),
    )


if __name__ == "__main__":
    key = jax.random.PRNGKey(0)
    kx, ka, kp = jax.random.split(key, 3)

    # hidden_dim = 128 so the lane axis is fully dense; num_nodes multiple of 16.
    batch, num_nodes, hidden_dim, num_layers = 2, 16, 128, 2

    x = jax.random.normal(kx, (batch, num_nodes, hidden_dim), jnp.float32)
    adj = (jax.random.uniform(ka, (batch, num_nodes, num_nodes)) < 0.3).astype(jnp.float32)
    adj = adj * (1.0 - jnp.eye(num_nodes)[None])   # zero diagonal; self-loops added in-kernel

    params = init_params(kp, num_layers, hidden_dim)

    out = graph_conv_encoder(x, adj, params)       # batch_tile auto-sized to VMEM
    jax.block_until_ready(out)
    assert out.shape == (batch, num_nodes, hidden_dim)
    assert bool(jnp.all(jnp.isfinite(out)))
    print("KERNEL_OK")
</pallas_src>

<mosaic_0001>
module attributes {stable_mosaic.version = 11 : i64} {
  func.func @kernel(%arg0: i32, %arg1: i32, %arg2: memref<2x16x128xf32, #tpu.memory_space<vmem>>, %arg3: memref<2x16x16xf32, #tpu.memory_space<vmem>>, %arg4: memref<1x128x128xbf16, #tpu.memory_space<vmem>>, %arg5: memref<1x128x512xbf16, #tpu.memory_space<vmem>>, %arg6: memref<1x512x128xbf16, #tpu.memory_space<vmem>>, %arg7: memref<1x8x512xf32, #tpu.memory_space<vmem>>, %arg8: memref<2x16x128xf32, #tpu.memory_space<vmem>>, %arg9: memref<2x16x16xbf16, #tpu.memory_space<vmem>>) attributes {dimension_semantics = [#tpu.dimension_semantics<parallel>, #tpu.dimension_semantics<arbitrary>], iteration_bounds = array<i64: 1, 2>, scalar_prefetch = 0 : i64, scratch_operands = 1 : i64, tpu.core_type = #tpu.core_type<tc>, window_params = [{pipeline_mode = #tpu.pipeline_mode<synchronous>, transform_indices = @transform_0, window_bounds = array<i64: 2, 16, 128>}, {pipeline_mode = #tpu.pipeline_mode<synchronous>, transform_indices = @transform_1, window_bounds = array<i64: 2, 16, 16>}, {transform_indices = @transform_2, window_bounds = array<i64: 1, 128, 128>}, {transform_indices = @transform_3, window_bounds = array<i64: 1, 128, 512>}, {transform_indices = @transform_4, window_bounds = array<i64: 1, 512, 128>}, {transform_indices = @transform_5, window_bounds = array<i64: 1, 8, 512>}, {transform_indices = @transform_6, window_bounds = array<i64: 2, 16, 128>}]} {
    %c0_i32 = arith.constant 0 : i32
    %0 = arith.cmpi eq, %arg1, %c0_i32 : i32
    %1 = arith.extui %0 : i1 to i32
    %c0_i32_0 = arith.constant 0 : i32
    %2 = arith.cmpi ne, %1, %c0_i32_0 : i32
    scf.if %2 {
      %87 = tpu.iota {dimensions = array<i32: 1>} : vector<2x16x16xi32>
      %88 = tpu.iota {dimensions = array<i32: 2>} : vector<2x16x16xi32>
      %89 = arith.cmpi eq, %87, %88 : vector<2x16x16xi32>
      %c0_35 = arith.constant 0 : index
      %c0_36 = arith.constant 0 : index
      %c0_37 = arith.constant 0 : index
      %90 = vector.load %arg3[%c0_35, %c0_36, %c0_37] : memref<2x16x16xf32, #tpu.memory_space<vmem>>, vector<2x16x16xf32>
      %cst_38 = arith.constant 0.000000e+00 : f32
      %91 = vector.broadcast %cst_38 : f32 to vector<2x16x16xf32>
      %92 = arith.cmpf one, %90, %91 : vector<2x16x16xf32>
      %93 = arith.extui %92 : vector<2x16x16xi1> to vector<2x16x16xi32>
      %94 = arith.sitofp %93 : vector<2x16x16xi32> to vector<2x16x16xf32>
      %cst_39 = arith.constant 1.000000e+00 : f32
      %95 = vector.broadcast %cst_39 : f32 to vector<2x16x16xf32>
      %96 = arith.select %89, %95, %94 : vector<2x16x16xi1>, vector<2x16x16xf32>
      %cst_40 = arith.constant dense<0.000000e+00> : vector<2x16xf32>
      %97 = vector.multi_reduction <add>, %96, %cst_40 [1] : vector<2x16x16xf32> to vector<2x16xf32>
      %98 = vector.shape_cast %97 : vector<2x16xf32> to vector<2x1x16xf32>
      %cst_41 = arith.constant 1.000000e+00 : f32
      %99 = vector.broadcast %cst_41 : f32 to vector<2x16x1xf32>
      "tpu.trace_start"() <{level = 10 : i32, message = "bst,bso->bto"}> : () -> ()
      %cst_42 = arith.constant dense<0.000000e+00> : vector<2x16x1xf32>
      %100 = tpu.matmul %96, %99, %cst_42 {dimension_numbers = #tpu.dot_dimension_numbers<[1], [1], [2], [2], [0, 0, 0, 2, 1, 2], [0], [0]>} : vector<2x16x16xf32>, vector<2x16x1xf32>, vector<2x16x1xf32> -> vector<2x16x1xf32>
      %cst_43 = arith.constant 0.000000e+00 : f32
      "tpu.trace_stop"() : () -> ()
      %101 = vector.broadcast %cst_43 : f32 to vector<2x1x16xf32>
      %102 = arith.cmpf ogt, %98, %101 : vector<2x1x16xf32>
      %103 = math.rsqrt %98 : vector<2x1x16xf32>
      %cst_44 = arith.constant 0.000000e+00 : f32
      %104 = vector.broadcast %cst_44 : f32 to vector<2x1x16xf32>
      %105 = arith.select %102, %103, %104 : vector<2x1x16xi1>, vector<2x1x16xf32>
      %cst_45 = arith.constant 0.000000e+00 : f32
      %106 = vector.broadcast %cst_45 : f32 to vector<2x16x1xf32>
      %107 = arith.cmpf ogt, %100, %106 : vector<2x16x1xf32>
      %108 = math.rsqrt %100 : vector<2x16x1xf32>
      %cst_46 = arith.constant 0.000000e+00 : f32
      %109 = vector.broadcast %cst_46 : f32 to vector<2x16x1xf32>
      %110 = arith.select %107, %108, %109 : vector<2x16x1xi1>, vector<2x16x1xf32>
      %111 = vector.broadcast %105 : vector<2x1x16xf32> to vector<2x16x16xf32>
      %112 = arith.mulf %96, %111 : vector<2x16x16xf32>
      %113 = vector.broadcast %110 : vector<2x16x1xf32> to vector<2x16x16xf32>
      %114 = arith.mulf %112, %113 : vector<2x16x16xf32>
      %115 = arith.truncf %114 : vector<2x16x16xf32> to vector<2x16x16xbf16>
      %c0_47 = arith.constant 0 : index
      %c0_48 = arith.constant 0 : index
      %c0_49 = arith.constant 0 : index
      %116 = vector.load %arg9[%c0_47, %c0_48, %c0_49] : memref<2x16x16xbf16, #tpu.memory_space<vmem>>, vector<2x16x16xbf16>
      tpu.vector_store %arg9[%c0_47, %c0_48, %c0_49], %115 {strides = array<i32>} : memref<2x16x16xbf16, #tpu.memory_space<vmem>>, vector<2x16x16xbf16>,
      %c0_50 = arith.constant 0 : index
      %c0_51 = arith.constant 0 : index
      %c0_52 = arith.constant 0 : index
      %117 = vector.load %arg2[%c0_50, %c0_51, %c0_52] : memref<2x16x128xf32, #tpu.memory_space<vmem>>, vector<2x16x128xf32>
      %c0_53 = arith.constant 0 : index
      %c0_54 = arith.constant 0 : index
      %c0_55 = arith.constant 0 : index
      %118 = vector.load %arg8[%c0_53, %c0_54, %c0_55] : memref<2x16x128xf32, #tpu.memory_space<vmem>>, vector<2x16x128xf32>
      tpu.vector_store %arg8[%c0_53, %c0_54, %c0_55], %117 {strides = array<i32>} : memref<2x16x128xf32, #tpu.memory_space<vmem>>, vector<2x16x128xf32>,
    } else {
    }
    %c0 = arith.constant 0 : index
    %c0_1 = arith.constant 0 : index
    %c0_2 = arith.constant 0 : index
    %3 = vector.load %arg4[%c0, %c0_1, %c0_2] : memref<1x128x128xbf16, #tpu.memory_space<vmem>>, vector<1x128x128xbf16>
    %4 = vector.shape_cast %3 : vector<1x128x128xbf16> to vector<128x128xbf16>
    %c0_3 = arith.constant 0 : index
    %c0_4 = arith.constant 0 : index
    %c0_5 = arith.constant 0 : index
    %5 = vector.load %arg5[%c0_3, %c0_4, %c0_5] : memref<1x128x512xbf16, #tpu.memory_space<vmem>>, vector<1x128x512xbf16>
    %6 = vector.shape_cast %5 : vector<1x128x512xbf16> to vector<128x512xbf16>
    %c0_6 = arith.constant 0 : index
    %c0_7 = arith.constant 0 : index
    %c0_8 = arith.constant 0 : index
    %7 = vector.load %arg6[%c0_6, %c0_7, %c0_8] : memref<1x512x128xbf16, #tpu.memory_space<vmem>>, vector<1x512x128xbf16>
    %8 = vector.shape_cast %7 : vector<1x512x128xbf16> to vector<512x128xbf16>
    %c0_9 = arith.constant 0 : index
    %c0_10 = arith.constant 0 : index
    %c0_11 = arith.constant 0 : index
    %9 = vector.load %arg7[%c0_9, %c0_10, %c0_11] : memref<1x8x512xf32, #tpu.memory_space<vmem>>, vector<1x8x512xf32>
    %10 = vector.shape_cast %9 : vector<1x8x512xf32> to vector<8x512xf32>
    %11 = vector.extract_strided_slice %10 {offsets = [0, 0], sizes = [1, 128], strides = [1, 1]} : vector<8x512xf32> to vector<1x128xf32>
    %12 = vector.extract_strided_slice %10 {offsets = [1, 0], sizes = [1, 512], strides = [1, 1]} : vector<8x512xf32> to vector<1x512xf32>
    %13 = vector.extract_strided_slice %10 {offsets = [2, 0], sizes = [1, 128], strides = [1, 1]} : vector<8x512xf32> to vector<1x128xf32>
    %14 = vector.extract_strided_slice %10 {offsets = [3, 0], sizes = [1, 128], strides = [1, 1]} : vector<8x512xf32> to vector<1x128xf32>
    %15 = vector.extract_strided_slice %10 {offsets = [4, 0], sizes = [1, 128], strides = [1, 1]} : vector<8x512xf32> to vector<1x128xf32>
    %16 = vector.extract_strided_slice %10 {offsets = [5, 0], sizes = [1, 128], strides = [1, 1]} : vector<8x512xf32> to vector<1x128xf32>
    %17 = vector.extract_strided_slice %10 {offsets = [6, 0], sizes = [1, 128], strides = [1, 1]} : vector<8x512xf32> to vector<1x128xf32>
    %c0_12 = arith.constant 0 : index
    %c0_13 = arith.constant 0 : index
    %c0_14 = arith.constant 0 : index
    %18 = vector.load %arg8[%c0_12, %c0_13, %c0_14] : memref<2x16x128xf32, #tpu.memory_space<vmem>>, vector<2x16x128xf32>
    %19 = vector.shape_cast %18 : vector<2x16x128xf32> to vector<32x128xf32>
    %20 = arith.truncf %19 : vector<32x128xf32> to vector<32x128xbf16>
    %cst = arith.constant dense<0.000000e+00> : vector<32x128xf32>
    %21 = tpu.matmul %20, %4, %cst {dimension_numbers = #tpu.dot_dimension_numbers<[1], [0], [0], [1], [0, 0, 1, 1], [], []>} : vector<32x128xbf16>, vector<128x128xbf16>, vector<32x128xf32> -> vector<32x128xf32>
    %c0_15 = arith.constant 0 : index
    %c0_16 = arith.constant 0 : index
    %c0_17 = arith.constant 0 : index
    %22 = vector.load %arg9[%c0_15, %c0_16, %c0_17] : memref<2x16x16xbf16, #tpu.memory_space<vmem>>, vector<2x16x16xbf16>
    %23 = arith.truncf %21 : vector<32x128xf32> to vector<32x128xbf16>
    %24 = vector.shape_cast %23 : vector<32x128xbf16> to vector<2x16x128xbf16>
    "tpu.trace_start"() <{level = 10 : i32, message = "bst,bsd->btd"}> : () -> ()
    %cst_18 = arith.constant dense<0.000000e+00> : vector<2x16x128xf32>
    %25 = tpu.matmul %22, %24, %cst_18 {dimension_numbers = #tpu.dot_dimension_numbers<[1], [1], [2], [2], [0, 0, 0, 2, 1, 2], [0], [0]>} : vector<2x16x16xbf16>, vector<2x16x128xbf16>, vector<2x16x128xf32> -> vector<2x16x128xf32>
    "tpu.trace_stop"() : () -> ()
    %26 = vector.shape_cast %25 : vector<2x16x128xf32> to vector<32x128xf32>
    %27 = vector.broadcast %11 : vector<1x128xf32> to vector<32x128xf32>
    %28 = arith.addf %26, %27 : vector<32x128xf32>
    %29 = arith.addf %28, %19 : vector<32x128xf32>
    %cst_19 = arith.constant dense<0.000000e+00> : vector<32xf32>
    %30 = vector.multi_reduction <add>, %29, %cst_19 [1] : vector<32x128xf32> to vector<32xf32>
    %31 = vector.shape_cast %30 : vector<32xf32> to vector<32x1xf32>
    %cst_20 = arith.constant 7.812500e-03 : f32
    %32 = vector.broadcast %cst_20 : f32 to vector<32x1xf32>
    %33 = arith.mulf %31, %32 : vector<32x1xf32>
    %34 = vector.broadcast %33 : vector<32x1xf32> to vector<32x128xf32>
    %35 = arith.subf %29, %34 : vector<32x128xf32>
    %36 = arith.mulf %35, %35 : vector<32x128xf32>
    %cst_21 = arith.constant dense<0.000000e+00> : vector<32xf32>
    %37 = vector.multi_reduction <add>, %36, %cst_21 [1] : vector<32x128xf32> to vector<32xf32>
    %38 = vector.shape_cast %37 : vector<32xf32> to vector<32x1xf32>
    %cst_22 = arith.constant 7.812500e-03 : f32
    %39 = vector.broadcast %cst_22 : f32 to vector<32x1xf32>
    %40 = arith.mulf %38, %39 : vector<32x1xf32>
    %cst_23 = arith.constant 9.99999974E-6 : f32
    %41 = vector.broadcast %cst_23 : f32 to vector<32x1xf32>
    %42 = arith.addf %40, %41 : vector<32x1xf32>
    %43 = math.rsqrt %42 : vector<32x1xf32>
    %44 = vector.broadcast %43 : vector<32x1xf32> to vector<32x128xf32>
    %45 = arith.mulf %35, %44 : vector<32x128xf32>
    %46 = vector.broadcast %14 : vector<1x128xf32> to vector<32x128xf32>
    %47 = arith.mulf %45, %46 : vector<32x128xf32>
    %48 = vector.broadcast %15 : vector<1x128xf32> to vector<32x128xf32>
    %49 = arith.addf %47, %48 : vector<32x128xf32>
    %50 = arith.truncf %49 : vector<32x128xf32> to vector<32x128xbf16>
    %cst_24 = arith.constant dense<0.000000e+00> : vector<32x512xf32>
    %51 = tpu.matmul %50, %6, %cst_24 {dimension_numbers = #tpu.dot_dimension_numbers<[1], [0], [0], [1], [0, 0, 1, 1], [], []>} : vector<32x128xbf16>, vector<128x512xbf16>, vector<32x512xf32> -> vector<32x512xf32>
    %52 = vector.broadcast %12 : vector<1x512xf32> to vector<32x512xf32>
    %53 = arith.addf %51, %52 : vector<32x512xf32>
    %54 = arith.negf %53 : vector<32x512xf32>
    %55 = math.exp %54 : vector<32x512xf32>
    %cst_25 = arith.constant 1.000000e+00 : f32
    %56 = vector.broadcast %cst_25 : f32 to vector<32x512xf32>
    %57 = arith.addf %56, %55 : vector<32x512xf32>
    %58 = arith.divf %56, %57 : vector<32x512xf32>
    %59 = arith.mulf %53, %58 : vector<32x512xf32>
    %60 = arith.truncf %59 : vector<32x512xf32> to vector<32x512xbf16>
    %cst_26 = arith.constant dense<0.000000e+00> : vector<32x128xf32>
    %61 = tpu.matmul %60, %8, %cst_26 {dimension_numbers = #tpu.dot_dimension_numbers<[1], [0], [0], [1], [0, 0, 1, 1], [], []>} : vector<32x512xbf16>, vector<512x128xbf16>, vector<32x128xf32> -> vector<32x128xf32>
    %62 = vector.broadcast %13 : vector<1x128xf32> to vector<32x128xf32>
    %63 = arith.addf %61, %62 : vector<32x128xf32>
    %64 = arith.addf %63, %49 : vector<32x128xf32>
    %cst_27 = arith.constant dense<0.000000e+00> : vector<32xf32>
    %65 = vector.multi_reduction <add>, %64, %cst_27 [1] : vector<32x128xf32> to vector<32xf32>
    %66 = vector.shape_cast %65 : vector<32xf32> to vector<32x1xf32>
    %cst_28 = arith.constant 7.812500e-03 : f32
    %67 = vector.broadcast %cst_28 : f32 to vector<32x1xf32>
    %68 = arith.mulf %66, %67 : vector<32x1xf32>
    %69 = vector.broadcast %68 : vector<32x1xf32> to vector<32x128xf32>
    %70 = arith.subf %64, %69 : vector<32x128xf32>
    %71 = arith.mulf %70, %70 : vector<32x128xf32>
    %cst_29 = arith.constant dense<0.000000e+00> : vector<32xf32>
    %72 = vector.multi_reduction <add>, %71, %cst_29 [1] : vector<32x128xf32> to vector<32xf32>
    %73 = vector.shape_cast %72 : vector<32xf32> to vector<32x1xf32>
    %cst_30 = arith.constant 7.812500e-03 : f32
    %74 = vector.broadcast %cst_30 : f32 to vector<32x1xf32>
    %75 = arith.mulf %73, %74 : vector<32x1xf32>
    %cst_31 = arith.constant 9.99999974E-6 : f32
    %76 = vector.broadcast %cst_31 : f32 to vector<32x1xf32>
    %77 = arith.addf %75, %76 : vector<32x1xf32>
    %78 = math.rsqrt %77 : vector<32x1xf32>
    %79 = vector.broadcast %78 : vector<32x1xf32> to vector<32x128xf32>
    %80 = arith.mulf %70, %79 : vector<32x128xf32>
    %81 = vector.broadcast %16 : vector<1x128xf32> to vector<32x128xf32>
    %82 = arith.mulf %80, %81 : vector<32x128xf32>
    %83 = vector.broadcast %17 : vector<1x128xf32> to vector<32x128xf32>
    %84 = arith.addf %82, %83 : vector<32x128xf32>
    %85 = vector.shape_cast %84 : vector<32x128xf32> to vector<2x16x128xf32>
    %c0_32 = arith.constant 0 : index
    %c0_33 = arith.constant 0 : index
    %c0_34 = arith.constant 0 : index
    %86 = vector.load %arg8[%c0_32, %c0_33, %c0_34] : memref<2x16x128xf32, #tpu.memory_space<vmem>>, vector<2x16x128xf32>
    tpu.vector_store %arg8[%c0_32, %c0_33, %c0_34], %85 {strides = array<i32>} : memref<2x16x128xf32, #tpu.memory_space<vmem>>, vector<2x16x128xf32>,
    return
  }
  func.func @transform_0(%arg0: i32, %arg1: i32) -> (i32, i32, i32) {
    %c0_i32 = arith.constant 0 : i32
    %c0_i32_0 = arith.constant 0 : i32
    %c0_i32_1 = arith.constant 0 : i32
    return %arg0, %c0_i32, %c0_i32_0 : i32, i32, i32
  }
  func.func @transform_1(%arg0: i32, %arg1: i32) -> (i32, i32, i32) {
    %c0_i32 = arith.constant 0 : i32
    %c0_i32_0 = arith.constant 0 : i32
    %c0_i32_1 = arith.constant 0 : i32
    return %arg0, %c0_i32, %c0_i32_0 : i32, i32, i32
  }
  func.func @transform_2(%arg0: i32, %arg1: i32) -> (i32, i32, i32) {
    %c0_i32 = arith.constant 0 : i32
    %c0_i32_0 = arith.constant 0 : i32
    %c0_i32_1 = arith.constant 0 : i32
    return %arg1, %c0_i32, %c0_i32_0 : i32, i32, i32
  }
  func.func @transform_3(%arg0: i32, %arg1: i32) -> (i32, i32, i32) {
    %c0_i32 = arith.constant 0 : i32
    %c0_i32_0 = arith.constant 0 : i32
    %c0_i32_1 = arith.constant 0 : i32
    return %arg1, %c0_i32, %c0_i32_0 : i32, i32, i32
  }
  func.func @transform_4(%arg0: i32, %arg1: i32) -> (i32, i32, i32) {
    %c0_i32 = arith.constant 0 : i32
    %c0_i32_0 = arith.constant 0 : i32
    %c0_i32_1 = arith.constant 0 : i32
    return %arg1, %c0_i32, %c0_i32_0 : i32, i32, i32
  }
  func.func @transform_5(%arg0: i32, %arg1: i32) -> (i32, i32, i32) {
    %c0_i32 = arith.constant 0 : i32
    %c0_i32_0 = arith.constant 0 : i32
    %c0_i32_1 = arith.constant 0 : i32
    return %arg1, %c0_i32, %c0_i32_0 : i32, i32, i32
  }
  func.func @transform_6(%arg0: i32, %arg1: i32) -> (i32, i32, i32) {
    %c0_i32 = arith.constant 0 : i32
    %c0_i32_0 = arith.constant 0 : i32
    %c0_i32_1 = arith.constant 0 : i32
    return %arg0, %c0_i32, %c0_i32_0 : i32, i32, i32
  }
}

module attributes {stable_mosaic.version = 11 : i64} {
  func.func @kernel(%arg0: i32, %arg1: i32, %arg2: memref<2x16x128xf32, #tpu.memory_space<vmem>>, %arg3: memref<2x16x16xf32, #tpu.memory_space<vmem>>, %arg4: memref<1x128x128xbf16, #tpu.memory_space<vmem>>, %arg5: memref<1x128x512xbf16, #tpu.memory_space<vmem>>, %arg6: memref<1x512x128xbf16, #tpu.memory_space<vmem>>, %arg7: memref<1x8x512xf32, #tpu.memory_space<vmem>>, %arg8: memref<2x16x128xf32, #tpu.memory_space<vmem>>, %arg9: memref<2x16x16xbf16, #tpu.memory_space<vmem>>) attributes {dimension_semantics = [#tpu.dimension_semantics<parallel>, #tpu.dimension_semantics<arbitrary>], iteration_bounds = array<i64: 1, 2>, scalar_prefetch = 0 : i64, scratch_operands = 1 : i64, tpu.core_type = #tpu.core_type<tc>, window_params = [{transform_indices = @transform_0, window_bounds = array<i64: 2, 16, 128>}, {transform_indices = @transform_1, window_bounds = array<i64: 2, 16, 16>}, {transform_indices = @transform_2, window_bounds = array<i64: 1, 128, 128>}, {transform_indices = @transform_3, window_bounds = array<i64: 1, 128, 512>}, {transform_indices = @transform_4, window_bounds = array<i64: 1, 512, 128>}, {transform_indices = @transform_5, window_bounds = array<i64: 1, 8, 512>}, {transform_indices = @transform_6, window_bounds = array<i64: 2, 16, 128>}]} {
    %c0_i32 = arith.constant 0 : i32
    %0 = arith.cmpi eq, %arg1, %c0_i32 : i32
    %1 = arith.extui %0 : i1 to i32
    %c0_i32_0 = arith.constant 0 : i32
    %2 = arith.cmpi ne, %1, %c0_i32_0 : i32
    scf.if %2 {
      %87 = tpu.iota {dimensions = array<i32: 1>} : vector<2x16x16xi32>
      %88 = tpu.iota {dimensions = array<i32: 2>} : vector<2x16x16xi32>
      %89 = arith.cmpi eq, %87, %88 : vector<2x16x16xi32>
      %c0_35 = arith.constant 0 : index
      %c0_36 = arith.constant 0 : index
      %c0_37 = arith.constant 0 : index
      %90 = vector.load %arg3[%c0_35, %c0_36, %c0_37] : memref<2x16x16xf32, #tpu.memory_space<vmem>>, vector<2x16x16xf32>
      %cst_38 = arith.constant 0.000000e+00 : f32
      %91 = vector.broadcast %cst_38 : f32 to vector<2x16x16xf32>
      %92 = arith.cmpf one, %90, %91 : vector<2x16x16xf32>
      %93 = arith.extui %92 : vector<2x16x16xi1> to vector<2x16x16xi32>
      %94 = arith.sitofp %93 : vector<2x16x16xi32> to vector<2x16x16xf32>
      %cst_39 = arith.constant 1.000000e+00 : f32
      %95 = vector.broadcast %cst_39 : f32 to vector<2x16x16xf32>
      %96 = arith.select %89, %95, %94 : vector<2x16x16xi1>, vector<2x16x16xf32>
      %cst_40 = arith.constant dense<0.000000e+00> : vector<2x16xf32>
      %97 = vector.multi_reduction <add>, %96, %cst_40 [1] : vector<2x16x16xf32> to vector<2x16xf32>
      %98 = vector.shape_cast %97 : vector<2x16xf32> to vector<2x1x16xf32>
      %cst_41 = arith.constant 1.000000e+00 : f32
      %99 = vector.broadcast %cst_41 : f32 to vector<2x16x1xf32>
      "tpu.trace_start"() <{level = 10 : i32, message = "bst,bso->bto"}> : () -> ()
      %cst_42 = arith.constant dense<0.000000e+00> : vector<2x16x1xf32>
      %100 = tpu.matmul %96, %99, %cst_42 {dimension_numbers = #tpu.dot_dimension_numbers<[1], [1], [2], [2], [0, 0, 0, 2, 1, 2], [0], [0]>} : vector<2x16x16xf32>, vector<2x16x1xf32>, vector<2x16x1xf32> -> vector<2x16x1xf32>
      %cst_43 = arith.constant 0.000000e+00 : f32
      "tpu.trace_stop"() : () -> ()
      %101 = vector.broadcast %cst_43 : f32 to vector<2x1x16xf32>
      %102 = arith.cmpf ogt, %98, %101 : vector<2x1x16xf32>
      %103 = math.rsqrt %98 : vector<2x1x16xf32>
      %cst_44 = arith.constant 0.000000e+00 : f32
      %104 = vector.broadcast %cst_44 : f32 to vector<2x1x16xf32>
      %105 = arith.select %102, %103, %104 : vector<2x1x16xi1>, vector<2x1x16xf32>
      %cst_45 = arith.constant 0.000000e+00 : f32
      %106 = vector.broadcast %cst_45 : f32 to vector<2x16x1xf32>
      %107 = arith.cmpf ogt, %100, %106 : vector<2x16x1xf32>
      %108 = math.rsqrt %100 : vector<2x16x1xf32>
      %cst_46 = arith.constant 0.000000e+00 : f32
      %109 = vector.broadcast %cst_46 : f32 to vector<2x16x1xf32>
      %110 = arith.select %107, %108, %109 : vector<2x16x1xi1>, vector<2x16x1xf32>
      %111 = vector.broadcast %105 : vector<2x1x16xf32> to vector<2x16x16xf32>
      %112 = arith.mulf %96, %111 : vector<2x16x16xf32>
      %113 = vector.broadcast %110 : vector<2x16x1xf32> to vector<2x16x16xf32>
      %114 = arith.mulf %112, %113 : vector<2x16x16xf32>
      %115 = arith.truncf %114 : vector<2x16x16xf32> to vector<2x16x16xbf16>
      %c0_47 = arith.constant 0 : index
      %c0_48 = arith.constant 0 : index
      %c0_49 = arith.constant 0 : index
      %116 = vector.load %arg9[%c0_47, %c0_48, %c0_49] : memref<2x16x16xbf16, #tpu.memory_space<vmem>>, vector<2x16x16xbf16>
      tpu.vector_store %arg9[%c0_47, %c0_48, %c0_49], %115 {strides = array<i32>} : memref<2x16x16xbf16, #tpu.memory_space<vmem>>, vector<2x16x16xbf16>,
      %c0_50 = arith.constant 0 : index
      %c0_51 = arith.constant 0 : index
      %c0_52 = arith.constant 0 : index
      %117 = vector.load %arg2[%c0_50, %c0_51, %c0_52] : memref<2x16x128xf32, #tpu.memory_space<vmem>>, vector<2x16x128xf32>
      %c0_53 = arith.constant 0 : index
      %c0_54 = arith.constant 0 : index
      %c0_55 = arith.constant 0 : index
      %118 = vector.load %arg8[%c0_53, %c0_54, %c0_55] : memref<2x16x128xf32, #tpu.memory_space<vmem>>, vector<2x16x128xf32>
      tpu.vector_store %arg8[%c0_53, %c0_54, %c0_55], %117 {strides = array<i32>} : memref<2x16x128xf32, #tpu.memory_space<vmem>>, vector<2x16x128xf32>,
    } else {
    }
    %c0 = arith.constant 0 : index
    %c0_1 = arith.constant 0 : index
    %c0_2 = arith.constant 0 : index
    %3 = vector.load %arg4[%c0, %c0_1, %c0_2] : memref<1x128x128xbf16, #tpu.memory_space<vmem>>, vector<1x128x128xbf16>
    %4 = vector.shape_cast %3 : vector<1x128x128xbf16> to vector<128x128xbf16>
    %c0_3 = arith.constant 0 : index
    %c0_4 = arith.constant 0 : index
    %c0_5 = arith.constant 0 : index
    %5 = vector.load %arg5[%c0_3, %c0_4, %c0_5] : memref<1x128x512xbf16, #tpu.memory_space<vmem>>, vector<1x128x512xbf16>
    %6 = vector.shape_cast %5 : vector<1x128x512xbf16> to vector<128x512xbf16>
    %c0_6 = arith.constant 0 : index
    %c0_7 = arith.constant 0 : index
    %c0_8 = arith.constant 0 : index
    %7 = vector.load %arg6[%c0_6, %c0_7, %c0_8] : memref<1x512x128xbf16, #tpu.memory_space<vmem>>, vector<1x512x128xbf16>
    %8 = vector.shape_cast %7 : vector<1x512x128xbf16> to vector<512x128xbf16>
    %c0_9 = arith.constant 0 : index
    %c0_10 = arith.constant 0 : index
    %c0_11 = arith.constant 0 : index
    %9 = vector.load %arg7[%c0_9, %c0_10, %c0_11] : memref<1x8x512xf32, #tpu.memory_space<vmem>>, vector<1x8x512xf32>
    %10 = vector.shape_cast %9 : vector<1x8x512xf32> to vector<8x512xf32>
    %11 = vector.extract_strided_slice %10 {offsets = [0, 0], sizes = [1, 128], strides = [1, 1]} : vector<8x512xf32> to vector<1x128xf32>
    %12 = vector.extract_strided_slice %10 {offsets = [1, 0], sizes = [1, 512], strides = [1, 1]} : vector<8x512xf32> to vector<1x512xf32>
    %13 = vector.extract_strided_slice %10 {offsets = [2, 0], sizes = [1, 128], strides = [1, 1]} : vector<8x512xf32> to vector<1x128xf32>
    %14 = vector.extract_strided_slice %10 {offsets = [3, 0], sizes = [1, 128], strides = [1, 1]} : vector<8x512xf32> to vector<1x128xf32>
    %15 = vector.extract_strided_slice %10 {offsets = [4, 0], sizes = [1, 128], strides = [1, 1]} : vector<8x512xf32> to vector<1x128xf32>
    %16 = vector.extract_strided_slice %10 {offsets = [5, 0], sizes = [1, 128], strides = [1, 1]} : vector<8x512xf32> to vector<1x128xf32>
    %17 = vector.extract_strided_slice %10 {offsets = [6, 0], sizes = [1, 128], strides = [1, 1]} : vector<8x512xf32> to vector<1x128xf32>
    %c0_12 = arith.constant 0 : index
    %c0_13 = arith.constant 0 : index
    %c0_14 = arith.constant 0 : index
    %18 = vector.load %arg8[%c0_12, %c0_13, %c0_14] : memref<2x16x128xf32, #tpu.memory_space<vmem>>, vector<2x16x128xf32>
    %19 = vector.shape_cast %18 : vector<2x16x128xf32> to vector<32x128xf32>
    %20 = arith.truncf %19 : vector<32x128xf32> to vector<32x128xbf16>
    %cst = arith.constant dense<0.000000e+00> : vector<32x128xf32>
    %21 = tpu.matmul %20, %4, %cst {dimension_numbers = #tpu.dot_dimension_numbers<[1], [0], [0], [1], [0, 0, 1, 1], [], []>} : vector<32x128xbf16>, vector<128x128xbf16>, vector<32x128xf32> -> vector<32x128xf32>
    %c0_15 = arith.constant 0 : index
    %c0_16 = arith.constant 0 : index
    %c0_17 = arith.constant 0 : index
    %22 = vector.load %arg9[%c0_15, %c0_16, %c0_17] : memref<2x16x16xbf16, #tpu.memory_space<vmem>>, vector<2x16x16xbf16>
    %23 = arith.truncf %21 : vector<32x128xf32> to vector<32x128xbf16>
    %24 = vector.shape_cast %23 : vector<32x128xbf16> to vector<2x16x128xbf16>
    "tpu.trace_start"() <{level = 10 : i32, message = "bst,bsd->btd"}> : () -> ()
    %cst_18 = arith.constant dense<0.000000e+00> : vector<2x16x128xf32>
    %25 = tpu.matmul %22, %24, %cst_18 {dimension_numbers = #tpu.dot_dimension_numbers<[1], [1], [2], [2], [0, 0, 0, 2, 1, 2], [0], [0]>} : vector<2x16x16xbf16>, vector<2x16x128xbf16>, vector<2x16x128xf32> -> vector<2x16x128xf32>
    "tpu.trace_stop"() : () -> ()
    %26 = vector.shape_cast %25 : vector<2x16x128xf32> to vector<32x128xf32>
    %27 = vector.broadcast %11 : vector<1x128xf32> to vector<32x128xf32>
    %28 = arith.addf %26, %27 : vector<32x128xf32>
    %29 = arith.addf %28, %19 : vector<32x128xf32>
    %cst_19 = arith.constant dense<0.000000e+00> : vector<32xf32>
    %30 = vector.multi_reduction <add>, %29, %cst_19 [1] : vector<32x128xf32> to vector<32xf32>
    %31 = vector.shape_cast %30 : vector<32xf32> to vector<32x1xf32>
    %cst_20 = arith.constant 7.812500e-03 : f32
    %32 = vector.broadcast %cst_20 : f32 to vector<32x1xf32>
    %33 = arith.mulf %31, %32 : vector<32x1xf32>
    %34 = vector.broadcast %33 : vector<32x1xf32> to vector<32x128xf32>
    %35 = arith.subf %29, %34 : vector<32x128xf32>
    %36 = arith.mulf %35, %35 : vector<32x128xf32>
    %cst_21 = arith.constant dense<0.000000e+00> : vector<32xf32>
    %37 = vector.multi_reduction <add>, %36, %cst_21 [1] : vector<32x128xf32> to vector<32xf32>
    %38 = vector.shape_cast %37 : vector<32xf32> to vector<32x1xf32>
    %cst_22 = arith.constant 7.812500e-03 : f32
    %39 = vector.broadcast %cst_22 : f32 to vector<32x1xf32>
    %40 = arith.mulf %38, %39 : vector<32x1xf32>
    %cst_23 = arith.constant 9.99999974E-6 : f32
    %41 = vector.broadcast %cst_23 : f32 to vector<32x1xf32>
    %42 = arith.addf %40, %41 : vector<32x1xf32>
    %43 = math.rsqrt %42 : vector<32x1xf32>
    %44 = vector.broadcast %43 : vector<32x1xf32> to vector<32x128xf32>
    %45 = arith.mulf %35, %44 : vector<32x128xf32>
    %46 = vector.broadcast %14 : vector<1x128xf32> to vector<32x128xf32>
    %47 = arith.mulf %45, %46 : vector<32x128xf32>
    %48 = vector.broadcast %15 : vector<1x128xf32> to vector<32x128xf32>
    %49 = arith.addf %47, %48 : vector<32x128xf32>
    %50 = arith.truncf %49 : vector<32x128xf32> to vector<32x128xbf16>
    %cst_24 = arith.constant dense<0.000000e+00> : vector<32x512xf32>
    %51 = tpu.matmul %50, %6, %cst_24 {dimension_numbers = #tpu.dot_dimension_numbers<[1], [0], [0], [1], [0, 0, 1, 1], [], []>} : vector<32x128xbf16>, vector<128x512xbf16>, vector<32x512xf32> -> vector<32x512xf32>
    %52 = vector.broadcast %12 : vector<1x512xf32> to vector<32x512xf32>
    %53 = arith.addf %51, %52 : vector<32x512xf32>
    %54 = arith.negf %53 : vector<32x512xf32>
    %55 = math.exp %54 : vector<32x512xf32>
    %cst_25 = arith.constant 1.000000e+00 : f32
    %56 = vector.broadcast %cst_25 : f32 to vector<32x512xf32>
    %57 = arith.addf %56, %55 : vector<32x512xf32>
    %58 = arith.divf %56, %57 : vector<32x512xf32>
    %59 = arith.mulf %53, %58 : vector<32x512xf32>
    %60 = arith.truncf %59 : vector<32x512xf32> to vector<32x512xbf16>
    %cst_26 = arith.constant dense<0.000000e+00> : vector<32x128xf32>
    %61 = tpu.matmul %60, %8, %cst_26 {dimension_numbers = #tpu.dot_dimension_numbers<[1], [0], [0], [1], [0, 0, 1, 1], [], []>} : vector<32x512xbf16>, vector<512x128xbf16>, vector<32x128xf32> -> vector<32x128xf32>
    %62 = vector.broadcast %13 : vector<1x128xf32> to vector<32x128xf32>
    %63 = arith.addf %61, %62 : vector<32x128xf32>
    %64 = arith.addf %63, %49 : vector<32x128xf32>
    %cst_27 = arith.constant dense<0.000000e+00> : vector<32xf32>
    %65 = vector.multi_reduction <add>, %64, %cst_27 [1] : vector<32x128xf32> to vector<32xf32>
    %66 = vector.shape_cast %65 : vector<32xf32> to vector<32x1xf32>
    %cst_28 = arith.constant 7.812500e-03 : f32
    %67 = vector.broadcast %cst_28 : f32 to vector<32x1xf32>
    %68 = arith.mulf %66, %67 : vector<32x1xf32>
    %69 = vector.broadcast %68 : vector<32x1xf32> to vector<32x128xf32>
    %70 = arith.subf %64, %69 : vector<32x128xf32>
    %71 = arith.mulf %70, %70 : vector<32x128xf32>
    %cst_29 = arith.constant dense<0.000000e+00> : vector<32xf32>
    %72 = vector.multi_reduction <add>, %71, %cst_29 [1] : vector<32x128xf32> to vector<32xf32>
    %73 = vector.shape_cast %72 : vector<32xf32> to vector<32x1xf32>
    %cst_30 = arith.constant 7.812500e-03 : f32
    %74 = vector.broadcast %cst_30 : f32 to vector<32x1xf32>
    %75 = arith.mulf %73, %74 : vector<32x1xf32>
    %cst_31 = arith.constant 9.99999974E-6 : f32
    %76 = vector.broadcast %cst_31 : f32 to vector<32x1xf32>
    %77 = arith.addf %75, %76 : vector<32x1xf32>
    %78 = math.rsqrt %77 : vector<32x1xf32>
    %79 = vector.broadcast %78 : vector<32x1xf32> to vector<32x128xf32>
    %80 = arith.mulf %70, %79 : vector<32x128xf32>
    %81 = vector.broadcast %16 : vector<1x128xf32> to vector<32x128xf32>
    %82 = arith.mulf %80, %81 : vector<32x128xf32>
    %83 = vector.broadcast %17 : vector<1x128xf32> to vector<32x128xf32>
    %84 = arith.addf %82, %83 : vector<32x128xf32>
    %85 = vector.shape_cast %84 : vector<32x128xf32> to vector<2x16x128xf32>
    %c0_32 = arith.constant 0 : index
    %c0_33 = arith.constant 0 : index
    %c0_34 = arith.constant 0 : index
    %86 = vector.load %arg8[%c0_32, %c0_33, %c0_34] : memref<2x16x128xf32, #tpu.memory_space<vmem>>, vector<2x16x128xf32>
    tpu.vector_store %arg8[%c0_32, %c0_33, %c0_34], %85 {strides = array<i32>} : memref<2x16x128xf32, #tpu.memory_space<vmem>>, vector<2x16x128xf32>,
    return
  }
  func.func @transform_0(%arg0: i32, %arg1: i32) -> (i32, i32, i32) {
    %c0_i32 = arith.constant 0 : i32
    %c0_i32_0 = arith.constant 0 : i32
    %c0_i32_1 = arith.constant 0 : i32
    return %arg0, %c0_i32, %c0_i32_0 : i32, i32, i32
  }
  func.func @transform_1(%arg0: i32, %arg1: i32) -> (i32, i32, i32) {
    %c0_i32 = arith.constant 0 : i32
    %c0_i32_0 = arith.constant 0 : i32
    %c0_i32_1 = arith.constant 0 : i32
    return %arg0, %c0_i32, %c0_i32_0 : i32, i32, i32
  }
  func.func @transform_2(%arg0: i32, %arg1: i32) -> (i32, i32, i32) {
    %c0_i32 = arith.constant 0 : i32
    %c0_i32_0 = arith.constant 0 : i32
    %c0_i32_1 = arith.constant 0 : i32
    return %arg1, %c0_i32, %c0_i32_0 : i32, i32, i32
  }
  func.func @transform_3(%arg0: i32, %arg1: i32) -> (i32, i32, i32) {
    %c0_i32 = arith.constant 0 : i32
    %c0_i32_0 = arith.constant 0 : i32
    %c0_i32_1 = arith.constant 0 : i32
    return %arg1, %c0_i32, %c0_i32_0 : i32, i32, i32
  }
  func.func @transform_4(%arg0: i32, %arg1: i32) -> (i32, i32, i32) {
    %c0_i32 = arith.constant 0 : i32
    %c0_i32_0 = arith.constant 0 : i32
    %c0_i32_1 = arith.constant 0 : i32
    return %arg1, %c0_i32, %c0_i32_0 : i32, i32, i32
  }
  func.func @transform_5(%arg0: i32, %arg1: i32) -> (i32, i32, i32) {
    %c0_i32 = arith.constant 0 : i32
    %c0_i32_0 = arith.constant 0 : i32
    %c0_i32_1 = arith.constant 0 : i32
    return %arg1, %c0_i32, %c0_i32_0 : i32, i32, i32
  }
  func.func @transform_6(%arg0: i32, %arg1: i32) -> (i32, i32, i32) {
    %c0_i32 = arith.constant 0 : i32
    %c0_i32_0 = arith.constant 0 : i32
    %c0_i32_1 = arith.constant 0 : i32
    return %arg0, %c0_i32, %c0_i32_0 : i32, i32, i32
  }
}

</mosaic_0001>

<bundles_post_ra>
// kernel: tpu_custom_call.1
= control target key start
LH: loop header
LB: loop body
LE: loop exit
PB: predicated region body
PF: predicated region fallthrough
CT: control target
= control target key end

     0   :  { %s3387_s0 = inlined_call_operand.hbm [shape: f32[2,16,128], index: 0, kind: input, shape index: {}, may-alias: {0,6}]   ;;  %s3388_s1 = inlined_call_operand.hbm [shape: f32[2,16,16], index: 1, kind: input, shape index: {}]   ;;  %s3389_s2 = inlined_call_operand.hbm [shape: bf16[2,128,128], index: 2, kind: input, shape index: {}]   ;;  %s3390_s3 = inlined_call_operand.hbm [shape: bf16[2,128,512], index: 3, kind: input, shape index: {}]   ;;  %s3391_s4 = inlined_call_operand.hbm [shape: bf16[2,512,128], index: 4, kind: input, shape index: {}]   ;;  %s3392_s5 = inlined_call_operand.vmem [shape: f32[2,8,512], index: 5, kind: input, shape index: {}]   ;;  %s3393_s6 = inlined_call_operand.hbm [shape: f32[2,16,128], index: 6, kind: output, shape index: {}, may-alias: {0,6}]  }
   0x1   :  { %3398 = sst [smem:[#allocation16_spill]] %s3387_s0 }
   0x2   :  { %3399 = sst [smem:[#allocation17_spill]] %s3389_s2 }
   0x3   :  { %3400 = sst [smem:[#allocation18_spill]] %s3392_s5 }
   0x4   :  { %3401 = sst [smem:[#allocation19_spill]] %s3393_s6 }
   0x5   :  { %11 = vsyncpa [#allocation4], 0 }
   0x6   :  { %12 = vsyncpa [#allocation7], 0 }
   0x7   :  { %13 = vsyncpa [#allocation5], 0  ;;  %s2961_s21 = smov 0   ;;  %s2963_s22 = smov 0  }
   0x8   :  { %s2965_s23 = smov 0   ;;  %s2967_s24 = smov 0  }
   0x9   :  { %s2969_s25 = smov 0   ;;  %s2971_s26 = smov 0  }
   0xa LB: > { %s2990_s27 = sadd.s32 4294967295, %s2904_s26   ;;  %p97_p0 = scmp.ne.s32.totalorder %s2892_s23, %s2888_s22  ;;  %s2904_s26 = sphi %s2971_s26, %s19_s26   ;;  %s2900_s25 = sphi %s2969_s25, %s3422_s25   ;;  %s2896_s24 = sphi %s2967_s24, %s3421_s24   ;;  %s2892_s23 = sphi %s2965_s23, %s3420_s23   ;;  %s2888_s22 = sphi %s2963_s22, %s3419_s22   ;;  %s2884_s21 = sphi %s2961_s21, %s3418_s21  }
   0xb   : > { %p98_p1 = scmp.eq.s32.totalorder %s2904_s26, 0  ;;  %p103_p2 = scmp.ne.s32.totalorder %s2888_s22, %s2884_s21 }
   0xc   : > { %p3394_p3 = scmp.eq.s32.totalorder %s2990_s27, 0  ;;  %p2115_p5 = scmp.ge.s32.totalorder %s2904_s26, 1 }
   0xd   : > { %p99_p4 = por %p98_p1, %p97_p0  ;;  %p218_p7 = scmp.lt.s32.totalorder %s2904_s26, 3 }
   0xe   : > { %p3001_p6 = por %p3394_p3, %p103_p2  ;;  %s2906_s7 = smov [#allocation3]  }
   0xf   : > { %p3006_p8 = pnand %p2115_p5, %p218_p7  ;;  %s234_s8 = sshll.u32 %s2906_s7, 4  ;;  %s235_s8 = int_to_ptr.vmem [resolvable:$true] %s234_s8 }
  0x10   : > { %p2414_p10 = scmp.lt.s32.totalorder %s2904_s26, 2  ;;  %s28_s11 = sadd.s32 1, %s2900_s25 }
  0x11   : > { %p2395_p9 = pneg %p3006_p8  ;;  %s2693_s12 = scalar_lea.vmem %s235_s8, 512 }
  0x12   : > { %p3019_p12 = pnand %p2414_p10, %p99_p4  ;;  %p2694_p0 = scmp.ne.s32.totalorder %s235_s8, %s2693_s12 }
  0x13   : > { %p3015_p11 = pnand %p2395_p9, %p3394_p3  ;;  %p2701_p5 = scmp.lt.s32.totalorder %s235_s8, %s235_s8 }
  0x14   : > { %p2702_p7 = scmp.lt.s32.totalorder %s2693_s12, %s2693_s12 }
  0x15   : > { %p2684_p13 = pneg %p3015_p11 }
  0x16   : > { %p2703_p9 = por %p2702_p7, %p2701_p5 }
  0x17   : > { %p2696_p1 = pnand %p2694_p0, %p2684_p13 }
  0x19   : > { %p2697_p2 = pneg %p2696_p1 }
  0x1b   : > { %p2704_p3 = pnand %p2703_p9, %p2697_p2 }
  0x1d   : > { %2707 = shalt.err (!%p2704_p3)
}
  0x1e   : > { %s3395_s13 = smov 128   ;;  %s3396_s14 = smov 8  }
  0x1f   : > { %s3406_s0 = sld [smem:[#allocation16_spill]]  ;;  %p29_p4 = scmp.ge.s32.totalorder %s28_s11, 2 }
  0x20   : > { %s265_s17 = sand.u32 1, %s2904_s26   ;;  %s267_s18 = sand.u32 1, %s2892_s23  }
  0x21   : > { %s3424_s11 = smov (%p29_p4, %s28_s11), 0  ;;  %s2119_s19 = sshll.u32 %s267_s18, 6 }
  0x22   : > { %s87_s20 = ssub.s32 %s2900_s25, %s3424_s11  ;;  %s2245_s21 = sshll.u32 %s2900_s25, 10 }
  0x23   : > { %p88_p3 = scmp.eq.s32.totalorder %s87_s20, 0  ;;  %s3407_s2 = sld [smem:[#allocation17_spill]] }
  0x24   : > { %s269_s6 = scalar_lea.vmem [#allocation8], %s2119_s19  ;;  %s3408_s15 = sadd.s32 1, %s2892_s23 }
  0x25   : > { %2398 = dma.hbm_to_vmem [thread:$0]  (!%p3015_p11), %s3406_s0, 512, %s235_s8, [#allocation4], %s3395_s13, %s3395_s13, %s3396_s14  }
  0x26   : > { %s276_s5 = sshll.u32 %s269_s6, 4  ;;  %s3052_s16 = sshll.u32 %s267_s18, 8  ;;  %s277_s5 = int_to_ptr.vmem [resolvable:$true] %s276_s5 }
  0x27   : > { %s3050_s8 = scalar_select %p88_p3, %s2892_s23, %s3408_s15  }
  0x28   : > { %s3054_s13 = scalar_lea.sflag [#allocation4], %s265_s17  ;;  %p2710_p10 = pneg %p3019_p12 }
  0x29   : > { %s275_s28 = scalar_lea.hbm %s3407_s2, %s2245_s21  ;;  %s2721_s14 = scalar_lea.vmem %s277_s5, 1024 }
  0x2a   : > { %p2722_p0 = scmp.ne.s32.totalorder %s277_s5, %s2721_s14  ;;  %s2909_s20 = smov [#allocation8]  }
  0x2b   : > { %s2726_s21 = sshll.u32 %s2909_s20, 4  ;;  %s2727_s21 = int_to_ptr.vmem [resolvable:$false] %s2726_s21 }
  0x2c   : > { %p2724_p1 = pnand %p2722_p0, %p2710_p10  ;;  %s2728_s6 = scalar_lea.vmem %s2727_s21, 2048 }
  0x2d   : > { %p2729_p5 = scmp.lt.s32.totalorder %s277_s5, %s2727_s21  ;;  %p2730_p7 = scmp.lt.s32.totalorder %s2728_s6, %s2721_s14 }
  0x2e   : > { %p2725_p2 = pneg %p2724_p1 }
  0x2f   : > { %p2731_p9 = por %p2730_p7, %p2729_p5 }
  0x31   : > { %p2732_p4 = pnand %p2731_p9, %p2725_p2 }
  0x33   : > { %2735 = shalt.err (!%p2732_p4)
}
  0x34   : > { %s3397_s18 = smov 64   ;;  %s2911_s17 = smov 4  }
  0x35   : > { %2405 = dma.hbm_to_vmem [thread:$0]  (!%p3019_p12), %s275_s28, 1024, %s277_s5, %s3054_s13, %s3397_s18, %s3397_s18, %s2911_s17  }
  0x36   : > { %s2246_s19 = sshll.u32 %s2900_s25, 12  ;;  %s290_s15 = scalar_lea.vmem [#allocation9], %s3052_s16 }
  0x37   : > { %s296_s14 = scalar_lea.hbm %s3390_s3, %s2246_s19  ;;  %s297_s20 = sshll.u32 %s290_s15, 4  ;;  %s298_s20 = int_to_ptr.vmem [resolvable:$true] %s297_s20 }
  0x38   : > { %s2749_s21 = scalar_lea.vmem %s298_s20, 4096  ;;  %s2912_s6 = smov [#allocation9]  }
  0x39   : > { %p2750_p3 = scmp.ne.s32.totalorder %s298_s20, %s2749_s21  ;;  %s2754_s0 = sshll.u32 %s2912_s6, 4  ;;  %s2755_s0 = int_to_ptr.vmem [resolvable:$false] %s2754_s0 }
  0x3a   : > { %s2756_s2 = scalar_lea.vmem %s2755_s0, 8192  ;;  %p2757_p2 = scmp.lt.s32.totalorder %s298_s20, %s2755_s0 }
  0x3b   : > { %p2752_p0 = pnand %p2750_p3, %p2710_p10  ;;  %p2758_p5 = scmp.lt.s32.totalorder %s2756_s2, %s2749_s21 }
  0x3d   : > { %p2753_p1 = pneg %p2752_p0  ;;  %p2759_p7 = por %p2758_p5, %p2757_p2 }
  0x3f   : > { %p2760_p9 = pnand %p2759_p7, %p2753_p1 }
  0x41   : > { %2763 = shalt.err (!%p2760_p9)
}
  0x42   : > { %s2913_s5 = smov 256   ;;  %s2914_s28 = smov 16  }
  0x43   : > { %2408 = dma.hbm_to_vmem [thread:$0]  (!%p3019_p12), %s296_s14, 4096, %s298_s20, %s3054_s13, %s2913_s5, %s2913_s5, %s2914_s28  }
  0x44   : > { %s2915_s7 = smov [#allocation6]   ;;  %s3081_s6 = scalar_lea.hbm %s3391_s4, %s2246_s19 }
  0x45   : > { %s251_s12 = sshll.u32 %s2915_s7, 4  ;;  %s252_s12 = int_to_ptr.vmem [resolvable:$true] %s251_s12 }
  0x46   : > { %s2775_s0 = scalar_lea.vmem %s252_s12, 512  ;;  %p2783_p1 = scmp.lt.s32.totalorder %s252_s12, %s252_s12 }
  0x47   : > { %p2776_p4 = scmp.ne.s32.totalorder %s252_s12, %s2775_s0  ;;  %p2784_p2 = scmp.lt.s32.totalorder %s2775_s0, %s2775_s0 }
  0x49   : > { %p2778_p3 = pnand %p2776_p4, %p2684_p13  ;;  %p2785_p5 = por %p2784_p2, %p2783_p1 }
  0x4b   : > { %p2779_p0 = pneg %p2778_p3 }
  0x4d   : > { %p2786_p7 = pnand %p2785_p5, %p2779_p0 }
  0x4f   : > { %2789 = shalt.err (!%p2786_p7)
}
  0x50   : > { %s3409_s2 = smov 8   ;;  %s3410_s14 = smov 128  }
  0x51   : > { %2401 = dma.hbm_to_vmem [thread:$0]  (!%p3015_p11), %s3388_s1, 512, %s252_s12, [#allocation7], %s3410_s14, %s3410_s14, %s3409_s2  }
  0x52   : > { %s311_s19 = scalar_lea.vmem [#allocation10], %s3052_s16  ;;  %s2916_s28 = smov [#allocation10]  }
  0x53   : > { %s318_s21 = sshll.u32 %s311_s19, 4  ;;  %s2808_s9 = sshll.u32 %s2916_s28, 4  ;;  %s319_s21 = int_to_ptr.vmem [resolvable:$true] %s318_s21  ;;  %s2809_s9 = int_to_ptr.vmem [resolvable:$false] %s2808_s9 }
  0x54   : > { %s2803_s5 = scalar_lea.vmem %s319_s21, 4096  ;;  %s2810_s7 = scalar_lea.vmem %s2809_s9, 8192 }
  0x55   : > { %p2804_p13 = scmp.ne.s32.totalorder %s319_s21, %s2803_s5  ;;  %p2811_p3 = scmp.lt.s32.totalorder %s319_s21, %s2809_s9 }
  0x56   : > { %p2812_p0 = scmp.lt.s32.totalorder %s2810_s7, %s2803_s5 }
  0x57   : > { %p2806_p9 = pnand %p2804_p13, %p2710_p10 }
  0x58   : > { %p2813_p1 = por %p2812_p0, %p2811_p3 }
  0x59   : > { %p2807_p4 = pneg %p2806_p9 }
  0x5b   : > { %p2814_p2 = pnand %p2813_p1, %p2807_p4 }
  0x5d   : > { %2817 = shalt.err (!%p2814_p2)
}
  0x5e   : > { %s3411_s16 = smov 64   ;;  %338 = sbr.rel (%p3006_p8) target bundleno = 2119 (0x847), region = 44 }
  0x5f   : > { %2411 = dma.hbm_to_vmem [thread:$0]  (!%p3019_p12), %s3081_s6, 4096, %s319_s21, %s3054_s13, %s3411_s16, %s3411_s16, %s2911_s17  }
  0x60   : > { %p3412_p11 = scmp.eq.s32.totalorder (!%p3006_p8), %s2990_s27, 0 }
  0x63   : > { %2867 = dma.done.wait (%p3412_p11), [#allocation4], 512   ;;  %p3413_p10 = pmov %p3412_p11 }
  0x65   : > { %2869 = vsyncadd (%p3413_p10), [#allocation4], 4294966784  ;;  %p3414_p5 = pmov %p3413_p10 }
  0x67   : > { %2871 = dma.done.wait (%p3414_p5), [#allocation7], 512   ;;  %p3415_p7 = pmov %p3414_p5 }
  0x68   : > { %s348_s10 = sand.u32 1, %s2990_s27   ;;  %s350_s13 = sand.u32 1, %s2888_s22  }
  0x69   : > { %2873 = vsyncadd (%p3415_p7), [#allocation7], 4294966784  ;;  %s2131_s17 = sshll.u32 %s350_s13, 6  ;;  %s349_s30 = scalar_lea.sflag [#allocation4], %s348_s10 }
  0x6a   : > { %s3117_s12 = scalar_lea.vmem [#allocation8], %s2131_s17 }
  0x6b   : > { %2875 = dma.done.wait (%p3001_p6), %s349_s30, 9216  }
  0x6c   : > { %2877 = vsyncadd (%p3001_p6), %s349_s30, 4294958080  ;;  %s2132_s15 = sshll.u32 %s350_s13, 8  ;;  %p411_p8 = scmp.lt.s32.totalorder %s2896_s24, 1 }
  0x6d   : > { %s3416_s20 = sld [smem:[#allocation18_spill]]  ;;  %s3130_s19 = scalar_lea.vmem [#allocation9], %s2132_s15 }
  0x6e   : > { %s412_s6 = scalar_select %p411_p8, %s2896_s24, 1 }
  0x6f   : > { %s3132_s21 = scalar_lea.vmem [#allocation10], %s2132_s15  ;;  %p2136_p12 = scmp.ne.s32.totalorder %s2896_s24, 0 }
  0x70   : > { %s2248_s0 = sshll.u32 %s412_s6, 5 }
  0x71   : > { %421 = sbr.rel (%p2136_p12) target bundleno = 602 (0x25a), region = 68 }
  0x73   : > { %s3128_s18 = scalar_lea.vmem %s3416_s20, %s2248_s0 }
  0x76   : > { %v422_v0 = vlaneseq  ;;  %v429_v1 = vld [vmem:[#allocation6] sm:$0xff]  ;;  %v431_v2 = vld [vmem:[#allocation6 + $0x10] sm:$0xff]  ;;  %v430_v3 = vld [vmem:[#allocation6 + $0x8] sm:$0xff]  ;;  %v2917_v7 = vmov 0.0   ;;  %v2918_v16 = vmov 1.0   ;;  %vm449_vm6 = vcmask 130048  }
  0x77   : > { %vm433_vm0 = vcmp.ne.f32.partialorder %v429_v1, 0.0  ;;  %vm435_vm1 = vcmp.ne.f32.partialorder %v431_v2, 0.0  ;;  %v432_v4 = vld [vmem:[#allocation6 + $0x18] sm:$0xff]  ;;  %vm434_vm2 = vcmp.ne.f32.partialorder %v430_v3, 0.0  ;;  %2331 = vmatprep.subr.mxu0 %v2918_v16  ;;  %2338 = vmatprep.subr.mxu1 %v2918_v16  ;;  %v2919_v26 = vmov 0   ;;  %v761_v39 = vld [vmem:[#allocation3] sm:$0xff] }
  0x78   : > { %v423_v5 = vshrl.u32 %v422_v0, 7  ;;  %v426_v6 = vand.u32 127, %v422_v0  ;;  %v2137_v8 = vsel %vm433_vm0, 1.0, %v2917_v7  ;;  %v2139_v9 = vsel %vm435_vm1, 1.0, %v2917_v7  ;;  %2332 = vmatpush3.msra.mxu0 %v2918_v16  ;;  %2339 = vmatpush3.msra.mxu1 %v2918_v16  ;;  %v762_v40 = vld [vmem:[#allocation3 + $0x8] sm:$0xff]  ;;  %v763_v41 = vld [vmem:[#allocation3 + $0x10] sm:$0xff] }
  0x79   : > { %vm436_vm3 = vcmp.ne.f32.partialorder %v432_v4, 0.0  ;;  %v2138_v11 = vsel %vm434_vm2, 1.0, %v2917_v7  ;;  %2333 = vmatprep.subr.mxu0 %v2918_v16  ;;  %2340 = vmatprep.subr.mxu1 %v2918_v16  ;;  %v764_v42 = vld [vmem:[#allocation3 + $0x18] sm:$0xff]  ;;  %765 = vst [vmem:[#allocation11] sm:$0xff] %v761_v39  ;;  %766 = vst [vmem:[#allocation11 + $0x8] sm:$0xff] %v762_v40  ;;  %vm756_vm13 = vcmask 125952  }
  0x7a   : > { %vm427_vm4 = vcmp.eq.s32.totalorder %v423_v5, %v426_v6  ;;  %v424_v10 = vadd.s32 8, %v423_v5  ;;  %v2140_v12 = vsel %vm436_vm3, 1.0, %v2917_v7  ;;  %2334 = vmatpush3.msra.mxu0 %v2918_v16  ;;  %2341 = vmatpush3.msra.mxu1 %v2918_v16  ;;  %767 = vst [vmem:[#allocation11 + $0x10] sm:$0xff] %v763_v41  ;;  %768 = vst [vmem:[#allocation11 + $0x18] sm:$0xff] %v764_v42 }
  0x7b   : > { %v3135_v13 = vsel %vm427_vm4, 1.0, %v2137_v8  ;;  %v3137_v14 = vsel %vm427_vm4, 1.0, %v2139_v9  ;;  %2498 = vset.pattern.permute.xlu1 %v2919_v26 }
  0x7c   : > { %v2484_v15 = vpack.i.bf16 %v3137_v14, %v3135_v13  ;;  %vm428_vm5 = vcmp.eq.s32.totalorder %v424_v10, %v426_v6  ;;  %v450_v43 = vsel %vm449_vm6, %v3135_v13, 0.0  ;;  %v459_v45 = vsel %vm449_vm6, %v3137_v14, 0.0 }
  0x7d   : > { %v3141_v17 = vsel %vm428_vm5, 1.0, %v2138_v11  ;;  %v3143_v18 = vsel %vm428_vm5, 1.0, %v2140_v12 }
  0x7e   : > { %2485 = vxpose.xlu0.b32.start [1/2] (short) (narrow) %v2484_v15, 16  ;;  %v2486_v19 = vpack.i.bf16 %v3143_v18, %v3141_v17  ;;  %v451_v44 = vsel %vm449_vm6, %v3141_v17, 0.0  ;;  %v460_v46 = vsel %vm449_vm6, %v3143_v18, 0.0 }
  0x7f   : > { %v452_v47 = vadd.f32 %v451_v44, %v450_v43  ;;  %v461_v48 = vadd.f32 %v460_v46, %v459_v45 }
  0x81   : > { %v453_v49 = vrot.slane %v452_v47, 4  ;;  %v462_v50 = vrot.slane %v461_v48, 4 }
  0x82   : > { %2487 = vxpose.xlu0.b32.end [2/2] (short) (narrow) %v2486_v19, 16 }
  0x83   : > { %v454_v51 = vadd.f32 %v453_v49, %v452_v47  ;;  %v463_v52 = vadd.f32 %v462_v50, %v461_v48 }
  0x85   : > { %v455_v53 = vrot.slane %v454_v51, 2  ;;  %v464_v54 = vrot.slane %v463_v52, 2 }
  0x87   : > { %v456_v55 = vadd.f32 %v455_v53, %v454_v51  ;;  %v465_v56 = vadd.f32 %v464_v54, %v463_v52 }
  0x89   : > { %v457_v57 = vrot.slane %v456_v55, 1  ;;  %v466_v58 = vrot.slane %v465_v56, 1 }
  0x8b   : > { %v458_v59 = vadd.f32 %v457_v57, %v456_v55  ;;  %v467_v60 = vadd.f32 %v466_v58, %v465_v56 }
  0x8d   : > { %vm694_vm11 = vcmp.gt.f32.partialorder %v458_v59, 0.0  ;;  %vm695_vm12 = vcmp.gt.f32.partialorder %v467_v60, 0.0 }
  0xab   : > { %2499 = vset.pattern.permute.xlu0 %v2919_v26 }
  0xfa   : > { %v2488_v20 = vpop.trf.xlu0 }
  0xfb   : > { %v2489_v21 = vunpack.i.l.bf16 %v2488_v20  ;;  %v2492_v22 = vunpack.i.h.bf16 %v2488_v20 }
  0xfd   : > { %2335 = vmatprep.mubr.msk.f32.mxu0 %vm449_vm6, %v2489_v21  ;;  %2342 = vmatprep.mubr.msk.f32.mxu1 %vm449_vm6, %v2492_v22 }
  0xfe   : > { %v2493_v23 = vpop.trf.xlu0 }
  0xff   : > { %v2497_v24 = vunpack.i.h.bf16 %v2493_v23  ;;  %v2494_v25 = vunpack.i.l.bf16 %v2493_v23 }
 0x101   : > { %2336 = vmatmul.mubr.msk.f32.vlgmr.msra.gmra.mxu0 %vm449_vm6, %v2494_v25  ;;  %2343 = vmatmul.mubr.msk.f32.vlgmr.msra.gmra.mxu1 %vm449_vm6, %v2497_v24 }
 0x1c1   : > { %v2337_v27 = vpop.f32.mrf.mxu0  ;;  %v2344_v28 = vpop.f32.mrf.mxu1 }
 0x1c2   : > { %2500 = vrsqrt.f32 %v2337_v27  ;;  %vm701_vm7 = vcmp.gt.f32.partialorder %v2337_v27, 0.0  ;;  %vm703_vm10 = vcmp.gt.f32.partialorder %v2344_v28, 0.0 }
 0x1c3   : > { %v572_v29 = vpop.f32.mrf.mxu0  ;;  %v685_v30 = vpop.f32.mrf.mxu1 }
 0x1c4   : > { %2502 = vrsqrt.f32 %v572_v29  ;;  %vm702_vm8 = vcmp.gt.f32.partialorder %v685_v30, 0.0  ;;  %vm700_vm9 = vcmp.gt.f32.partialorder %v572_v29, 0.0 }
 0x1c5   : > { %2504 = vrsqrt.f32 %v685_v30 }
 0x1c6   : > { %2506 = vrsqrt.f32 %v2344_v28 }
 0x1c7   : > { %2508 = vrsqrt.f32 %v458_v59 }
 0x1c8   : > { %2510 = vrsqrt.f32 %v467_v60 }
 0x1cf   : > { %v2501_v31 = vpop.eup %2500 }
 0x1d0   : > { %v709_v32 = vsel %vm701_vm7, %v2501_v31, 0.0 }
 0x1d1   : > { %v2503_v33 = vpop.eup %2502  ;;  %723 = vperm.xlu1 %2498, %v709_v32  }
 0x1d2   : > { %v2505_v34 = vpop.eup %2504  ;;  %v708_v36 = vsel %vm700_vm9, %v2503_v33, 0.0 }
 0x1d3   : > { %v710_v35 = vsel %vm702_vm8, %v2505_v34, 0.0  ;;  %v2507_v37 = vpop.eup %2506 }
 0x1d4   : > { %728 = vperm.xlu0 %2499, %v710_v35   ;;  %v711_v38 = vsel %vm703_vm10, %v2507_v37, 0.0  ;;  %v2509_v61 = vpop.eup %2508 }
 0x1d5   : > { %718 = vperm.xlu1 %2498, %v708_v36   ;;  %v2511_v62 = vpop.eup %2510  ;;  %v698_v63 = vsel %vm694_vm11, %v2509_v61, 0.0 }
 0x1d6   : > { %v713_v0 = vmul.f32 %v698_v63, %v3141_v17  ;;  %v699_v1 = vsel %vm695_vm12, %v2511_v62, 0.0  ;;  %v712_v5 = vmul.f32 %v698_v63, %v3135_v13 }
 0x1d7   : > { %v714_v3 = vmul.f32 %v699_v1, %v3137_v14  ;;  %v715_v11 = vmul.f32 %v699_v1, %v3143_v18 }
 0x1d9   : > { %733 = vperm.xlu1 %2498, %v711_v38  }
 0x24c   : > { %v724_v2 = vpop.permute.xlu1 %723 }
 0x24d   : > { %v737_v4 = vmul.f32 %v724_v2, %v713_v0 }
 0x24f   : > { %v2250_v6 = vpack.c.bf16 %v737_v4, %v737_v4  ;;  %v729_v7 = vpop.permute.xlu0 %728 }
 0x250   : > { %v738_v8 = vmul.f32 %v729_v7, %v714_v3  ;;  %v719_v9 = vpop.permute.xlu1 %718 }
 0x251   : > { %758 = vst.msk [vmem:[#allocation2 + $0x4] sm:$0xf] %vm756_vm13, %v2250_v6  ;;  %v736_v10 = vmul.f32 %v719_v9, %v712_v5 }
 0x252   : > { %v2251_v12 = vpack.c.bf16 %v738_v8, %v738_v8 }
 0x253   : > { %v2249_v15 = vpack.c.bf16 %v736_v10, %v736_v10 }
 0x254   : > { %759 = vst.msk [vmem:[#allocation2 + $0x8] sm:$0xf] %vm756_vm13, %v2251_v12  ;;  %v734_v16 = vpop.permute.xlu1 %733 }
 0x255   : > { %757 = vst.msk [vmem:[#allocation2] sm:$0xf] %vm756_vm13, %v2249_v15  ;;  %v739_v17 = vmul.f32 %v734_v16, %v715_v11 }
 0x257   : > { %v2252_v19 = vpack.c.bf16 %v739_v17, %v739_v17 }
 0x259   : > { %760 = vst.msk [vmem:[#allocation2 + $0xc] sm:$0xf] %vm756_vm13, %v2252_v19 }
 0x25a PF: > { %v2512_v13 = vld [vmem:[%s3117_s12 + $0x38] sm:$0xff]   ;;  %v2513_v14 = vld [vmem:[%s3117_s12 + $0x30] sm:$0xff]   ;;  %v2514_v18 = vld [vmem:[%s3117_s12 + $0x28] sm:$0xff]   ;;  %v2920_v33 = vmov 0.0   ;;  %vm2921_vm14 = vmmov 0   ;;  %vm1016_vm15 = vcmask 130048   ;;  %v1127_v42 = vlaneseq }
 0x25b   : > { %2345 = vmatprep.subr.bf16.mxu0 %v2512_v13  ;;  %v2515_v20 = vld [vmem:[%s3117_s12 + $0x20] sm:$0xff]   ;;  %v886_v22 = vld [vmem:[#allocation11 + $0x8] sm:$0xff]  ;;  %v2516_v24 = vld [vmem:[%s3117_s12 + $0x18] sm:$0xff]   ;;  %2365 = vmatprep.subr.bf16.mxu1 %v2920_v33  ;;  %s2923_s24 = smov [#allocation11]   ;;  %p2417_p6 = scmp.eq.s32.totalorder %s2990_s27, 1 }
 0x25c   : > { %2346 = vmatpush3.bf16.msra.mxu0 %v2512_v13  ;;  %v885_v21 = vld [vmem:[#allocation11] sm:$0xff]  ;;  %v2520_v25 = vld [vmem:[#allocation2] sm:$0xff]   ;;  %v2518_v28 = vld [vmem:[%s3117_s12 + $0x8] sm:$0xff]   ;;  %2367 = vmatprep.mubr.msk.bf16.mxu1 %vm2921_vm14, %v2920_v33  ;;  %v3171_v43 = vshrl.u32 %v1127_v42, 7  ;;  %s1975_s29 = sshll.u32 %s2923_s24, 4  ;;  %s1976_s29 = int_to_ptr.vmem [resolvable:$true] %s1975_s29 }
 0x25d   : > { %2347 = vmatprep.subr.bf16.mxu0 %v2513_v14  ;;  %v889_v23 = vpack.c.bf16 %v886_v22, %v885_v21  ;;  %1000 = vxpose.xlu0.c.b16.start.end [1/1] (short) (narrow) %v2520_v25, 16  ;;  %v2517_v27 = vld [vmem:[%s3117_s12 + $0x10] sm:$0xff]   ;;  %v2519_v29 = vld [vmem:[%s3117_s12] sm:$0xff]   ;;  %v888_v31 = vld [vmem:[#allocation11 + $0x18] sm:$0xff]  ;;  %s2818_s5 = scalar_lea.vmem %s1976_s29, 512  ;;  %p2825_p3 = scmp.lt.s32.totalorder %s1976_s29, %s1976_s29 }
 0x25e   : > { %v887_v30 = vld [vmem:[#allocation11 + $0x10] sm:$0xff]  ;;  %v1129_v44 = vsub.s32 0, %v3171_v43  ;;  %v2525_v1 = vld [vmem:[%s3130_s19 + $0xe8] ss:$16 sps:$4 sm:$0xff]   ;;  %v2527_v2 = vld [vmem:[%s3130_s19 + $0xec] ss:$16 sps:$4 sm:$0xff]   ;;  %p2819_p13 = scmp.ne.s32.totalorder %s1976_s29, %s2818_s5  ;;  %p2826_p0 = scmp.lt.s32.totalorder %s2818_s5, %s2818_s5 }
 0x25f   : > { %2361 = vmatprep.mubr.bf16.mxu0 %v889_v23  ;;  %v890_v32 = vpack.c.bf16 %v888_v31, %v887_v30  ;;  %v3175_v45 = vld [vmem:[%s3128_s18] sm:$0xff]  ;;  %v2561_v42 = vld [vmem:[%s3130_s19 + $0x28] ss:$16 sps:$4 sm:$0xff]  }
 0x260   : > { %2348 = vmatpush3.bf16.msra.mxu0 %v2513_v14  ;;  %v2521_v26 = vld [vmem:[#allocation2 + $0x8] sm:$0xff]   ;;  %v1130_v46 = vrot.slane %v3175_v45, %v1129_v44  ;;  %v2522_v63 = vld [vmem:[%s3130_s19 + $0xe0] ss:$16 sps:$4 sm:$0xff]   ;;  %v2524_v0 = vld [vmem:[%s3130_s19 + $0xe4] ss:$16 sps:$4 sm:$0xff]   ;;  %p2820_p9 = pnand %p2819_p13, %p2417_p6  ;;  %p2827_p1 = por %p2826_p0, %p2825_p3 }
 0x261   : > { %2349 = vmatprep.subr.bf16.mxu0 %v2514_v18  ;;  %1067 = vxpose.xlu0.c.b16.start.end [1/1] (short) (narrow) %v2521_v26, 16  ;;  %v2536_v23 = vld [vmem:[%s3130_s19 + $0xa4] ss:$16 sps:$4 sm:$0xff]   ;;  %v2534_v25 = vld [vmem:[%s3130_s19 + $0xa0] ss:$16 sps:$4 sm:$0xff]  }
 0x262   : > { %v2537_v26 = vld [vmem:[%s3130_s19 + $0xa8] ss:$16 sps:$4 sm:$0xff]   ;;  %v2566_v44 = vld [vmem:[%s3130_s19 + $0x4] ss:$16 sps:$4 sm:$0xff]   ;;  %p2821_p4 = pneg %p2820_p9 }
 0x264   : > { %2350 = vmatpush3.bf16.msra.mxu0 %v2514_v18  ;;  %v2530_v18 = vld [vmem:[%s3130_s19 + $0xc4] ss:$16 sps:$4 sm:$0xff]   ;;  %p2828_p2 = pnand %p2827_p1, %p2821_p4 }
 0x265   : > { %2351 = vmatprep.subr.bf16.mxu0 %v2515_v20 }
 0x268   : > { %2352 = vmatpush3.bf16.msra.mxu0 %v2515_v20  ;;  %v2533_v20 = vld [vmem:[%s3130_s19 + $0xcc] ss:$16 sps:$4 sm:$0xff]  }
 0x269   : > { %2353 = vmatprep.subr.bf16.mxu0 %v2516_v24 }
 0x26c   : > { %2354 = vmatpush3.bf16.msra.mxu0 %v2516_v24  ;;  %v2539_v24 = vld [vmem:[%s3130_s19 + $0xac] ss:$16 sps:$4 sm:$0xff]  }
 0x26d   : > { %2355 = vmatprep.subr.bf16.mxu0 %v2517_v27 }
 0x270   : > { %2356 = vmatpush3.bf16.msra.mxu0 %v2517_v27  ;;  %v2542_v27 = vld [vmem:[%s3130_s19 + $0x84] ss:$16 sps:$4 sm:$0xff]  }
 0x271   : > { %2357 = vmatprep.subr.bf16.mxu0 %v2518_v28 }
 0x274   : > { %2358 = vmatpush3.bf16.msra.mxu0 %v2518_v28  ;;  %v2545_v28 = vld [vmem:[%s3130_s19 + $0x8c] ss:$16 sps:$4 sm:$0xff]  }
 0x275   : > { %2359 = vmatprep.subr.bf16.mxu0 %v2519_v29 }
 0x278   : > { %2360 = vmatpush3.bf16.msra.mxu0 %v2519_v29  ;;  %v2540_v29 = vld [vmem:[%s3130_s19 + $0x80] ss:$16 sps:$4 sm:$0xff]  }
 0x279   : > { %1430 = vmatprep.subr.bf16.mxu0 %v2527_v2  ;;  %v1193_v2 = vsub.s32 4, %v3171_v43 }
 0x27b   : > { %2362 = vmatmul.mubr.bf16.vlgmr.msra.gmra.mxu0 %v890_v32  ;;  %v2551_v32 = vld [vmem:[%s3130_s19 + $0x6c] ss:$16 sps:$4 sm:$0xff]  }
 0x27c   : > { %1431 = vmatpush1.bf16.msra.mxu0 %v2525_v1 }
 0x27d   : > { %1432 = vmatprep.subr.bf16.mxu0 %v2533_v20 }
 0x2bf   : > { %v1008_v39 = vpop.trf.xlu0 }
 0x2c3   : > { %v1075_v41 = vpop.trf.xlu0 }
 0x33b   : > { %v2363_v34 = vpop.f32.mrf.mxu0 }
 0x33d   : > { %v973_v35 = vpop.f32.mrf.mxu0 }
 0x33f   : > { %v2364_v36 = vpop.f32.mrf.mxu0 }
 0x340   : > { %v993_v40 = vpack.c.bf16 %v2364_v36, %v2363_v34  ;;  %v2549_v34 = vld [vmem:[%s3130_s19 + $0x68] ss:$16 sps:$4 sm:$0xff]   ;;  %v2554_v36 = vld [vmem:[%s3130_s19 + $0x44] ss:$16 sps:$4 sm:$0xff]  }
 0x341   : > { %v976_v37 = vpop.f32.mrf.mxu0 }
 0x342   : > { %v992_v38 = vpack.c.bf16 %v976_v37, %v973_v35  ;;  %v2552_v35 = vld [vmem:[%s3130_s19 + $0x40] ss:$16 sps:$4 sm:$0xff]   ;;  %v2555_v37 = vld [vmem:[%s3130_s19 + $0x48] ss:$16 sps:$4 sm:$0xff]  }
 0x344   : > { %2366 = vmatpush3.bf16.msra.mxu1 %v992_v38  ;;  %v2557_v38 = vld [vmem:[%s3130_s19 + $0x4c] ss:$16 sps:$4 sm:$0xff]  }
 0x345   : > { %2371 = vmatprep.subr.bf16.mxu1 %v2920_v33 }
 0x347   : > { %2368 = vmatmul.mubr.msk.bf16.vlgmr.msra.gmra.mxu1 %vm1016_vm15, %v1008_v39  ;;  %v2560_v39 = vld [vmem:[%s3130_s19 + $0x24] ss:$16 sps:$4 sm:$0xff]  }
 0x348   : > { %2372 = vmatpush3.bf16.msra.mxu1 %v993_v40  ;;  %2373 = vmatprep.mubr.msk.bf16.mxu1 %vm2921_vm14, %v2920_v33  ;;  %v2546_v33 = vld [vmem:[%s3130_s19 + $0x60] ss:$16 sps:$4 sm:$0xff]   ;;  %v2563_v40 = vld [vmem:[%s3130_s19 + $0x2c] ss:$16 sps:$4 sm:$0xff]  }
 0x349   : > { %1377 = vmatprep.subr.bf16.mxu1 %v2524_v0 }
 0x34f   : > { %2374 = vmatmul.mubr.msk.bf16.vlgmr.msra.gmra.mxu1 %vm1016_vm15, %v1075_v41  ;;  %v2558_v41 = vld [vmem:[%s3130_s19 + $0x20] ss:$16 sps:$4 sm:$0xff]  }
 0x350   : > { %1378 = vmatpush1.bf16.msra.mxu1 %v2522_v63 }
 0x351   : > { %1379 = vmatprep.subr.bf16.mxu1 %v2530_v18 }
 0x407   : > { %v1054_v47 = vpop.f32.mrf.mxu1 }
 0x408   : > { %v1131_v48 = vadd.f32 %v1130_v46, %v1054_v47  ;;  %v2922_v47 = vmov 0  }
 0x409   : > { %v2369_v49 = vpop.f32.mrf.mxu1  ;;  %1409 = vmatprep.mubr.bf16.mxu1 %v2922_v47  ;;  %1462 = vmatprep.mubr.bf16.mxu0 %v2922_v47 }
 0x40a   : > { %v1135_v50 = vadd.f32 %v1131_v48, %v885_v21  ;;  %v2528_v21 = vld [vmem:[%s3130_s19 + $0xc0] ss:$16 sps:$4 sm:$0xff]   ;;  %v2567_v49 = vld [vmem:[%s3130_s19 + $0x8] ss:$16 sps:$4 sm:$0xff]  }
 0x40b   : > { %v1057_v51 = vpop.f32.mrf.mxu1  ;;  %1380 = vmatpush1.bf16.msra.mxu1 %v2528_v21  ;;  %v2564_v48 = vld [vmem:[%s3130_s19] ss:$16 sps:$4 sm:$0xff]   ;;  %v2570_v21 = vld [vmem:[%s3132_s21 + $0x78] sm:$0xff]  }
 0x40c   : > { %v1132_v52 = vadd.f32 %v1130_v46, %v1057_v51  ;;  %1139 = vadd.xlane.f32.xlu1 %v1135_v50  ;;  %1381 = vmatprep.subr.bf16.mxu1 %v2536_v23  ;;  %v2573_v23 = vld [vmem:[%s3132_s21 + $0xb8] sm:$0xff]  }
 0x40d   : > { %v2370_v53 = vpop.f32.mrf.mxu1 }
 0x40e   : > { %v1136_v54 = vadd.f32 %v1132_v52, %v886_v22  ;;  %v2531_v22 = vld [vmem:[%s3130_s19 + $0xc8] ss:$16 sps:$4 sm:$0xff]  }
 0x40f   : > { %v1120_v55 = vpop.f32.mrf.mxu1  ;;  %1433 = vmatpush1.bf16.msra.mxu0 %v2531_v22  ;;  %1382 = vmatpush1.bf16.msra.mxu1 %v2534_v25  ;;  %v2572_v22 = vld [vmem:[%s3132_s21 + $0x38] sm:$0xff]   ;;  %v2575_v25 = vld [vmem:[%s3132_s21 + $0xf0] sm:$0xff]  }
 0x410   : > { %v1133_v56 = vadd.f32 %v1130_v46, %v1120_v55  ;;  %1141 = vadd.xlane.f32.xlu1 %v1136_v54  ;;  %1434 = vmatprep.subr.bf16.mxu0 %v2539_v24  ;;  %v2574_v24 = vld [vmem:[%s3132_s21 + $0x70] sm:$0xff]  }
 0x411   : > { %v2375_v57 = vpop.f32.mrf.mxu1  ;;  %1383 = vmatprep.subr.bf16.mxu1 %v2542_v27  ;;  %v2577_v27 = vld [vmem:[%s3132_s21 + $0xb0] sm:$0xff]  }
 0x412   : > { %v1137_v58 = vadd.f32 %v1133_v56, %v887_v30  ;;  %v2543_v30 = vld [vmem:[%s3130_s19 + $0x88] ss:$16 sps:$4 sm:$0xff]  }
 0x413   : > { %v1123_v59 = vpop.f32.mrf.mxu1  ;;  %1435 = vmatpush1.bf16.msra.mxu0 %v2537_v26  ;;  %1384 = vmatpush1.bf16.msra.mxu1 %v2540_v29  ;;  %v2576_v26 = vld [vmem:[%s3132_s21 + $0x30] sm:$0xff]   ;;  %v2579_v29 = vld [vmem:[%s3132_s21 + $0xe8] sm:$0xff]  }
 0x414   : > { %v1134_v60 = vadd.f32 %v1130_v46, %v1123_v59  ;;  %1143 = vadd.xlane.f32.xlu0 %v1137_v58  ;;  %1436 = vmatprep.subr.bf16.mxu0 %v2545_v28  ;;  %v2569_v46 = vld [vmem:[%s3130_s19 + $0xc] ss:$16 sps:$4 sm:$0xff]  }
 0x415   : > { %v2376_v61 = vpop.f32.mrf.mxu1  ;;  %v2578_v28 = vld [vmem:[%s3132_s21 + $0x68] sm:$0xff]  }
 0x416   : > { %v1138_v62 = vadd.f32 %v1134_v60, %v888_v31  ;;  %v2548_v31 = vld [vmem:[%s3130_s19 + $0x64] ss:$16 sps:$4 sm:$0xff]  }
 0x417   : > { %1437 = vmatpush1.bf16.msra.mxu0 %v2543_v30  ;;  %1385 = vmatprep.subr.bf16.mxu1 %v2548_v31  ;;  %v2580_v30 = vld [vmem:[%s3132_s21 + $0x28] sm:$0xff]  }
 0x418   : > { %1145 = vadd.xlane.f32.xlu1 %v1138_v62  ;;  %1438 = vmatprep.subr.bf16.mxu0 %v2551_v32  ;;  %v2581_v31 = vld [vmem:[%s3132_s21 + $0xa8] sm:$0xff]   ;;  %v2582_v32 = vld [vmem:[%s3132_s21 + $0x60] sm:$0xff]  }
 0x419   : > { %1386 = vmatpush1.bf16.msra.mxu1 %v2546_v33  ;;  %v2583_v33 = vld [vmem:[%s3132_s21 + $0xe0] sm:$0xff]  }
 0x41a   : > { %1387 = vmatprep.subr.bf16.mxu1 %v2554_v36  ;;  %v2586_v36 = vld [vmem:[%s3132_s21 + $0x58] sm:$0xff]  }
 0x41b   : > { %1439 = vmatpush1.bf16.msra.mxu0 %v2549_v34  ;;  %v2584_v34 = vld [vmem:[%s3132_s21 + $0x20] sm:$0xff]  }
 0x41c   : > { %1440 = vmatprep.subr.bf16.mxu0 %v2557_v38  ;;  %v2588_v38 = vld [vmem:[%s3132_s21 + $0x18] sm:$0xff]  }
 0x41d   : > { %1388 = vmatpush1.bf16.msra.mxu1 %v2552_v35  ;;  %v2585_v35 = vld [vmem:[%s3132_s21 + $0xa0] sm:$0xff]  }
 0x41e   : > { %1389 = vmatprep.subr.bf16.mxu1 %v2560_v39  ;;  %v2589_v39 = vld [vmem:[%s3132_s21 + $0x98] sm:$0xff]  }
 0x41f   : > { %1441 = vmatpush1.bf16.msra.mxu0 %v2555_v37  ;;  %v2587_v37 = vld [vmem:[%s3132_s21 + $0xd8] sm:$0xff]  }
 0x420   : > { %1442 = vmatprep.subr.bf16.mxu0 %v2563_v40  ;;  %v2590_v40 = vld [vmem:[%s3132_s21 + $0x50] sm:$0xff]  }
 0x421   : > { %1390 = vmatpush1.bf16.msra.mxu1 %v2558_v41  ;;  %v2591_v41 = vld [vmem:[%s3132_s21 + $0xd0] sm:$0xff]  }
 0x422   : > { %1391 = vmatprep.subr.bf16.mxu1 %v2566_v44  ;;  %v2593_v44 = vld [vmem:[%s3132_s21 + $0x90] sm:$0xff]  }
 0x423   : > { %1443 = vmatpush1.bf16.msra.mxu0 %v2561_v42  ;;  %v2592_v42 = vld [vmem:[%s3132_s21 + $0x10] sm:$0xff]  }
 0x424   : > { %1444 = vmatprep.subr.bf16.mxu0 %v2569_v46  ;;  %v2594_v46 = vld [vmem:[%s3132_s21 + $0x48] sm:$0xff]  }
 0x425   : > { %1392 = vmatpush1.bf16.msra.mxu1 %v2564_v48  ;;  %v2596_v48 = vld [vmem:[%s3132_s21 + $0x8] sm:$0xff]  }
 0x426   : > { %2275 = vmatprep.subr.bf16.mxu1 %v2570_v21 }
 0x427   : > { %1445 = vmatpush1.bf16.msra.mxu0 %v2567_v49  ;;  %v2597_v49 = vld [vmem:[%s3132_s21 + $0x88] sm:$0xff]  }
 0x495   : > { %v1140_v3 = vpop.xlane.xlu1 %1139 }
 0x496   : > { %v1147_v4 = vmul.f32 0.0078125, %v1140_v3 }
 0x498   : > { %v3182_v5 = vsub.f32 %v1135_v50, %v1147_v4 }
 0x499   : > { %v1142_v6 = vpop.xlane.xlu1 %1141 }
 0x49a   : > { %v1148_v7 = vmul.f32 0.0078125, %v1142_v6  ;;  %v1155_v8 = vmul.f32 %v3182_v5, %v3182_v5 }
 0x49c   : > { %v3186_v9 = vsub.f32 %v1136_v54, %v1148_v7  ;;  %1159 = vadd.xlane.f32.xlu1 %v1155_v8  ;;  %v1194_v7 = vrot.slane %v3175_v45, %v1193_v2 }
 0x49d   : > { %v1144_v10 = vpop.xlane.xlu0 %1143 }
 0x49e   : > { %v1149_v11 = vmul.f32 0.0078125, %v1144_v10  ;;  %v1156_v12 = vmul.f32 %v3186_v9, %v3186_v9 }
 0x4a0   : > { %v3190_v15 = vsub.f32 %v1137_v58, %v1149_v11  ;;  %1161 = vadd.xlane.f32.xlu1 %v1156_v12 }
 0x4a1   : > { %v1146_v16 = vpop.xlane.xlu1 %1145 }
 0x4a2   : > { %v1150_v17 = vmul.f32 0.0078125, %v1146_v16  ;;  %v1157_v19 = vmul.f32 %v3190_v15, %v3190_v15 }
 0x4a4   : > { %v3194_v13 = vsub.f32 %v1138_v62, %v1150_v17  ;;  %1163 = vadd.xlane.f32.xlu1 %v1157_v19  ;;  %v1185_v62 = vsub.s32 3, %v3171_v43 }
 0x4a6   : > { %v1158_v14 = vmul.f32 %v3194_v13, %v3194_v13  ;;  %v1186_v1 = vrot.slane %v3175_v45, %v1185_v62 }
 0x4a8   : > { %1165 = vadd.xlane.f32.xlu0 %v1158_v14 }
 0x525   : > { %v1160_v50 = vpop.xlane.xlu1 %1159 }
 0x526   : > { %v1167_v51 = vmul.f32 0.0078125, %v1160_v50  ;;  %v2598_v50 = vld [vmem:[%s3132_s21 + $0x40] sm:$0xff]  }
 0x528   : > { %v1171_v52 = vadd.f32 1e-05, %v1167_v51  ;;  %v2599_v51 = vld [vmem:[%s3132_s21 + $0xc0] sm:$0xff]  }
 0x529   : > { %v1162_v53 = vpop.xlane.xlu1 %1161 }
 0x52a   : > { %2602 = vrsqrt.f32 %v1171_v52  ;;  %v1168_v54 = vmul.f32 0.0078125, %v1162_v53  ;;  %v2600_v52 = vld [vmem:[%s3132_s21] sm:$0xff]  }
 0x52b   : > { %v2601_v53 = vld [vmem:[%s3132_s21 + $0x80] sm:$0xff]  }
 0x52c   : > { %v1172_v55 = vadd.f32 1e-05, %v1168_v54  ;;  %v1203_v54 = vsub.s32 1, %v3171_v43 }
 0x52d   : > { %v1164_v56 = vpop.xlane.xlu1 %1163 }
 0x52e   : > { %2604 = vrsqrt.f32 %v1172_v55  ;;  %v1169_v57 = vmul.f32 0.0078125, %v1164_v56  ;;  %v883_v55 = vld [vmem:[%s3128_s18 + $0x10] sm:$0xff]  ;;  %v882_v56 = vld [vmem:[%s3128_s18 + $0x8] sm:$0xff] }
 0x530   : > { %v1173_v58 = vadd.f32 1e-05, %v1169_v57  ;;  %v884_v57 = vld [vmem:[%s3128_s18 + $0x18] sm:$0xff] }
 0x531   : > { %v1166_v59 = vpop.xlane.xlu0 %1165 }
 0x532   : > { %2606 = vrsqrt.f32 %v1173_v58  ;;  %v1170_v60 = vmul.f32 0.0078125, %v1166_v59  ;;  %v1204_v58 = vrot.slane %v3175_v45, %v1203_v54  ;;  %v1212_v59 = vrot.slane %v883_v55, %v1203_v54 }
 0x534   : > { %v1174_v61 = vadd.f32 1e-05, %v1170_v60  ;;  %v1208_v60 = vrot.slane %v882_v56, %v1203_v54 }
 0x536   : > { %2608 = vrsqrt.f32 %v1174_v61  ;;  %v1216_v61 = vrot.slane %v884_v57, %v1203_v54 }
 0x537   : > { %v2603_v63 = vpop.eup %2602 }
 0x538   : > { %v1179_v0 = vmul.f32 %v2603_v63, %v3182_v5 }
 0x53a   : > { %v1187_v6 = vmul.f32 %v1186_v1, %v1179_v0 }
 0x53b   : > { %v2605_v3 = vpop.eup %2604 }
 0x53c   : > { %v1180_v4 = vmul.f32 %v2605_v3, %v3186_v9  ;;  %v3232_v11 = vadd.f32 %v1194_v7, %v1187_v6 }
 0x53e   : > { %v1188_v8 = vmul.f32 %v1186_v1, %v1180_v4 }
 0x53f   : > { %v2607_v10 = vpop.eup %2606 }
 0x540   : > { %v3234_v12 = vadd.f32 %v1194_v7, %v1188_v8  ;;  %v1181_v16 = vmul.f32 %v2607_v10, %v3190_v15 }
 0x542   : > { %v1199_v5 = vpack.c.bf16 %v3234_v12, %v3232_v11  ;;  %v1189_v19 = vmul.f32 %v1186_v1, %v1181_v16 }
 0x543   : > { %v2609_v17 = vpop.eup %2608 }
 0x544   : > { %1410 = vmatmul.mubr.bf16.vlgmr.msra.gmra.mxu1 %v1199_v5  ;;  %1463 = vmatmul.mubr.bf16.vlgmr.msra.gmra.mxu0 %v1199_v5  ;;  %v1182_v9 = vmul.f32 %v2609_v17, %v3194_v13  ;;  %v3240_v18 = vadd.f32 %v1194_v7, %v1189_v19  ;;  %v2571_v13 = vld [vmem:[%s3132_s21 + $0xf8] sm:$0xff]  }
 0x545   : > { %1419 = vmatprep.mubr.bf16.mxu1 %v2922_v47  ;;  %1472 = vmatprep.mubr.bf16.mxu0 %v2922_v47  ;;  %v2595_v47 = vld [vmem:[%s3132_s21 + $0xc8] sm:$0xff]  }
 0x546   : > { %v1190_v14 = vmul.f32 %v1186_v1, %v1182_v9  ;;  %2303 = vmatprep.subr.bf16.mxu0 %v2571_v13  ;;  %2276 = vmatpush3.bf16.msra.mxu1 %v2572_v22 }
 0x547   : > { %2304 = vmatpush3.bf16.msra.mxu0 %v2573_v23  ;;  %2277 = vmatprep.subr.bf16.mxu1 %v2574_v24 }
 0x548   : > { %v3242_v15 = vadd.f32 %v1194_v7, %v1190_v14  ;;  %2305 = vmatprep.subr.bf16.mxu0 %v2575_v25 }
 0x54a   : > { %v1200_v20 = vpack.c.bf16 %v3242_v15, %v3240_v18  ;;  %2278 = vmatpush3.bf16.msra.mxu1 %v2576_v26 }
 0x54b   : > { %2306 = vmatpush3.bf16.msra.mxu0 %v2577_v27  ;;  %2279 = vmatprep.subr.bf16.mxu1 %v2578_v28 }
 0x54c   : > { %1420 = vmatmul.mubr.bf16.gmra.mxu1 %v1200_v20  ;;  %1473 = vmatmul.mubr.bf16.gmra.mxu0 %v1200_v20 }
 0x54d   : > { %2307 = vmatprep.subr.bf16.mxu0 %v2579_v29 }
 0x54e   : > { %2280 = vmatpush3.bf16.msra.mxu1 %v2580_v30 }
 0x54f   : > { %2308 = vmatpush3.bf16.msra.mxu0 %v2581_v31  ;;  %2281 = vmatprep.subr.bf16.mxu1 %v2582_v32 }
 0x550   : > { %2309 = vmatprep.subr.bf16.mxu0 %v2583_v33 }
 0x552   : > { %2282 = vmatpush3.bf16.msra.mxu1 %v2584_v34 }
 0x553   : > { %2310 = vmatpush3.bf16.msra.mxu0 %v2585_v35  ;;  %2283 = vmatprep.subr.bf16.mxu1 %v2586_v36 }
 0x554   : > { %2311 = vmatprep.subr.bf16.mxu0 %v2587_v37 }
 0x556   : > { %2284 = vmatpush3.bf16.msra.mxu1 %v2588_v38 }
 0x557   : > { %2312 = vmatpush3.bf16.msra.mxu0 %v2589_v39  ;;  %2285 = vmatprep.subr.bf16.mxu1 %v2590_v40 }
 0x558   : > { %2313 = vmatprep.subr.bf16.mxu0 %v2591_v41 }
 0x55a   : > { %2286 = vmatpush3.bf16.msra.mxu1 %v2592_v42 }
 0x55b   : > { %2314 = vmatpush3.bf16.msra.mxu0 %v2593_v44  ;;  %2287 = vmatprep.subr.bf16.mxu1 %v2594_v46 }
 0x55c   : > { %2315 = vmatprep.subr.bf16.mxu0 %v2595_v47 }
 0x55e   : > { %2288 = vmatpush3.bf16.msra.mxu1 %v2596_v48 }
 0x55f   : > { %2316 = vmatpush3.bf16.msra.mxu0 %v2597_v49  ;;  %2289 = vmatprep.subr.bf16.mxu1 %v2598_v50 }
 0x560   : > { %2317 = vmatprep.subr.bf16.mxu0 %v2599_v51 }
 0x562   : > { %2290 = vmatpush3.bf16.msra.mxu1 %v2600_v52 }
 0x563   : > { %2318 = vmatpush3.bf16.msra.mxu0 %v2601_v53 }
 0x604   : > { %v1411_v62 = vpop.f32.mrf.mxu1  ;;  %v1464_v63 = vpop.f32.mrf.mxu0 }
 0x605   : > { %v3283_v0 = vadd.f32 %v1411_v62, %v1204_v58  ;;  %v3285_v1 = vadd.f32 %v1464_v63, %v1212_v59 }
 0x606   : > { %v1413_v2 = vpop.f32.mrf.mxu1  ;;  %v1466_v3 = vpop.f32.mrf.mxu0 }
 0x607   : > { %v2193_v4 = vmul.f32 -1.442695, %v3283_v0  ;;  %v2195_v6 = vmul.f32 -1.442695, %v3285_v1  ;;  %v3289_v7 = vadd.f32 %v1413_v2, %v1208_v60  ;;  %v3291_v8 = vadd.f32 %v1466_v3, %v1216_v61 }
 0x608   : > { %v1415_v10 = vpop.f32.mrf.mxu1  ;;  %v1468_v16 = vpop.f32.mrf.mxu0 }
 0x609   : > { %2610 = vpow2.f32 %v2193_v4  ;;  %v2194_v5 = vmul.f32 -1.442695, %v3289_v7  ;;  %v2196_v17 = vmul.f32 -1.442695, %v3291_v8  ;;  %v3295_v9 = vadd.f32 %v1415_v10, %v1204_v58 }
 0x60a   : > { %2612 = vpow2.f32 %v2195_v6  ;;  %v3297_v19 = vadd.f32 %v1468_v16, %v1212_v59  ;;  %v1417_v14 = vpop.f32.mrf.mxu1  ;;  %v1470_v20 = vpop.f32.mrf.mxu0 }
 0x60b   : > { %2614 = vpow2.f32 %v2194_v5  ;;  %v2197_v21 = vmul.f32 -1.442695, %v3295_v9  ;;  %v3300_v13 = vadd.f32 %v1417_v14, %v1208_v60  ;;  %v3302_v22 = vadd.f32 %v1470_v20, %v1216_v61 }
 0x60c   : > { %2616 = vpow2.f32 %v2196_v17  ;;  %v2199_v23 = vmul.f32 -1.442695, %v3297_v19  ;;  %v1421_v24 = vpop.f32.mrf.mxu1  ;;  %v1474_v25 = vpop.f32.mrf.mxu0 }
 0x60d   : > { %2618 = vpow2.f32 %v2197_v21  ;;  %v2198_v26 = vmul.f32 -1.442695, %v3300_v13  ;;  %v2200_v27 = vmul.f32 -1.442695, %v3302_v22  ;;  %v3307_v28 = vadd.f32 %v1421_v24, %v1204_v58 }
 0x60e   : > { %2620 = vpow2.f32 %v2199_v23  ;;  %v3309_v29 = vadd.f32 %v1474_v25, %v1212_v59  ;;  %v1423_v30 = vpop.f32.mrf.mxu1  ;;  %v1476_v31 = vpop.f32.mrf.mxu0 }
 0x60f   : > { %2622 = vpow2.f32 %v2198_v26  ;;  %v2201_v32 = vmul.f32 -1.442695, %v3307_v28  ;;  %v3312_v33 = vadd.f32 %v1423_v30, %v1208_v60  ;;  %v3314_v34 = vadd.f32 %v1476_v31, %v1216_v61 }
 0x610   : > { %2624 = vpow2.f32 %v2200_v27  ;;  %v2203_v35 = vmul.f32 -1.442695, %v3309_v29  ;;  %v1425_v36 = vpop.f32.mrf.mxu1  ;;  %v1478_v37 = vpop.f32.mrf.mxu0 }
 0x611   : > { %2626 = vpow2.f32 %v2201_v32  ;;  %v2202_v38 = vmul.f32 -1.442695, %v3312_v33  ;;  %v2204_v39 = vmul.f32 -1.442695, %v3314_v34  ;;  %v3319_v40 = vadd.f32 %v1425_v36, %v1204_v58 }
 0x612   : > { %2628 = vpow2.f32 %v2203_v35  ;;  %v3321_v41 = vadd.f32 %v1478_v37, %v1212_v59  ;;  %v1427_v42 = vpop.f32.mrf.mxu1  ;;  %v1480_v44 = vpop.f32.mrf.mxu0 }
 0x613   : > { %2630 = vpow2.f32 %v2202_v38  ;;  %v2205_v46 = vmul.f32 -1.442695, %v3319_v40  ;;  %v3324_v47 = vadd.f32 %v1427_v42, %v1208_v60  ;;  %v3326_v48 = vadd.f32 %v1480_v44, %v1216_v61 }
 0x614   : > { %2632 = vpow2.f32 %v2204_v39  ;;  %v2207_v49 = vmul.f32 -1.442695, %v3321_v41 }
 0x615   : > { %2634 = vpow2.f32 %v2205_v46  ;;  %v2206_v50 = vmul.f32 -1.442695, %v3324_v47  ;;  %v2208_v51 = vmul.f32 -1.442695, %v3326_v48 }
 0x616   : > { %v2611_v52 = vpop.eup %2610  ;;  %2636 = vpow2.f32 %v2207_v49 }
 0x617   : > { %v2613_v53 = vpop.eup %2612  ;;  %v1531_v54 = vadd.f32 1.0, %v2611_v52  ;;  %2638 = vpow2.f32 %v2206_v50 }
 0x618   : > { %v2615_v55 = vpop.eup %2614  ;;  %v1533_v56 = vadd.f32 1.0, %v2613_v53  ;;  %2640 = vpow2.f32 %v2208_v51 }
 0x619   : > { %v2617_v57 = vpop.eup %2616  ;;  %2642 = vrcp.f32 %v1531_v54  ;;  %v1532_v58 = vadd.f32 1.0, %v2615_v55 }
 0x61a   : > { %v2619_v59 = vpop.eup %2618  ;;  %2644 = vrcp.f32 %v1533_v56  ;;  %v1534_v60 = vadd.f32 1.0, %v2617_v57 }
 0x61b   : > { %v2621_v61 = vpop.eup %2620  ;;  %2646 = vrcp.f32 %v1532_v58  ;;  %v1535_v62 = vadd.f32 1.0, %v2619_v59 }
 0x61c   : > { %v2623_v63 = vpop.eup %2622  ;;  %2648 = vrcp.f32 %v1534_v60  ;;  %v1537_v2 = vadd.f32 1.0, %v2621_v61 }
 0x61d   : > { %v2625_v3 = vpop.eup %2624  ;;  %2650 = vrcp.f32 %v1535_v62  ;;  %v1536_v4 = vadd.f32 1.0, %v2623_v63 }
 0x61e   : > { %v2627_v6 = vpop.eup %2626  ;;  %2652 = vrcp.f32 %v1537_v2  ;;  %v1538_v10 = vadd.f32 1.0, %v2625_v3 }
 0x61f   : > { %v2629_v16 = vpop.eup %2628  ;;  %2654 = vrcp.f32 %v1536_v4  ;;  %v1539_v5 = vadd.f32 1.0, %v2627_v6 }
 0x620   : > { %v2631_v17 = vpop.eup %2630  ;;  %2656 = vrcp.f32 %v1538_v10  ;;  %v1541_v14 = vadd.f32 1.0, %v2629_v16 }
 0x621   : > { %v2633_v20 = vpop.eup %2632  ;;  %2658 = vrcp.f32 %v1539_v5  ;;  %v1540_v21 = vadd.f32 1.0, %v2631_v17 }
 0x622   : > { %v2635_v23 = vpop.eup %2634  ;;  %2660 = vrcp.f32 %v1541_v14  ;;  %v1542_v24 = vadd.f32 1.0, %v2633_v20 }
 0x623   : > { %v2637_v25 = vpop.eup %2636  ;;  %2662 = vrcp.f32 %v1540_v21  ;;  %v1543_v26 = vadd.f32 1.0, %v2635_v23 }
 0x624   : > { %v2639_v27 = vpop.eup %2638  ;;  %2664 = vrcp.f32 %v1542_v24  ;;  %v1545_v30 = vadd.f32 1.0, %v2637_v25 }
 0x625   : > { %v2641_v31 = vpop.eup %2640  ;;  %2666 = vrcp.f32 %v1543_v26  ;;  %v1544_v32 = vadd.f32 1.0, %v2639_v27 }
 0x626   : > { %v2643_v35 = vpop.eup %2642  ;;  %2668 = vrcp.f32 %v1545_v30  ;;  %v1546_v36 = vadd.f32 1.0, %v2641_v31 }
 0x627   : > { %v2645_v37 = vpop.eup %2644  ;;  %2670 = vrcp.f32 %v1544_v32  ;;  %v1579_v55 = vmul.f32 %v2643_v35, %v3283_v0 }
 0x628   : > { %v2647_v38 = vpop.eup %2646  ;;  %2672 = vrcp.f32 %v1546_v36  ;;  %v1581_v59 = vmul.f32 %v2645_v37, %v3285_v1 }
 0x629   : > { %v2649_v39 = vpop.eup %2648  ;;  %v1580_v51 = vmul.f32 %v2647_v38, %v3289_v7 }
 0x62a   : > { %v2651_v42 = vpop.eup %2650  ;;  %v1582_v56 = vmul.f32 %v2649_v39, %v3291_v8 }
 0x62b   : > { %v2653_v44 = vpop.eup %2652  ;;  %v1583_v49 = vmul.f32 %v2651_v42, %v3295_v9 }
 0x62c   : > { %v2655_v46 = vpop.eup %2654  ;;  %v1585_v52 = vmul.f32 %v2653_v44, %v3297_v19 }
 0x62d   : > { %v2657_v50 = vpop.eup %2656  ;;  %v1584_v53 = vmul.f32 %v2655_v46, %v3300_v13  ;;  %v1595_v9 = vpack.c.bf16 %v1583_v49, %v1579_v55 }
 0x62e   : > { %v2659_v54 = vpop.eup %2658  ;;  %v1586_v57 = vmul.f32 %v2657_v50, %v3302_v22  ;;  %v1597_v7 = vpack.c.bf16 %v1585_v52, %v1581_v59 }
 0x62f   : > { %v2661_v58 = vpop.eup %2660  ;;  %v1596_v60 = vpack.c.bf16 %v1584_v53, %v1580_v51  ;;  %v1587_v4 = vmul.f32 %v2659_v54, %v3307_v28 }
 0x630   : > { %v2663_v61 = vpop.eup %2662  ;;  %v1598_v62 = vpack.c.bf16 %v1586_v57, %v1582_v56  ;;  %v1589_v16 = vmul.f32 %v2661_v58, %v3309_v29 }
 0x631   : > { %v2665_v63 = vpop.eup %2664  ;;  %1831 = vmatprep.mubr.bf16.mxu1 %v1596_v60  ;;  %v1588_v22 = vmul.f32 %v2663_v61, %v3312_v33  ;;  %v1605_v33 = vsub.s32 2, %v3171_v43 }
 0x632   : > { %v2667_v19 = vpop.eup %2666  ;;  %1880 = vmatprep.mubr.bf16.mxu0 %v1598_v62  ;;  %1832 = vmatmul.mubr.bf16.vlgmr.msra.gmra.mxu1 %v1595_v9  ;;  %v1590_v6 = vmul.f32 %v2665_v63, %v3314_v34 }
 0x633   : > { %v2669_v13 = vpop.eup %2668  ;;  %1881 = vmatmul.mubr.bf16.vlgmr.msra.gmra.mxu0 %v1597_v7  ;;  %v1591_v8 = vmul.f32 %v2667_v19, %v3319_v40  ;;  %v1606_v28 = vrot.slane %v3175_v45, %v1605_v33 }
 0x634   : > { %v2671_v0 = vpop.eup %2670  ;;  %v1593_v1 = vmul.f32 %v2669_v13, %v3321_v41 }
 0x635   : > { %v2673_v2 = vpop.eup %2672  ;;  %v1592_v3 = vmul.f32 %v2671_v0, %v3324_v47  ;;  %v1599_v14 = vpack.c.bf16 %v1591_v8, %v1587_v4 }
 0x636   : > { %v1594_v10 = vmul.f32 %v2673_v2, %v3326_v48  ;;  %v1601_v40 = vpack.c.bf16 %v1593_v1, %v1589_v16 }
 0x637   : > { %v1600_v5 = vpack.c.bf16 %v1592_v3, %v1588_v22 }
 0x638   : > { %v1602_v17 = vpack.c.bf16 %v1594_v10, %v1590_v6 }
 0x639   : > { %1839 = vmatprep.mubr.bf16.mxu1 %v1600_v5 }
 0x63a   : > { %1888 = vmatprep.mubr.bf16.mxu0 %v1602_v17  ;;  %1840 = vmatmul.mubr.bf16.gmra.mxu1 %v1599_v14 }
 0x63b   : > { %1889 = vmatmul.mubr.bf16.gmra.mxu0 %v1601_v40 }
 0x6f2   : > { %v2291_v41 = vpop.f32.mrf.mxu1 }
 0x6f3   : > { %v2319_v47 = vpop.f32.mrf.mxu0 }
 0x6f4   : > { %v2292_v20 = vpop.f32.mrf.mxu1 }
 0x6f5   : > { %v2293_v34 = vadd.f32 %v2292_v20, %v2291_v41  ;;  %v2320_v21 = vpop.f32.mrf.mxu0 }
 0x6f6   : > { %v2294_v48 = vpop.f32.mrf.mxu1  ;;  %v2321_v29 = vadd.f32 %v2320_v21, %v2319_v47  ;;  %v1947_v47 = vsub.s32 5, %v3171_v43 }
 0x6f7   : > { %v1834_v23 = vadd.f32 %v2293_v34, %v1606_v28  ;;  %v2322_v24 = vpop.f32.mrf.mxu0  ;;  %v1955_v34 = vsub.s32 6, %v3171_v43 }
 0x6f8   : > { %v2295_v25 = vpop.f32.mrf.mxu1  ;;  %v1948_v21 = vrot.slane %v3175_v45, %v1947_v47 }
 0x6f9   : > { %v1883_v26 = vadd.f32 %v2321_v29, %v1834_v23  ;;  %v2296_v27 = vadd.f32 %v2295_v25, %v2294_v48  ;;  %v2323_v30 = vpop.f32.mrf.mxu0  ;;  %v1956_v29 = vrot.slane %v3175_v45, %v1955_v34 }
 0x6fa   : > { %v2297_v31 = vpop.f32.mrf.mxu1  ;;  %v2324_v35 = vadd.f32 %v2323_v30, %v2322_v24 }
 0x6fb   : > { %v1837_v32 = vadd.f32 %v2296_v27, %v1606_v28  ;;  %v2325_v36 = vpop.f32.mrf.mxu0  ;;  %v1897_v37 = vadd.f32 %v1883_v26, %v3232_v11 }
 0x6fc   : > { %v2298_v38 = vpop.f32.mrf.mxu1 }
 0x6fd   : > { %v1886_v39 = vadd.f32 %v2324_v35, %v1837_v32  ;;  %v2299_v42 = vadd.f32 %v2298_v38, %v2297_v31  ;;  %v2326_v44 = vpop.f32.mrf.mxu0  ;;  %1901 = vadd.xlane.f32.xlu1 %v1897_v37 }
 0x6fe   : > { %v2300_v46 = vpop.f32.mrf.mxu1  ;;  %v2327_v50 = vadd.f32 %v2326_v44, %v2325_v36 }
 0x6ff   : > { %v1842_v49 = vadd.f32 %v2299_v42, %v1606_v28  ;;  %v2328_v51 = vpop.f32.mrf.mxu0  ;;  %v1898_v52 = vadd.f32 %v1886_v39, %v3234_v12 }
 0x700   : > { %v2301_v53 = vpop.f32.mrf.mxu1 }
 0x701   : > { %v1891_v54 = vadd.f32 %v2327_v50, %v1842_v49  ;;  %v2302_v55 = vadd.f32 %v2301_v53, %v2300_v46  ;;  %v2329_v56 = vpop.f32.mrf.mxu0  ;;  %1903 = vadd.xlane.f32.xlu0 %v1898_v52 }
 0x702   : > { %v2330_v58 = vadd.f32 %v2329_v56, %v2328_v51 }
 0x703   : > { %v1845_v57 = vadd.f32 %v2302_v55, %v1606_v28  ;;  %v1899_v11 = vadd.f32 %v1891_v54, %v3240_v18 }
 0x705   : > { %v1894_v59 = vadd.f32 %v2330_v58, %v1845_v57  ;;  %1905 = vadd.xlane.f32.xlu1 %v1899_v11 }
 0x707   : > { %v1900_v60 = vadd.f32 %v1894_v59, %v3242_v15 }
 0x709   : > { %1907 = vadd.xlane.f32.xlu0 %v1900_v60 }
 0x786   : > { %v1902_v61 = vpop.xlane.xlu1 %1901 }
 0x787   : > { %v1909_v9 = vmul.f32 0.0078125, %v1902_v61 }
 0x789   : > { %v1913_v62 = vsub.f32 %v1897_v37, %v1909_v9 }
 0x78a   : > { %v1904_v63 = vpop.xlane.xlu0 %1903 }
 0x78b   : > { %v1910_v7 = vmul.f32 0.0078125, %v1904_v63  ;;  %v1917_v12 = vmul.f32 %v1913_v62, %v1913_v62 }
 0x78d   : > { %v1914_v19 = vsub.f32 %v1898_v52, %v1910_v7  ;;  %1921 = vadd.xlane.f32.xlu1 %v1917_v12 }
 0x78e   : > { %v1906_v13 = vpop.xlane.xlu1 %1905 }
 0x78f   : > { %v1911_v0 = vmul.f32 0.0078125, %v1906_v13  ;;  %v1918_v8 = vmul.f32 %v1914_v19, %v1914_v19 }
 0x791   : > { %v1915_v2 = vsub.f32 %v1899_v11, %v1911_v0  ;;  %1923 = vadd.xlane.f32.xlu0 %v1918_v8 }
 0x792   : > { %v1908_v22 = vpop.xlane.xlu0 %1907 }
 0x793   : > { %v1912_v18 = vmul.f32 0.0078125, %v1908_v22  ;;  %v1919_v1 = vmul.f32 %v1915_v2, %v1915_v2 }
 0x795   : > { %v1916_v3 = vsub.f32 %v1900_v60, %v1912_v18  ;;  %1925 = vadd.xlane.f32.xlu1 %v1919_v1 }
 0x797   : > { %v1920_v15 = vmul.f32 %v1916_v3, %v1916_v3 }
 0x799   : > { %1927 = vadd.xlane.f32.xlu0 %v1920_v15 }
 0x816   : > { %v1922_v4 = vpop.xlane.xlu1 %1921 }
 0x817   : > { %v1929_v6 = vmul.f32 0.0078125, %v1922_v4 }
 0x819   : > { %v1933_v10 = vadd.f32 1e-05, %v1929_v6 }
 0x81a   : > { %v1924_v16 = vpop.xlane.xlu0 %1923 }
 0x81b   : > { %2674 = vrsqrt.f32 %v1933_v10  ;;  %v1930_v5 = vmul.f32 0.0078125, %v1924_v16 }
 0x81d   : > { %v1934_v17 = vadd.f32 1e-05, %v1930_v5 }
 0x81e   : > { %v1926_v14 = vpop.xlane.xlu1 %1925 }
 0x81f   : > { %2676 = vrsqrt.f32 %v1934_v17  ;;  %v1931_v40 = vmul.f32 0.0078125, %v1926_v14 }
 0x821   : > { %v1935_v33 = vadd.f32 1e-05, %v1931_v40 }
 0x822   : > { %v1928_v41 = vpop.xlane.xlu0 %1927 }
 0x823   : > { %2678 = vrsqrt.f32 %v1935_v33  ;;  %v1932_v28 = vmul.f32 0.0078125, %v1928_v41 }
 0x825   : > { %v1936_v20 = vadd.f32 1e-05, %v1932_v28 }
 0x827   : > { %2680 = vrsqrt.f32 %v1936_v20 }
 0x828   : > { %v2675_v48 = vpop.eup %2674 }
 0x829   : > { %v1941_v23 = vmul.f32 %v2675_v48, %v1913_v62 }
 0x82b   : > { %v1949_v24 = vmul.f32 %v1948_v21, %v1941_v23 }
 0x82c   : > { %v2677_v25 = vpop.eup %2676 }
 0x82d   : > { %v1942_v26 = vmul.f32 %v2677_v25, %v1914_v19  ;;  %v1957_v27 = vadd.f32 %v1956_v29, %v1949_v24 }
 0x82f   : > { %v1950_v30 = vmul.f32 %v1948_v21, %v1942_v26  ;;  %1961 = vst [vmem:[#allocation11] sm:$0xff] %v1957_v27 }
 0x830   : > { %v2679_v31 = vpop.eup %2678 }
 0x831   : > { %v1943_v32 = vmul.f32 %v2679_v31, %v1915_v2  ;;  %v1958_v35 = vadd.f32 %v1956_v29, %v1950_v30 }
 0x833   : > { %v1951_v36 = vmul.f32 %v1948_v21, %v1943_v32  ;;  %1962 = vst [vmem:[#allocation11 + $0x8] sm:$0xff] %v1958_v35 }
 0x834   : > { %v2681_v43 = vpop.eup %2680 }
 0x835   : > { %v1944_v37 = vmul.f32 %v2681_v43, %v1916_v3  ;;  %v1959_v38 = vadd.f32 %v1956_v29, %v1951_v36 }
 0x837   : > { %v1952_v39 = vmul.f32 %v1948_v21, %v1944_v37  ;;  %1963 = vst [vmem:[#allocation11 + $0x10] sm:$0xff] %v1959_v38 }
 0x839   : > { %v1960_v45 = vadd.f32 %v1956_v29, %v1952_v39 }
 0x83b   : > { %1964 = vst [vmem:[#allocation11 + $0x18] sm:$0xff] %v1960_v45 }
 0x83c   : > { %2831 = shalt.err (!%p2828_p2)
}
 0x83d   : > { %s2924_s28 = smov 128   ;;  %s2925_s9 = smov 8  }
 0x83e   : > { %s3417_s10 = sld [smem:[#allocation19_spill]] }
 0x844   : > { %2392 = dma.vmem_to_hbm [thread:$0]  (%p2417_p6), %s1976_s29, 512, %s3417_s10, [#allocation5], %s2924_s28, %s2924_s28, %s2925_s9  }
 0x845   : > { %2879 = dma.done.wait (%p2417_p6), [#allocation5], 512  }
 0x846   : > { %2881 = vsyncadd (%p2417_p6), [#allocation5], 4294966784 }
 0x847 PF: > { %s19_s26 = sadd.s32 1, %s2904_s26   ;;  %s3418_s21 = smov %s2888_s22 }
 0x848   : > { %p16_p11 = scmp.ge.s32.totalorder %s19_s26, 4   ;;  %s3419_s22 = smov %s2892_s23 }
 0x849   : > { %s3420_s23 = smov %s3050_s8  ;;  %s3421_s24 = smov %s2900_s25 }
 0x84a   : > { %s3422_s25 = smov %s3424_s11  ;;  %18 = sbr.rel (!%p16_p11) target bundleno = 10 (0xa), region = 120 }
 0x84f   :  { %1991 = vsyncpa [#allocation4], 1 }
 0x850   :  { %1993 = vsyncpa [#allocation4 + $0x1], 1 }
 0x851   :  { %1994 = vsyncpa [#allocation7], 1 }
 0x852   :  { %1995 = vsyncpa [#allocation5], 1 }
 0x853   :  { %1997 = vsyncpa [#allocation5 + $0x1], 1 }

// kernel: tpu_custom_call.1
= control target key start
LH: loop header
LB: loop body
LE: loop exit
PB: predicated region body
PF: predicated region fallthrough
CT: control target
= control target key end

     0   :  { %s3387_s0 = inlined_call_operand.hbm [shape: f32[2,16,128], index: 0, kind: input, shape index: {}, may-alias: {0,6}]   ;;  %s3388_s1 = inlined_call_operand.hbm [shape: f32[2,16,16], index: 1, kind: input, shape index: {}]   ;;  %s3389_s2 = inlined_call_operand.hbm [shape: bf16[2,128,128], index: 2, kind: input, shape index: {}]   ;;  %s3390_s3 = inlined_call_operand.hbm [shape: bf16[2,128,512], index: 3, kind: input, shape index: {}]   ;;  %s3391_s4 = inlined_call_operand.hbm [shape: bf16[2,512,128], index: 4, kind: input, shape index: {}]   ;;  %s3392_s5 = inlined_call_operand.vmem [shape: f32[2,8,512], index: 5, kind: input, shape index: {}]   ;;  %s3393_s6 = inlined_call_operand.hbm [shape: f32[2,16,128], index: 6, kind: output, shape index: {}, may-alias: {0,6}]  }
   0x1   :  { %3398 = sst [smem:[#allocation16_spill]] %s3387_s0 }
   0x2   :  { %3399 = sst [smem:[#allocation17_spill]] %s3389_s2 }
   0x3   :  { %3400 = sst [smem:[#allocation18_spill]] %s3392_s5 }
   0x4   :  { %3401 = sst [smem:[#allocation19_spill]] %s3393_s6 }
   0x5   :  { %11 = vsyncpa [#allocation4], 0 }
   0x6   :  { %12 = vsyncpa [#allocation7], 0 }
   0x7   :  { %13 = vsyncpa [#allocation5], 0  ;;  %s2961_s21 = smov 0   ;;  %s2963_s22 = smov 0  }
   0x8   :  { %s2965_s23 = smov 0   ;;  %s2967_s24 = smov 0  }
   0x9   :  { %s2969_s25 = smov 0   ;;  %s2971_s26 = smov 0  }
   0xa LB: > { %s2990_s27 = sadd.s32 4294967295, %s2904_s26   ;;  %p97_p0 = scmp.ne.s32.totalorder %s2892_s23, %s2888_s22  ;;  %s2904_s26 = sphi %s2971_s26, %s19_s26   ;;  %s2900_s25 = sphi %s2969_s25, %s3422_s25   ;;  %s2896_s24 = sphi %s2967_s24, %s3421_s24   ;;  %s2892_s23 = sphi %s2965_s23, %s3420_s23   ;;  %s2888_s22 = sphi %s2963_s22, %s3419_s22   ;;  %s2884_s21 = sphi %s2961_s21, %s3418_s21  }
   0xb   : > { %p98_p1 = scmp.eq.s32.totalorder %s2904_s26, 0  ;;  %p103_p2 = scmp.ne.s32.totalorder %s2888_s22, %s2884_s21 }
   0xc   : > { %p3394_p3 = scmp.eq.s32.totalorder %s2990_s27, 0  ;;  %p2115_p5 = scmp.ge.s32.totalorder %s2904_s26, 1 }
   0xd   : > { %p99_p4 = por %p98_p1, %p97_p0  ;;  %p218_p7 = scmp.lt.s32.totalorder %s2904_s26, 3 }
   0xe   : > { %p3001_p6 = por %p3394_p3, %p103_p2  ;;  %s2906_s7 = smov [#allocation3]  }
   0xf   : > { %p3006_p8 = pnand %p2115_p5, %p218_p7  ;;  %s234_s8 = sshll.u32 %s2906_s7, 4  ;;  %s235_s8 = int_to_ptr.vmem [resolvable:$true] %s234_s8 }
  0x10   : > { %p2414_p10 = scmp.lt.s32.totalorder %s2904_s26, 2  ;;  %s28_s11 = sadd.s32 1, %s2900_s25 }
  0x11   : > { %p2395_p9 = pneg %p3006_p8  ;;  %s2693_s12 = scalar_lea.vmem %s235_s8, 512 }
  0x12   : > { %p3019_p12 = pnand %p2414_p10, %p99_p4  ;;  %p2694_p0 = scmp.ne.s32.totalorder %s235_s8, %s2693_s12 }
  0x13   : > { %p3015_p11 = pnand %p2395_p9, %p3394_p3  ;;  %p2701_p5 = scmp.lt.s32.totalorder %s235_s8, %s235_s8 }
  0x14   : > { %p2702_p7 = scmp.lt.s32.totalorder %s2693_s12, %s2693_s12 }
  0x15   : > { %p2684_p13 = pneg %p3015_p11 }
  0x16   : > { %p2703_p9 = por %p2702_p7, %p2701_p5 }
  0x17   : > { %p2696_p1 = pnand %p2694_p0, %p2684_p13 }
  0x19   : > { %p2697_p2 = pneg %p2696_p1 }
  0x1b   : > { %p2704_p3 = pnand %p2703_p9, %p2697_p2 }
  0x1d   : > { %2707 = shalt.err (!%p2704_p3)
}
  0x1e   : > { %s3395_s13 = smov 128   ;;  %s3396_s14 = smov 8  }
  0x1f   : > { %s3406_s0 = sld [smem:[#allocation16_spill]]  ;;  %p29_p4 = scmp.ge.s32.totalorder %s28_s11, 2 }
  0x20   : > { %s265_s17 = sand.u32 1, %s2904_s26   ;;  %s267_s18 = sand.u32 1, %s2892_s23  }
  0x21   : > { %s3424_s11 = smov (%p29_p4, %s28_s11), 0  ;;  %s2119_s19 = sshll.u32 %s267_s18, 6 }
  0x22   : > { %s87_s20 = ssub.s32 %s2900_s25, %s3424_s11  ;;  %s2245_s21 = sshll.u32 %s2900_s25, 10 }
  0x23   : > { %p88_p3 = scmp.eq.s32.totalorder %s87_s20, 0  ;;  %s3407_s2 = sld [smem:[#allocation17_spill]] }
  0x24   : > { %s269_s6 = scalar_lea.vmem [#allocation8], %s2119_s19  ;;  %s3408_s15 = sadd.s32 1, %s2892_s23 }
  0x25   : > { %2398 = dma.hbm_to_vmem [thread:$0]  (!%p3015_p11), %s3406_s0, 512, %s235_s8, [#allocation4], %s3395_s13, %s3395_s13, %s3396_s14  }
  0x26   : > { %s276_s5 = sshll.u32 %s269_s6, 4  ;;  %s3052_s16 = sshll.u32 %s267_s18, 8  ;;  %s277_s5 = int_to_ptr.vmem [resolvable:$true] %s276_s5 }
  0x27   : > { %s3050_s8 = scalar_select %p88_p3, %s2892_s23, %s3408_s15  }
  0x28   : > { %s3054_s13 = scalar_lea.sflag [#allocation4], %s265_s17  ;;  %p2710_p10 = pneg %p3019_p12 }
  0x29   : > { %s275_s28 = scalar_lea.hbm %s3407_s2, %s2245_s21  ;;  %s2721_s14 = scalar_lea.vmem %s277_s5, 1024 }
  0x2a   : > { %p2722_p0 = scmp.ne.s32.totalorder %s277_s5, %s2721_s14  ;;  %s2909_s20 = smov [#allocation8]  }
  0x2b   : > { %s2726_s21 = sshll.u32 %s2909_s20, 4  ;;  %s2727_s21 = int_to_ptr.vmem [resolvable:$false] %s2726_s21 }
  0x2c   : > { %p2724_p1 = pnand %p2722_p0, %p2710_p10  ;;  %s2728_s6 = scalar_lea.vmem %s2727_s21, 2048 }
  0x2d   : > { %p2729_p5 = scmp.lt.s32.totalorder %s277_s5, %s2727_s21  ;;  %p2730_p7 = scmp.lt.s32.totalorder %s2728_s6, %s2721_s14 }
  0x2e   : > { %p2725_p2 = pneg %p2724_p1 }
  0x2f   : > { %p2731_p9 = por %p2730_p7, %p2729_p5 }
  0x31   : > { %p2732_p4 = pnand %p2731_p9, %p2725_p2 }
  0x33   : > { %2735 = shalt.err (!%p2732_p4)
}
  0x34   : > { %s3397_s18 = smov 64   ;;  %s2911_s17 = smov 4  }
  0x35   : > { %2405 = dma.hbm_to_vmem [thread:$0]  (!%p3019_p12), %s275_s28, 1024, %s277_s5, %s3054_s13, %s3397_s18, %s3397_s18, %s2911_s17  }
  0x36   : > { %s2246_s19 = sshll.u32 %s2900_s25, 12  ;;  %s290_s15 = scalar_lea.vmem [#allocation9], %s3052_s16 }
  0x37   : > { %s296_s14 = scalar_lea.hbm %s3390_s3, %s2246_s19  ;;  %s297_s20 = sshll.u32 %s290_s15, 4  ;;  %s298_s20 = int_to_ptr.vmem [resolvable:$true] %s297_s20 }
  0x38   : > { %s2749_s21 = scalar_lea.vmem %s298_s20, 4096  ;;  %s2912_s6 = smov [#allocation9]  }
  0x39   : > { %p2750_p3 = scmp.ne.s32.totalorder %s298_s20, %s2749_s21  ;;  %s2754_s0 = sshll.u32 %s2912_s6, 4  ;;  %s2755_s0 = int_to_ptr.vmem [resolvable:$false] %s2754_s0 }
  0x3a   : > { %s2756_s2 = scalar_lea.vmem %s2755_s0, 8192  ;;  %p2757_p2 = scmp.lt.s32.totalorder %s298_s20, %s2755_s0 }
  0x3b   : > { %p2752_p0 = pnand %p2750_p3, %p2710_p10  ;;  %p2758_p5 = scmp.lt.s32.totalorder %s2756_s2, %s2749_s21 }
  0x3d   : > { %p2753_p1 = pneg %p2752_p0  ;;  %p2759_p7 = por %p2758_p5, %p2757_p2 }
  0x3f   : > { %p2760_p9 = pnand %p2759_p7, %p2753_p1 }
  0x41   : > { %2763 = shalt.err (!%p2760_p9)
}
  0x42   : > { %s2913_s5 = smov 256   ;;  %s2914_s28 = smov 16  }
  0x43   : > { %2408 = dma.hbm_to_vmem [thread:$0]  (!%p3019_p12), %s296_s14, 4096, %s298_s20, %s3054_s13, %s2913_s5, %s2913_s5, %s2914_s28  }
  0x44   : > { %s2915_s7 = smov [#allocation6]   ;;  %s3081_s6 = scalar_lea.hbm %s3391_s4, %s2246_s19 }
  0x45   : > { %s251_s12 = sshll.u32 %s2915_s7, 4  ;;  %s252_s12 = int_to_ptr.vmem [resolvable:$true] %s251_s12 }
  0x46   : > { %s2775_s0 = scalar_lea.vmem %s252_s12, 512  ;;  %p2783_p1 = scmp.lt.s32.totalorder %s252_s12, %s252_s12 }
  0x47   : > { %p2776_p4 = scmp.ne.s32.totalorder %s252_s12, %s2775_s0  ;;  %p2784_p2 = scmp.lt.s32.totalorder %s2775_s0, %s2775_s0 }
  0x49   : > { %p2778_p3 = pnand %p2776_p4, %p2684_p13  ;;  %p2785_p5 = por %p2784_p2, %p2783_p1 }
  0x4b   : > { %p2779_p0 = pneg %p2778_p3 }
  0x4d   : > { %p2786_p7 = pnand %p2785_p5, %p2779_p0 }
  0x4f   : > { %2789 = shalt.err (!%p2786_p7)
}
  0x50   : > { %s3409_s2 = smov 8   ;;  %s3410_s14 = smov 128  }
  0x51   : > { %2401 = dma.hbm_to_vmem [thread:$0]  (!%p3015_p11), %s3388_s1, 512, %s252_s12, [#allocation7], %s3410_s14, %s3410_s14, %s3409_s2  }
  0x52   : > { %s311_s19 = scalar_lea.vmem [#allocation10], %s3052_s16  ;;  %s2916_s28 = smov [#allocation10]  }
  0x53   : > { %s318_s21 = sshll.u32 %s311_s19, 4  ;;  %s2808_s9 = sshll.u32 %s2916_s28, 4  ;;  %s319_s21 = int_to_ptr.vmem [resolvable:$true] %s318_s21  ;;  %s2809_s9 = int_to_ptr.vmem [resolvable:$false] %s2808_s9 }
  0x54   : > { %s2803_s5 = scalar_lea.vmem %s319_s21, 4096  ;;  %s2810_s7 = scalar_lea.vmem %s2809_s9, 8192 }
  0x55   : > { %p2804_p13 = scmp.ne.s32.totalorder %s319_s21, %s2803_s5  ;;  %p2811_p3 = scmp.lt.s32.totalorder %s319_s21, %s2809_s9 }
  0x56   : > { %p2812_p0 = scmp.lt.s32.totalorder %s2810_s7, %s2803_s5 }
  0x57   : > { %p2806_p9 = pnand %p2804_p13, %p2710_p10 }
  0x58   : > { %p2813_p1 = por %p2812_p0, %p2811_p3 }
  0x59   : > { %p2807_p4 = pneg %p2806_p9 }
  0x5b   : > { %p2814_p2 = pnand %p2813_p1, %p2807_p4 }
  0x5d   : > { %2817 = shalt.err (!%p2814_p2)
}
  0x5e   : > { %s3411_s16 = smov 64   ;;  %338 = sbr.rel (%p3006_p8) target bundleno = 2119 (0x847), region = 44 }
  0x5f   : > { %2411 = dma.hbm_to_vmem [thread:$0]  (!%p3019_p12), %s3081_s6, 4096, %s319_s21, %s3054_s13, %s3411_s16, %s3411_s16, %s2911_s17  }
  0x60   : > { %p3412_p11 = scmp.eq.s32.totalorder (!%p3006_p8), %s2990_s27, 0 }
  0x63   : > { %2867 = dma.done.wait (%p3412_p11), [#allocation4], 512   ;;  %p3413_p10 = pmov %p3412_p11 }
  0x65   : > { %2869 = vsyncadd (%p3413_p10), [#allocation4], 4294966784  ;;  %p3414_p5 = pmov %p3413_p10 }
  0x67   : > { %2871 = dma.done.wait (%p3414_p5), [#allocation7], 512   ;;  %p3415_p7 = pmov %p3414_p5 }
  0x68   : > { %s348_s10 = sand.u32 1, %s2990_s27   ;;  %s350_s13 = sand.u32 1, %s2888_s22  }
  0x69   : > { %2873 = vsyncadd (%p3415_p7), [#allocation7], 4294966784  ;;  %s2131_s17 = sshll.u32 %s350_s13, 6  ;;  %s349_s30 = scalar_lea.sflag [#allocation4], %s348_s10 }
  0x6a   : > { %s3117_s12 = scalar_lea.vmem [#allocation8], %s2131_s17 }
  0x6b   : > { %2875 = dma.done.wait (%p3001_p6), %s349_s30, 9216  }
  0x6c   : > { %2877 = vsyncadd (%p3001_p6), %s349_s30, 4294958080  ;;  %s2132_s15 = sshll.u32 %s350_s13, 8  ;;  %p411_p8 = scmp.lt.s32.totalorder %s2896_s24, 1 }
  0x6d   : > { %s3416_s20 = sld [smem:[#allocation18_spill]]  ;;  %s3130_s19 = scalar_lea.vmem [#allocation9], %s2132_s15 }
  0x6e   : > { %s412_s6 = scalar_select %p411_p8, %s2896_s24, 1 }
  0x6f   : > { %s3132_s21 = scalar_lea.vmem [#allocation10], %s2132_s15  ;;  %p2136_p12 = scmp.ne.s32.totalorder %s2896_s24, 0 }
  0x70   : > { %s2248_s0 = sshll.u32 %s412_s6, 5 }
  0x71   : > { %421 = sbr.rel (%p2136_p12) target bundleno = 602 (0x25a), region = 68 }
  0x73   : > { %s3128_s18 = scalar_lea.vmem %s3416_s20, %s2248_s0 }
  0x76   : > { %v422_v0 = vlaneseq  ;;  %v429_v1 = vld [vmem:[#allocation6] sm:$0xff]  ;;  %v431_v2 = vld [vmem:[#allocation6 + $0x10] sm:$0xff]  ;;  %v430_v3 = vld [vmem:[#allocation6 + $0x8] sm:$0xff]  ;;  %v2917_v7 = vmov 0.0   ;;  %v2918_v16 = vmov 1.0   ;;  %vm449_vm6 = vcmask 130048  }
  0x77   : > { %vm433_vm0 = vcmp.ne.f32.partialorder %v429_v1, 0.0  ;;  %vm435_vm1 = vcmp.ne.f32.partialorder %v431_v2, 0.0  ;;  %v432_v4 = vld [vmem:[#allocation6 + $0x18] sm:$0xff]  ;;  %vm434_vm2 = vcmp.ne.f32.partialorder %v430_v3, 0.0  ;;  %2331 = vmatprep.subr.mxu0 %v2918_v16  ;;  %2338 = vmatprep.subr.mxu1 %v2918_v16  ;;  %v2919_v26 = vmov 0   ;;  %v761_v39 = vld [vmem:[#allocation3] sm:$0xff] }
  0x78   : > { %v423_v5 = vshrl.u32 %v422_v0, 7  ;;  %v426_v6 = vand.u32 127, %v422_v0  ;;  %v2137_v8 = vsel %vm433_vm0, 1.0, %v2917_v7  ;;  %v2139_v9 = vsel %vm435_vm1, 1.0, %v2917_v7  ;;  %2332 = vmatpush3.msra.mxu0 %v2918_v16  ;;  %2339 = vmatpush3.msra.mxu1 %v2918_v16  ;;  %v762_v40 = vld [vmem:[#allocation3 + $0x8] sm:$0xff]  ;;  %v763_v41 = vld [vmem:[#allocation3 + $0x10] sm:$0xff] }
  0x79   : > { %vm436_vm3 = vcmp.ne.f32.partialorder %v432_v4, 0.0  ;;  %v2138_v11 = vsel %vm434_vm2, 1.0, %v2917_v7  ;;  %2333 = vmatprep.subr.mxu0 %v2918_v16  ;;  %2340 = vmatprep.subr.mxu1 %v2918_v16  ;;  %v764_v42 = vld [vmem:[#allocation3 + $0x18] sm:$0xff]  ;;  %765 = vst [vmem:[#allocation11] sm:$0xff] %v761_v39  ;;  %766 = vst [vmem:[#allocation11 + $0x8] sm:$0xff] %v762_v40  ;;  %vm756_vm13 = vcmask 125952  }
  0x7a   : > { %vm427_vm4 = vcmp.eq.s32.totalorder %v423_v5, %v426_v6  ;;  %v424_v10 = vadd.s32 8, %v423_v5  ;;  %v2140_v12 = vsel %vm436_vm3, 1.0, %v2917_v7  ;;  %2334 = vmatpush3.msra.mxu0 %v2918_v16  ;;  %2341 = vmatpush3.msra.mxu1 %v2918_v16  ;;  %767 = vst [vmem:[#allocation11 + $0x10] sm:$0xff] %v763_v41  ;;  %768 = vst [vmem:[#allocation11 + $0x18] sm:$0xff] %v764_v42 }
  0x7b   : > { %v3135_v13 = vsel %vm427_vm4, 1.0, %v2137_v8  ;;  %v3137_v14 = vsel %vm427_vm4, 1.0, %v2139_v9  ;;  %2498 = vset.pattern.permute.xlu1 %v2919_v26 }
  0x7c   : > { %v2484_v15 = vpack.i.bf16 %v3137_v14, %v3135_v13  ;;  %vm428_vm5 = vcmp.eq.s32.totalorder %v424_v10, %v426_v6  ;;  %v450_v43 = vsel %vm449_vm6, %v3135_v13, 0.0  ;;  %v459_v45 = vsel %vm449_vm6, %v3137_v14, 0.0 }
  0x7d   : > { %v3141_v17 = vsel %vm428_vm5, 1.0, %v2138_v11  ;;  %v3143_v18 = vsel %vm428_vm5, 1.0, %v2140_v12 }
  0x7e   : > { %2485 = vxpose.xlu0.b32.start [1/2] (short) (narrow) %v2484_v15, 16  ;;  %v2486_v19 = vpack.i.bf16 %v3143_v18, %v3141_v17  ;;  %v451_v44 = vsel %vm449_vm6, %v3141_v17, 0.0  ;;  %v460_v46 = vsel %vm449_vm6, %v3143_v18, 0.0 }
  0x7f   : > { %v452_v47 = vadd.f32 %v451_v44, %v450_v43  ;;  %v461_v48 = vadd.f32 %v460_v46, %v459_v45 }
  0x81   : > { %v453_v49 = vrot.slane %v452_v47, 4  ;;  %v462_v50 = vrot.slane %v461_v48, 4 }
  0x82   : > { %2487 = vxpose.xlu0.b32.end [2/2] (short) (narrow) %v2486_v19, 16 }
  0x83   : > { %v454_v51 = vadd.f32 %v453_v49, %v452_v47  ;;  %v463_v52 = vadd.f32 %v462_v50, %v461_v48 }
  0x85   : > { %v455_v53 = vrot.slane %v454_v51, 2  ;;  %v464_v54 = vrot.slane %v463_v52, 2 }
  0x87   : > { %v456_v55 = vadd.f32 %v455_v53, %v454_v51  ;;  %v465_v56 = vadd.f32 %v464_v54, %v463_v52 }
  0x89   : > { %v457_v57 = vrot.slane %v456_v55, 1  ;;  %v466_v58 = vrot.slane %v465_v56, 1 }
  0x8b   : > { %v458_v59 = vadd.f32 %v457_v57, %v456_v55  ;;  %v467_v60 = vadd.f32 %v466_v58, %v465_v56 }
  0x8d   : > { %vm694_vm11 = vcmp.gt.f32.partialorder %v458_v59, 0.0  ;;  %vm695_vm12 = vcmp.gt.f32.partialorder %v467_v60, 0.0 }
  0xab   : > { %2499 = vset.pattern.permute.xlu0 %v2919_v26 }
  0xfa   : > { %v2488_v20 = vpop.trf.xlu0 }
  0xfb   : > { %v2489_v21 = vunpack.i.l.bf16 %v2488_v20  ;;  %v2492_v22 = vunpack.i.h.bf16 %v2488_v20 }
  0xfd   : > { %2335 = vmatprep.mubr.msk.f32.mxu0 %vm449_vm6, %v2489_v21  ;;  %2342 = vmatprep.mubr.msk.f32.mxu1 %vm449_vm6, %v2492_v22 }
  0xfe   : > { %v2493_v23 = vpop.trf.xlu0 }
  0xff   : > { %v2497_v24 = vunpack.i.h.bf16 %v2493_v23  ;;  %v2494_v25 = vunpack.i.l.bf16 %v2493_v23 }
 0x101   : > { %2336 = vmatmul.mubr.msk.f32.vlgmr.msra.gmra.mxu0 %vm449_vm6, %v2494_v25  ;;  %2343 = vmatmul.mubr.msk.f32.vlgmr.msra.gmra.mxu1 %vm449_vm6, %v2497_v24 }
 0x1c1   : > { %v2337_v27 = vpop.f32.mrf.mxu0  ;;  %v2344_v28 = vpop.f32.mrf.mxu1 }
 0x1c2   : > { %2500 = vrsqrt.f32 %v2337_v27  ;;  %vm701_vm7 = vcmp.gt.f32.partialorder %v2337_v27, 0.0  ;;  %vm703_vm10 = vcmp.gt.f32.partialorder %v2344_v28, 0.0 }
 0x1c3   : > { %v572_v29 = vpop.f32.mrf.mxu0  ;;  %v685_v30 = vpop.f32.mrf.mxu1 }
 0x1c4   : > { %2502 = vrsqrt.f32 %v572_v29  ;;  %vm702_vm8 = vcmp.gt.f32.partialorder %v685_v30, 0.0  ;;  %vm700_vm9 = vcmp.gt.f32.partialorder %v572_v29, 0.0 }
 0x1c5   : > { %2504 = vrsqrt.f32 %v685_v30 }
 0x1c6   : > { %2506 = vrsqrt.f32 %v2344_v28 }
 0x1c7   : > { %2508 = vrsqrt.f32 %v458_v59 }
 0x1c8   : > { %2510 = vrsqrt.f32 %v467_v60 }
 0x1cf   : > { %v2501_v31 = vpop.eup %2500 }
 0x1d0   : > { %v709_v32 = vsel %vm701_vm7, %v2501_v31, 0.0 }
 0x1d1   : > { %v2503_v33 = vpop.eup %2502  ;;  %723 = vperm.xlu1 %2498, %v709_v32  }
 0x1d2   : > { %v2505_v34 = vpop.eup %2504  ;;  %v708_v36 = vsel %vm700_vm9, %v2503_v33, 0.0 }
 0x1d3   : > { %v710_v35 = vsel %vm702_vm8, %v2505_v34, 0.0  ;;  %v2507_v37 = vpop.eup %2506 }
 0x1d4   : > { %728 = vperm.xlu0 %2499, %v710_v35   ;;  %v711_v38 = vsel %vm703_vm10, %v2507_v37, 0.0  ;;  %v2509_v61 = vpop.eup %2508 }
 0x1d5   : > { %718 = vperm.xlu1 %2498, %v708_v36   ;;  %v2511_v62 = vpop.eup %2510  ;;  %v698_v63 = vsel %vm694_vm11, %v2509_v61, 0.0 }
 0x1d6   : > { %v713_v0 = vmul.f32 %v698_v63, %v3141_v17  ;;  %v699_v1 = vsel %vm695_vm12, %v2511_v62, 0.0  ;;  %v712_v5 = vmul.f32 %v698_v63, %v3135_v13 }
 0x1d7   : > { %v714_v3 = vmul.f32 %v699_v1, %v3137_v14  ;;  %v715_v11 = vmul.f32 %v699_v1, %v3143_v18 }
 0x1d9   : > { %733 = vperm.xlu1 %2498, %v711_v38  }
 0x24c   : > { %v724_v2 = vpop.permute.xlu1 %723 }
 0x24d   : > { %v737_v4 = vmul.f32 %v724_v2, %v713_v0 }
 0x24f   : > { %v2250_v6 = vpack.c.bf16 %v737_v4, %v737_v4  ;;  %v729_v7 = vpop.permute.xlu0 %728 }
 0x250   : > { %v738_v8 = vmul.f32 %v729_v7, %v714_v3  ;;  %v719_v9 = vpop.permute.xlu1 %718 }
 0x251   : > { %758 = vst.msk [vmem:[#allocation2 + $0x4] sm:$0xf] %vm756_vm13, %v2250_v6  ;;  %v736_v10 = vmul.f32 %v719_v9, %v712_v5 }
 0x252   : > { %v2251_v12 = vpack.c.bf16 %v738_v8, %v738_v8 }
 0x253   : > { %v2249_v15 = vpack.c.bf16 %v736_v10, %v736_v10 }
 0x254   : > { %759 = vst.msk [vmem:[#allocation2 + $0x8] sm:$0xf] %vm756_vm13, %v2251_v12  ;;  %v734_v16 = vpop.permute.xlu1 %733 }
 0x255   : > { %757 = vst.msk [vmem:[#allocation2] sm:$0xf] %vm756_vm13, %v2249_v15  ;;  %v739_v17 = vmul.f32 %v734_v16, %v715_v11 }
 0x257   : > { %v2252_v19 = vpack.c.bf16 %v739_v17, %v739_v17 }
 0x259   : > { %760 = vst.msk [vmem:[#allocation2 + $0xc] sm:$0xf] %vm756_vm13, %v2252_v19 }
 0x25a PF: > { %v2512_v13 = vld [vmem:[%s3117_s12 + $0x38] sm:$0xff]   ;;  %v2513_v14 = vld [vmem:[%s3117_s12 + $0x30] sm:$0xff]   ;;  %v2514_v18 = vld [vmem:[%s3117_s12 + $0x28] sm:$0xff]   ;;  %v2920_v33 = vmov 0.0   ;;  %vm2921_vm14 = vmmov 0   ;;  %vm1016_vm15 = vcmask 130048   ;;  %v1127_v42 = vlaneseq }
 0x25b   : > { %2345 = vmatprep.subr.bf16.mxu0 %v2512_v13  ;;  %v2515_v20 = vld [vmem:[%s3117_s12 + $0x20] sm:$0xff]   ;;  %v886_v22 = vld [vmem:[#allocation11 + $0x8] sm:$0xff]  ;;  %v2516_v24 = vld [vmem:[%s3117_s12 + $0x18] sm:$0xff]   ;;  %2365 = vmatprep.subr.bf16.mxu1 %v2920_v33  ;;  %s2923_s24 = smov [#allocation11]   ;;  %p2417_p6 = scmp.eq.s32.totalorder %s2990_s27, 1 }
 0x25c   : > { %2346 = vmatpush3.bf16.msra.mxu0 %v2512_v13  ;;  %v885_v21 = vld [vmem:[#allocation11] sm:$0xff]  ;;  %v2520_v25 = vld [vmem:[#allocation2] sm:$0xff]   ;;  %v2518_v28 = vld [vmem:[%s3117_s12 + $0x8] sm:$0xff]   ;;  %2367 = vmatprep.mubr.msk.bf16.mxu1 %vm2921_vm14, %v2920_v33  ;;  %v3171_v43 = vshrl.u32 %v1127_v42, 7  ;;  %s1975_s29 = sshll.u32 %s2923_s24, 4  ;;  %s1976_s29 = int_to_ptr.vmem [resolvable:$true] %s1975_s29 }
 0x25d   : > { %2347 = vmatprep.subr.bf16.mxu0 %v2513_v14  ;;  %v889_v23 = vpack.c.bf16 %v886_v22, %v885_v21  ;;  %1000 = vxpose.xlu0.c.b16.start.end [1/1] (short) (narrow) %v2520_v25, 16  ;;  %v2517_v27 = vld [vmem:[%s3117_s12 + $0x10] sm:$0xff]   ;;  %v2519_v29 = vld [vmem:[%s3117_s12] sm:$0xff]   ;;  %v888_v31 = vld [vmem:[#allocation11 + $0x18] sm:$0xff]  ;;  %s2818_s5 = scalar_lea.vmem %s1976_s29, 512  ;;  %p2825_p3 = scmp.lt.s32.totalorder %s1976_s29, %s1976_s29 }
 0x25e   : > { %v887_v30 = vld [vmem:[#allocation11 + $0x10] sm:$0xff]  ;;  %v1129_v44 = vsub.s32 0, %v3171_v43  ;;  %v2525_v1 = vld [vmem:[%s3130_s19 + $0xe8] ss:$16 sps:$4 sm:$0xff]   ;;  %v2527_v2 = vld [vmem:[%s3130_s19 + $0xec] ss:$16 sps:$4 sm:$0xff]   ;;  %p2819_p13 = scmp.ne.s32.totalorder %s1976_s29, %s2818_s5  ;;  %p2826_p0 = scmp.lt.s32.totalorder %s2818_s5, %s2818_s5 }
 0x25f   : > { %2361 = vmatprep.mubr.bf16.mxu0 %v889_v23  ;;  %v890_v32 = vpack.c.bf16 %v888_v31, %v887_v30  ;;  %v3175_v45 = vld [vmem:[%s3128_s18] sm:$0xff]  ;;  %v2561_v42 = vld [vmem:[%s3130_s19 + $0x28] ss:$16 sps:$4 sm:$0xff]  }
 0x260   : > { %2348 = vmatpush3.bf16.msra.mxu0 %v2513_v14  ;;  %v2521_v26 = vld [vmem:[#allocation2 + $0x8] sm:$0xff]   ;;  %v1130_v46 = vrot.slane %v3175_v45, %v1129_v44  ;;  %v2522_v63 = vld [vmem:[%s3130_s19 + $0xe0] ss:$16 sps:$4 sm:$0xff]   ;;  %v2524_v0 = vld [vmem:[%s3130_s19 + $0xe4] ss:$16 sps:$4 sm:$0xff]   ;;  %p2820_p9 = pnand %p2819_p13, %p2417_p6  ;;  %p2827_p1 = por %p2826_p0, %p2825_p3 }
 0x261   : > { %2349 = vmatprep.subr.bf16.mxu0 %v2514_v18  ;;  %1067 = vxpose.xlu0.c.b16.start.end [1/1] (short) (narrow) %v2521_v26, 16  ;;  %v2536_v23 = vld [vmem:[%s3130_s19 + $0xa4] ss:$16 sps:$4 sm:$0xff]   ;;  %v2534_v25 = vld [vmem:[%s3130_s19 + $0xa0] ss:$16 sps:$4 sm:$0xff]  }
 0x262   : > { %v2537_v26 = vld [vmem:[%s3130_s19 + $0xa8] ss:$16 sps:$4 sm:$0xff]   ;;  %v2566_v44 = vld [vmem:[%s3130_s19 + $0x4] ss:$16 sps:$4 sm:$0xff]   ;;  %p2821_p4 = pneg %p2820_p9 }
 0x264   : > { %2350 = vmatpush3.bf16.msra.mxu0 %v2514_v18  ;;  %v2530_v18 = vld [vmem:[%s3130_s19 + $0xc4] ss:$16 sps:$4 sm:$0xff]   ;;  %p2828_p2 = pnand %p2827_p1, %p2821_p4 }
 0x265   : > { %2351 = vmatprep.subr.bf16.mxu0 %v2515_v20 }
 0x268   : > { %2352 = vmatpush3.bf16.msra.mxu0 %v2515_v20  ;;  %v2533_v20 = vld [vmem:[%s3130_s19 + $0xcc] ss:$16 sps:$4 sm:$0xff]  }
 0x269   : > { %2353 = vmatprep.subr.bf16.mxu0 %v2516_v24 }
 0x26c   : > { %2354 = vmatpush3.bf16.msra.mxu0 %v2516_v24  ;;  %v2539_v24 = vld [vmem:[%s3130_s19 + $0xac] ss:$16 sps:$4 sm:$0xff]  }
 0x26d   : > { %2355 = vmatprep.subr.bf16.mxu0 %v2517_v27 }
 0x270   : > { %2356 = vmatpush3.bf16.msra.mxu0 %v2517_v27  ;;  %v2542_v27 = vld [vmem:[%s3130_s19 + $0x84] ss:$16 sps:$4 sm:$0xff]  }
 0x271   : > { %2357 = vmatprep.subr.bf16.mxu0 %v2518_v28 }
 0x274   : > { %2358 = vmatpush3.bf16.msra.mxu0 %v2518_v28  ;;  %v2545_v28 = vld [vmem:[%s3130_s19 + $0x8c] ss:$16 sps:$4 sm:$0xff]  }
 0x275   : > { %2359 = vmatprep.subr.bf16.mxu0 %v2519_v29 }
 0x278   : > { %2360 = vmatpush3.bf16.msra.mxu0 %v2519_v29  ;;  %v2540_v29 = vld [vmem:[%s3130_s19 + $0x80] ss:$16 sps:$4 sm:$0xff]  }
 0x279   : > { %1430 = vmatprep.subr.bf16.mxu0 %v2527_v2  ;;  %v1193_v2 = vsub.s32 4, %v3171_v43 }
 0x27b   : > { %2362 = vmatmul.mubr.bf16.vlgmr.msra.gmra.mxu0 %v890_v32  ;;  %v2551_v32 = vld [vmem:[%s3130_s19 + $0x6c] ss:$16 sps:$4 sm:$0xff]  }
 0x27c   : > { %1431 = vmatpush1.bf16.msra.mxu0 %v2525_v1 }
 0x27d   : > { %1432 = vmatprep.subr.bf16.mxu0 %v2533_v20 }
 0x2bf   : > { %v1008_v39 = vpop.trf.xlu0 }
 0x2c3   : > { %v1075_v41 = vpop.trf.xlu0 }
 0x33b   : > { %v2363_v34 = vpop.f32.mrf.mxu0 }
 0x33d   : > { %v973_v35 = vpop.f32.mrf.mxu0 }
 0x33f   : > { %v2364_v36 = vpop.f32.mrf.mxu0 }
 0x340   : > { %v993_v40 = vpack.c.bf16 %v2364_v36, %v2363_v34  ;;  %v2549_v34 = vld [vmem:[%s3130_s19 + $0x68] ss:$16 sps:$4 sm:$0xff]   ;;  %v2554_v36 = vld [vmem:[%s3130_s19 + $0x44] ss:$16 sps:$4 sm:$0xff]  }
 0x341   : > { %v976_v37 = vpop.f32.mrf.mxu0 }
 0x342   : > { %v992_v38 = vpack.c.bf16 %v976_v37, %v973_v35  ;;  %v2552_v35 = vld [vmem:[%s3130_s19 + $0x40] ss:$16 sps:$4 sm:$0xff]   ;;  %v2555_v37 = vld [vmem:[%s3130_s19 + $0x48] ss:$16 sps:$4 sm:$0xff]  }
 0x344   : > { %2366 = vmatpush3.bf16.msra.mxu1 %v992_v38  ;;  %v2557_v38 = vld [vmem:[%s3130_s19 + $0x4c] ss:$16 sps:$4 sm:$0xff]  }
 0x345   : > { %2371 = vmatprep.subr.bf16.mxu1 %v2920_v33 }
 0x347   : > { %2368 = vmatmul.mubr.msk.bf16.vlgmr.msra.gmra.mxu1 %vm1016_vm15, %v1008_v39  ;;  %v2560_v39 = vld [vmem:[%s3130_s19 + $0x24] ss:$16 sps:$4 sm:$0xff]  }
 0x348   : > { %2372 = vmatpush3.bf16.msra.mxu1 %v993_v40  ;;  %2373 = vmatprep.mubr.msk.bf16.mxu1 %vm2921_vm14, %v2920_v33  ;;  %v2546_v33 = vld [vmem:[%s3130_s19 + $0x60] ss:$16 sps:$4 sm:$0xff]   ;;  %v2563_v40 = vld [vmem:[%s3130_s19 + $0x2c] ss:$16 sps:$4 sm:$0xff]  }
 0x349   : > { %1377 = vmatprep.subr.bf16.mxu1 %v2524_v0 }
 0x34f   : > { %2374 = vmatmul.mubr.msk.bf16.vlgmr.msra.gmra.mxu1 %vm1016_vm15, %v1075_v41  ;;  %v2558_v41 = vld [vmem:[%s3130_s19 + $0x20] ss:$16 sps:$4 sm:$0xff]  }
 0x350   : > { %1378 = vmatpush1.bf16.msra.mxu1 %v2522_v63 }
 0x351   : > { %1379 = vmatprep.subr.bf16.mxu1 %v2530_v18 }
 0x407   : > { %v1054_v47 = vpop.f32.mrf.mxu1 }
 0x408   : > { %v1131_v48 = vadd.f32 %v1130_v46, %v1054_v47  ;;  %v2922_v47 = vmov 0  }
 0x409   : > { %v2369_v49 = vpop.f32.mrf.mxu1  ;;  %1409 = vmatprep.mubr.bf16.mxu1 %v2922_v47  ;;  %1462 = vmatprep.mubr.bf16.mxu0 %v2922_v47 }
 0x40a   : > { %v1135_v50 = vadd.f32 %v1131_v48, %v885_v21  ;;  %v2528_v21 = vld [vmem:[%s3130_s19 + $0xc0] ss:$16 sps:$4 sm:$0xff]   ;;  %v2567_v49 = vld [vmem:[%s3130_s19 + $0x8] ss:$16 sps:$4 sm:$0xff]  }
 0x40b   : > { %v1057_v51 = vpop.f32.mrf.mxu1  ;;  %1380 = vmatpush1.bf16.msra.mxu1 %v2528_v21  ;;  %v2564_v48 = vld [vmem:[%s3130_s19] ss:$16 sps:$4 sm:$0xff]   ;;  %v2570_v21 = vld [vmem:[%s3132_s21 + $0x78] sm:$0xff]  }
 0x40c   : > { %v1132_v52 = vadd.f32 %v1130_v46, %v1057_v51  ;;  %1139 = vadd.xlane.f32.xlu1 %v1135_v50  ;;  %1381 = vmatprep.subr.bf16.mxu1 %v2536_v23  ;;  %v2573_v23 = vld [vmem:[%s3132_s21 + $0xb8] sm:$0xff]  }
 0x40d   : > { %v2370_v53 = vpop.f32.mrf.mxu1 }
 0x40e   : > { %v1136_v54 = vadd.f32 %v1132_v52, %v886_v22  ;;  %v2531_v22 = vld [vmem:[%s3130_s19 + $0xc8] ss:$16 sps:$4 sm:$0xff]  }
 0x40f   : > { %v1120_v55 = vpop.f32.mrf.mxu1  ;;  %1433 = vmatpush1.bf16.msra.mxu0 %v2531_v22  ;;  %1382 = vmatpush1.bf16.msra.mxu1 %v2534_v25  ;;  %v2572_v22 = vld [vmem:[%s3132_s21 + $0x38] sm:$0xff]   ;;  %v2575_v25 = vld [vmem:[%s3132_s21 + $0xf0] sm:$0xff]  }
 0x410   : > { %v1133_v56 = vadd.f32 %v1130_v46, %v1120_v55  ;;  %1141 = vadd.xlane.f32.xlu1 %v1136_v54  ;;  %1434 = vmatprep.subr.bf16.mxu0 %v2539_v24  ;;  %v2574_v24 = vld [vmem:[%s3132_s21 + $0x70] sm:$0xff]  }
 0x411   : > { %v2375_v57 = vpop.f32.mrf.mxu1  ;;  %1383 = vmatprep.subr.bf16.mxu1 %v2542_v27  ;;  %v2577_v27 = vld [vmem:[%s3132_s21 + $0xb0] sm:$0xff]  }
 0x412   : > { %v1137_v58 = vadd.f32 %v1133_v56, %v887_v30  ;;  %v2543_v30 = vld [vmem:[%s3130_s19 + $0x88] ss:$16 sps:$4 sm:$0xff]  }
 0x413   : > { %v1123_v59 = vpop.f32.mrf.mxu1  ;;  %1435 = vmatpush1.bf16.msra.mxu0 %v2537_v26  ;;  %1384 = vmatpush1.bf16.msra.mxu1 %v2540_v29  ;;  %v2576_v26 = vld [vmem:[%s3132_s21 + $0x30] sm:$0xff]   ;;  %v2579_v29 = vld [vmem:[%s3132_s21 + $0xe8] sm:$0xff]  }
 0x414   : > { %v1134_v60 = vadd.f32 %v1130_v46, %v1123_v59  ;;  %1143 = vadd.xlane.f32.xlu0 %v1137_v58  ;;  %1436 = vmatprep.subr.bf16.mxu0 %v2545_v28  ;;  %v2569_v46 = vld [vmem:[%s3130_s19 + $0xc] ss:$16 sps:$4 sm:$0xff]  }
 0x415   : > { %v2376_v61 = vpop.f32.mrf.mxu1  ;;  %v2578_v28 = vld [vmem:[%s3132_s21 + $0x68] sm:$0xff]  }
 0x416   : > { %v1138_v62 = vadd.f32 %v1134_v60, %v888_v31  ;;  %v2548_v31 = vld [vmem:[%s3130_s19 + $0x64] ss:$16 sps:$4 sm:$0xff]  }
 0x417   : > { %1437 = vmatpush1.bf16.msra.mxu0 %v2543_v30  ;;  %1385 = vmatprep.subr.bf16.mxu1 %v2548_v31  ;;  %v2580_v30 = vld [vmem:[%s3132_s21 + $0x28] sm:$0xff]  }
 0x418   : > { %1145 = vadd.xlane.f32.xlu1 %v1138_v62  ;;  %1438 = vmatprep.subr.bf16.mxu0 %v2551_v32  ;;  %v2581_v31 = vld [vmem:[%s3132_s21 + $0xa8] sm:$0xff]   ;;  %v2582_v32 = vld [vmem:[%s3132_s21 + $0x60] sm:$0xff]  }
 0x419   : > { %1386 = vmatpush1.bf16.msra.mxu1 %v2546_v33  ;;  %v2583_v33 = vld [vmem:[%s3132_s21 + $0xe0] sm:$0xff]  }
 0x41a   : > { %1387 = vmatprep.subr.bf16.mxu1 %v2554_v36  ;;  %v2586_v36 = vld [vmem:[%s3132_s21 + $0x58] sm:$0xff]  }
 0x41b   : > { %1439 = vmatpush1.bf16.msra.mxu0 %v2549_v34  ;;  %v2584_v34 = vld [vmem:[%s3132_s21 + $0x20] sm:$0xff]  }
 0x41c   : > { %1440 = vmatprep.subr.bf16.mxu0 %v2557_v38  ;;  %v2588_v38 = vld [vmem:[%s3132_s21 + $0x18] sm:$0xff]  }
 0x41d   : > { %1388 = vmatpush1.bf16.msra.mxu1 %v2552_v35  ;;  %v2585_v35 = vld [vmem:[%s3132_s21 + $0xa0] sm:$0xff]  }
 0x41e   : > { %1389 = vmatprep.subr.bf16.mxu1 %v2560_v39  ;;  %v2589_v39 = vld [vmem:[%s3132_s21 + $0x98] sm:$0xff]  }
 0x41f   : > { %1441 = vmatpush1.bf16.msra.mxu0 %v2555_v37  ;;  %v2587_v37 = vld [vmem:[%s3132_s21 + $0xd8] sm:$0xff]  }
 0x420   : > { %1442 = vmatprep.subr.bf16.mxu0 %v2563_v40  ;;  %v2590_v40 = vld [vmem:[%s3132_s21 + $0x50] sm:$0xff]  }
 0x421   : > { %1390 = vmatpush1.bf16.msra.mxu1 %v2558_v41  ;;  %v2591_v41 = vld [vmem:[%s3132_s21 + $0xd0] sm:$0xff]  }
 0x422   : > { %1391 = vmatprep.subr.bf16.mxu1 %v2566_v44  ;;  %v2593_v44 = vld [vmem:[%s3132_s21 + $0x90] sm:$0xff]  }
 0x423   : > { %1443 = vmatpush1.bf16.msra.mxu0 %v2561_v42  ;;  %v2592_v42 = vld [vmem:[%s3132_s21 + $0x10] sm:$0xff]  }
 0x424   : > { %1444 = vmatprep.subr.bf16.mxu0 %v2569_v46  ;;  %v2594_v46 = vld [vmem:[%s3132_s21 + $0x48] sm:$0xff]  }
 0x425   : > { %1392 = vmatpush1.bf16.msra.mxu1 %v2564_v48  ;;  %v2596_v48 = vld [vmem:[%s3132_s21 + $0x8] sm:$0xff]  }
 0x426   : > { %2275 = vmatprep.subr.bf16.mxu1 %v2570_v21 }
 0x427   : > { %1445 = vmatpush1.bf16.msra.mxu0 %v2567_v49  ;;  %v2597_v49 = vld [vmem:[%s3132_s21 + $0x88] sm:$0xff]  }
 0x495   : > { %v1140_v3 = vpop.xlane.xlu1 %1139 }
 0x496   : > { %v1147_v4 = vmul.f32 0.0078125, %v1140_v3 }
 0x498   : > { %v3182_v5 = vsub.f32 %v1135_v50, %v1147_v4 }
 0x499   : > { %v1142_v6 = vpop.xlane.xlu1 %1141 }
 0x49a   : > { %v1148_v7 = vmul.f32 0.0078125, %v1142_v6  ;;  %v1155_v8 = vmul.f32 %v3182_v5, %v3182_v5 }
 0x49c   : > { %v3186_v9 = vsub.f32 %v1136_v54, %v1148_v7  ;;  %1159 = vadd.xlane.f32.xlu1 %v1155_v8  ;;  %v1194_v7 = vrot.slane %v3175_v45, %v1193_v2 }
 0x49d   : > { %v1144_v10 = vpop.xlane.xlu0 %1143 }
 0x49e   : > { %v1149_v11 = vmul.f32 0.0078125, %v1144_v10  ;;  %v1156_v12 = vmul.f32 %v3186_v9, %v3186_v9 }
 0x4a0   : > { %v3190_v15 = vsub.f32 %v1137_v58, %v1149_v11  ;;  %1161 = vadd.xlane.f32.xlu1 %v1156_v12 }
 0x4a1   : > { %v1146_v16 = vpop.xlane.xlu1 %1145 }
 0x4a2   : > { %v1150_v17 = vmul.f32 0.0078125, %v1146_v16  ;;  %v1157_v19 = vmul.f32 %v3190_v15, %v3190_v15 }
 0x4a4   : > { %v3194_v13 = vsub.f32 %v1138_v62, %v1150_v17  ;;  %1163 = vadd.xlane.f32.xlu1 %v1157_v19  ;;  %v1185_v62 = vsub.s32 3, %v3171_v43 }
 0x4a6   : > { %v1158_v14 = vmul.f32 %v3194_v13, %v3194_v13  ;;  %v1186_v1 = vrot.slane %v3175_v45, %v1185_v62 }
 0x4a8   : > { %1165 = vadd.xlane.f32.xlu0 %v1158_v14 }
 0x525   : > { %v1160_v50 = vpop.xlane.xlu1 %1159 }
 0x526   : > { %v1167_v51 = vmul.f32 0.0078125, %v1160_v50  ;;  %v2598_v50 = vld [vmem:[%s3132_s21 + $0x40] sm:$0xff]  }
 0x528   : > { %v1171_v52 = vadd.f32 1e-05, %v1167_v51  ;;  %v2599_v51 = vld [vmem:[%s3132_s21 + $0xc0] sm:$0xff]  }
 0x529   : > { %v1162_v53 = vpop.xlane.xlu1 %1161 }
 0x52a   : > { %2602 = vrsqrt.f32 %v1171_v52  ;;  %v1168_v54 = vmul.f32 0.0078125, %v1162_v53  ;;  %v2600_v52 = vld [vmem:[%s3132_s21] sm:$0xff]  }
 0x52b   : > { %v2601_v53 = vld [vmem:[%s3132_s21 + $0x80] sm:$0xff]  }
 0x52c   : > { %v1172_v55 = vadd.f32 1e-05, %v1168_v54  ;;  %v1203_v54 = vsub.s32 1, %v3171_v43 }
 0x52d   : > { %v1164_v56 = vpop.xlane.xlu1 %1163 }
 0x52e   : > { %2604 = vrsqrt.f32 %v1172_v55  ;;  %v1169_v57 = vmul.f32 0.0078125, %v1164_v56  ;;  %v883_v55 = vld [vmem:[%s3128_s18 + $0x10] sm:$0xff]  ;;  %v882_v56 = vld [vmem:[%s3128_s18 + $0x8] sm:$0xff] }
 0x530   : > { %v1173_v58 = vadd.f32 1e-05, %v1169_v57  ;;  %v884_v57 = vld [vmem:[%s3128_s18 + $0x18] sm:$0xff] }
 0x531   : > { %v1166_v59 = vpop.xlane.xlu0 %1165 }
 0x532   : > { %2606 = vrsqrt.f32 %v1173_v58  ;;  %v1170_v60 = vmul.f32 0.0078125, %v1166_v59  ;;  %v1204_v58 = vrot.slane %v3175_v45, %v1203_v54  ;;  %v1212_v59 = vrot.slane %v883_v55, %v1203_v54 }
 0x534   : > { %v1174_v61 = vadd.f32 1e-05, %v1170_v60  ;;  %v1208_v60 = vrot.slane %v882_v56, %v1203_v54 }
 0x536   : > { %2608 = vrsqrt.f32 %v1174_v61  ;;  %v1216_v61 = vrot.slane %v884_v57, %v1203_v54 }
 0x537   : > { %v2603_v63 = vpop.eup %2602 }
 0x538   : > { %v1179_v0 = vmul.f32 %v2603_v63, %v3182_v5 }
 0x53a   : > { %v1187_v6 = vmul.f32 %v1186_v1, %v1179_v0 }
 0x53b   : > { %v2605_v3 = vpop.eup %2604 }
 0x53c   : > { %v1180_v4 = vmul.f32 %v2605_v3, %v3186_v9  ;;  %v3232_v11 = vadd.f32 %v1194_v7, %v1187_v6 }
 0x53e   : > { %v1188_v8 = vmul.f32 %v1186_v1, %v1180_v4 }
 0x53f   : > { %v2607_v10 = vpop.eup %2606 }
 0x540   : > { %v3234_v12 = vadd.f32 %v1194_v7, %v1188_v8  ;;  %v1181_v16 = vmul.f32 %v2607_v10, %v3190_v15 }
 0x542   : > { %v1199_v5 = vpack.c.bf16 %v3234_v12, %v3232_v11  ;;  %v1189_v19 = vmul.f32 %v1186_v1, %v1181_v16 }
 0x543   : > { %v2609_v17 = vpop.eup %2608 }
 0x544   : > { %1410 = vmatmul.mubr.bf16.vlgmr.msra.gmra.mxu1 %v1199_v5  ;;  %1463 = vmatmul.mubr.bf16.vlgmr.msra.gmra.mxu0 %v1199_v5  ;;  %v1182_v9 = vmul.f32 %v2609_v17, %v3194_v13  ;;  %v3240_v18 = vadd.f32 %v1194_v7, %v1189_v19  ;;  %v2571_v13 = vld [vmem:[%s3132_s21 + $0xf8] sm:$0xff]  }
 0x545   : > { %1419 = vmatprep.mubr.bf16.mxu1 %v2922_v47  ;;  %1472 = vmatprep.mubr.bf16.mxu0 %v2922_v47  ;;  %v2595_v47 = vld [vmem:[%s3132_s21 + $0xc8] sm:$0xff]  }
 0x546   : > { %v1190_v14 = vmul.f32 %v1186_v1, %v1182_v9  ;;  %2303 = vmatprep.subr.bf16.mxu0 %v2571_v13  ;;  %2276 = vmatpush3.bf16.msra.mxu1 %v2572_v22 }
 0x547   : > { %2304 = vmatpush3.bf16.msra.mxu0 %v2573_v23  ;;  %2277 = vmatprep.subr.bf16.mxu1 %v2574_v24 }
 0x548   : > { %v3242_v15 = vadd.f32 %v1194_v7, %v1190_v14  ;;  %2305 = vmatprep.subr.bf16.mxu0 %v2575_v25 }
 0x54a   : > { %v1200_v20 = vpack.c.bf16 %v3242_v15, %v3240_v18  ;;  %2278 = vmatpush3.bf16.msra.mxu1 %v2576_v26 }
 0x54b   : > { %2306 = vmatpush3.bf16.msra.mxu0 %v2577_v27  ;;  %2279 = vmatprep.subr.bf16.mxu1 %v2578_v28 }
 0x54c   : > { %1420 = vmatmul.mubr.bf16.gmra.mxu1 %v1200_v20  ;;  %1473 = vmatmul.mubr.bf16.gmra.mxu0 %v1200_v20 }
 0x54d   : > { %2307 = vmatprep.subr.bf16.mxu0 %v2579_v29 }
 0x54e   : > { %2280 = vmatpush3.bf16.msra.mxu1 %v2580_v30 }
 0x54f   : > { %2308 = vmatpush3.bf16.msra.mxu0 %v2581_v31  ;;  %2281 = vmatprep.subr.bf16.mxu1 %v2582_v32 }
 0x550   : > { %2309 = vmatprep.subr.bf16.mxu0 %v2583_v33 }
 0x552   : > { %2282 = vmatpush3.bf16.msra.mxu1 %v2584_v34 }
 0x553   : > { %2310 = vmatpush3.bf16.msra.mxu0 %v2585_v35  ;;  %2283 = vmatprep.subr.bf16.mxu1 %v2586_v36 }
 0x554   : > { %2311 = vmatprep.subr.bf16.mxu0 %v2587_v37 }
 0x556   : > { %2284 = vmatpush3.bf16.msra.mxu1 %v2588_v38 }
 0x557   : > { %2312 = vmatpush3.bf16.msra.mxu0 %v2589_v39  ;;  %2285 = vmatprep.subr.bf16.mxu1 %v2590_v40 }
 0x558   : > { %2313 = vmatprep.subr.bf16.mxu0 %v2591_v41 }
 0x55a   : > { %2286 = vmatpush3.bf16.msra.mxu1 %v2592_v42 }
 0x55b   : > { %2314 = vmatpush3.bf16.msra.mxu0 %v2593_v44  ;;  %2287 = vmatprep.subr.bf16.mxu1 %v2594_v46 }
 0x55c   : > { %2315 = vmatprep.subr.bf16.mxu0 %v2595_v47 }
 0x55e   : > { %2288 = vmatpush3.bf16.msra.mxu1 %v2596_v48 }
 0x55f   : > { %2316 = vmatpush3.bf16.msra.mxu0 %v2597_v49  ;;  %2289 = vmatprep.subr.bf16.mxu1 %v2598_v50 }
 0x560   : > { %2317 = vmatprep.subr.bf16.mxu0 %v2599_v51 }
 0x562   : > { %2290 = vmatpush3.bf16.msra.mxu1 %v2600_v52 }
 0x563   : > { %2318 = vmatpush3.bf16.msra.mxu0 %v2601_v53 }
 0x604   : > { %v1411_v62 = vpop.f32.mrf.mxu1  ;;  %v1464_v63 = vpop.f32.mrf.mxu0 }
 0x605   : > { %v3283_v0 = vadd.f32 %v1411_v62, %v1204_v58  ;;  %v3285_v1 = vadd.f32 %v1464_v63, %v1212_v59 }
 0x606   : > { %v1413_v2 = vpop.f32.mrf.mxu1  ;;  %v1466_v3 = vpop.f32.mrf.mxu0 }
 0x607   : > { %v2193_v4 = vmul.f32 -1.442695, %v3283_v0  ;;  %v2195_v6 = vmul.f32 -1.442695, %v3285_v1  ;;  %v3289_v7 = vadd.f32 %v1413_v2, %v1208_v60  ;;  %v3291_v8 = vadd.f32 %v1466_v3, %v1216_v61 }
 0x608   : > { %v1415_v10 = vpop.f32.mrf.mxu1  ;;  %v1468_v16 = vpop.f32.mrf.mxu0 }
 0x609   : > { %2610 = vpow2.f32 %v2193_v4  ;;  %v2194_v5 = vmul.f32 -1.442695, %v3289_v7  ;;  %v2196_v17 = vmul.f32 -1.442695, %v3291_v8  ;;  %v3295_v9 = vadd.f32 %v1415_v10, %v1204_v58 }
 0x60a   : > { %2612 = vpow2.f32 %v2195_v6  ;;  %v3297_v19 = vadd.f32 %v1468_v16, %v1212_v59  ;;  %v1417_v14 = vpop.f32.mrf.mxu1  ;;  %v1470_v20 = vpop.f32.mrf.mxu0 }
 0x60b   : > { %2614 = vpow2.f32 %v2194_v5  ;;  %v2197_v21 = vmul.f32 -1.442695, %v3295_v9  ;;  %v3300_v13 = vadd.f32 %v1417_v14, %v1208_v60  ;;  %v3302_v22 = vadd.f32 %v1470_v20, %v1216_v61 }
 0x60c   : > { %2616 = vpow2.f32 %v2196_v17  ;;  %v2199_v23 = vmul.f32 -1.442695, %v3297_v19  ;;  %v1421_v24 = vpop.f32.mrf.mxu1  ;;  %v1474_v25 = vpop.f32.mrf.mxu0 }
 0x60d   : > { %2618 = vpow2.f32 %v2197_v21  ;;  %v2198_v26 = vmul.f32 -1.442695, %v3300_v13  ;;  %v2200_v27 = vmul.f32 -1.442695, %v3302_v22  ;;  %v3307_v28 = vadd.f32 %v1421_v24, %v1204_v58 }
 0x60e   : > { %2620 = vpow2.f32 %v2199_v23  ;;  %v3309_v29 = vadd.f32 %v1474_v25, %v1212_v59  ;;  %v1423_v30 = vpop.f32.mrf.mxu1  ;;  %v1476_v31 = vpop.f32.mrf.mxu0 }
 0x60f   : > { %2622 = vpow2.f32 %v2198_v26  ;;  %v2201_v32 = vmul.f32 -1.442695, %v3307_v28  ;;  %v3312_v33 = vadd.f32 %v1423_v30, %v1208_v60  ;;  %v3314_v34 = vadd.f32 %v1476_v31, %v1216_v61 }
 0x610   : > { %2624 = vpow2.f32 %v2200_v27  ;;  %v2203_v35 = vmul.f32 -1.442695, %v3309_v29  ;;  %v1425_v36 = vpop.f32.mrf.mxu1  ;;  %v1478_v37 = vpop.f32.mrf.mxu0 }
 0x611   : > { %2626 = vpow2.f32 %v2201_v32  ;;  %v2202_v38 = vmul.f32 -1.442695, %v3312_v33  ;;  %v2204_v39 = vmul.f32 -1.442695, %v3314_v34  ;;  %v3319_v40 = vadd.f32 %v1425_v36, %v1204_v58 }
 0x612   : > { %2628 = vpow2.f32 %v2203_v35  ;;  %v3321_v41 = vadd.f32 %v1478_v37, %v1212_v59  ;;  %v1427_v42 = vpop.f32.mrf.mxu1  ;;  %v1480_v44 = vpop.f32.mrf.mxu0 }
 0x613   : > { %2630 = vpow2.f32 %v2202_v38  ;;  %v2205_v46 = vmul.f32 -1.442695, %v3319_v40  ;;  %v3324_v47 = vadd.f32 %v1427_v42, %v1208_v60  ;;  %v3326_v48 = vadd.f32 %v1480_v44, %v1216_v61 }
 0x614   : > { %2632 = vpow2.f32 %v2204_v39  ;;  %v2207_v49 = vmul.f32 -1.442695, %v3321_v41 }
 0x615   : > { %2634 = vpow2.f32 %v2205_v46  ;;  %v2206_v50 = vmul.f32 -1.442695, %v3324_v47  ;;  %v2208_v51 = vmul.f32 -1.442695, %v3326_v48 }
 0x616   : > { %v2611_v52 = vpop.eup %2610  ;;  %2636 = vpow2.f32 %v2207_v49 }
 0x617   : > { %v2613_v53 = vpop.eup %2612  ;;  %v1531_v54 = vadd.f32 1.0, %v2611_v52  ;;  %2638 = vpow2.f32 %v2206_v50 }
 0x618   : > { %v2615_v55 = vpop.eup %2614  ;;  %v1533_v56 = vadd.f32 1.0, %v2613_v53  ;;  %2640 = vpow2.f32 %v2208_v51 }
 0x619   : > { %v2617_v57 = vpop.eup %2616  ;;  %2642 = vrcp.f32 %v1531_v54  ;;  %v1532_v58 = vadd.f32 1.0, %v2615_v55 }
 0x61a   : > { %v2619_v59 = vpop.eup %2618  ;;  %2644 = vrcp.f32 %v1533_v56  ;;  %v1534_v60 = vadd.f32 1.0, %v2617_v57 }
 0x61b   : > { %v2621_v61 = vpop.eup %2620  ;;  %2646 = vrcp.f32 %v1532_v58  ;;  %v1535_v62 = vadd.f32 1.0, %v2619_v59 }
 0x61c   : > { %v2623_v63 = vpop.eup %2622  ;;  %2648 = vrcp.f32 %v1534_v60  ;;  %v1537_v2 = vadd.f32 1.0, %v2621_v61 }
 0x61d   : > { %v2625_v3 = vpop.eup %2624  ;;  %2650 = vrcp.f32 %v1535_v62  ;;  %v1536_v4 = vadd.f32 1.0, %v2623_v63 }
 0x61e   : > { %v2627_v6 = vpop.eup %2626  ;;  %2652 = vrcp.f32 %v1537_v2  ;;  %v1538_v10 = vadd.f32 1.0, %v2625_v3 }
 0x61f   : > { %v2629_v16 = vpop.eup %2628  ;;  %2654 = vrcp.f32 %v1536_v4  ;;  %v1539_v5 = vadd.f32 1.0, %v2627_v6 }
 0x620   : > { %v2631_v17 = vpop.eup %2630  ;;  %2656 = vrcp.f32 %v1538_v10  ;;  %v1541_v14 = vadd.f32 1.0, %v2629_v16 }
 0x621   : > { %v2633_v20 = vpop.eup %2632  ;;  %2658 = vrcp.f32 %v1539_v5  ;;  %v1540_v21 = vadd.f32 1.0, %v2631_v17 }
 0x622   : > { %v2635_v23 = vpop.eup %2634  ;;  %2660 = vrcp.f32 %v1541_v14  ;;  %v1542_v24 = vadd.f32 1.0, %v2633_v20 }
 0x623   : > { %v2637_v25 = vpop.eup %2636  ;;  %2662 = vrcp.f32 %v1540_v21  ;;  %v1543_v26 = vadd.f32 1.0, %v2635_v23 }
 0x624   : > { %v2639_v27 = vpop.eup %2638  ;;  %2664 = vrcp.f32 %v1542_v24  ;;  %v1545_v30 = vadd.f32 1.0, %v2637_v25 }
 0x625   : > { %v2641_v31 = vpop.eup %2640  ;;  %2666 = vrcp.f32 %v1543_v26  ;;  %v1544_v32 = vadd.f32 1.0, %v2639_v27 }
 0x626   : > { %v2643_v35 = vpop.eup %2642  ;;  %2668 = vrcp.f32 %v1545_v30  ;;  %v1546_v36 = vadd.f32 1.0, %v2641_v31 }
 0x627   : > { %v2645_v37 = vpop.eup %2644  ;;  %2670 = vrcp.f32 %v1544_v32  ;;  %v1579_v55 = vmul.f32 %v2643_v35, %v3283_v0 }
 0x628   : > { %v2647_v38 = vpop.eup %2646  ;;  %2672 = vrcp.f32 %v1546_v36  ;;  %v1581_v59 = vmul.f32 %v2645_v37, %v3285_v1 }
 0x629   : > { %v2649_v39 = vpop.eup %2648  ;;  %v1580_v51 = vmul.f32 %v2647_v38, %v3289_v7 }
 0x62a   : > { %v2651_v42 = vpop.eup %2650  ;;  %v1582_v56 = vmul.f32 %v2649_v39, %v3291_v8 }
 0x62b   : > { %v2653_v44 = vpop.eup %2652  ;;  %v1583_v49 = vmul.f32 %v2651_v42, %v3295_v9 }
 0x62c   : > { %v2655_v46 = vpop.eup %2654  ;;  %v1585_v52 = vmul.f32 %v2653_v44, %v3297_v19 }
 0x62d   : > { %v2657_v50 = vpop.eup %2656  ;;  %v1584_v53 = vmul.f32 %v2655_v46, %v3300_v13  ;;  %v1595_v9 = vpack.c.bf16 %v1583_v49, %v1579_v55 }
 0x62e   : > { %v2659_v54 = vpop.eup %2658  ;;  %v1586_v57 = vmul.f32 %v2657_v50, %v3302_v22  ;;  %v1597_v7 = vpack.c.bf16 %v1585_v52, %v1581_v59 }
 0x62f   : > { %v2661_v58 = vpop.eup %2660  ;;  %v1596_v60 = vpack.c.bf16 %v1584_v53, %v1580_v51  ;;  %v1587_v4 = vmul.f32 %v2659_v54, %v3307_v28 }
 0x630   : > { %v2663_v61 = vpop.eup %2662  ;;  %v1598_v62 = vpack.c.bf16 %v1586_v57, %v1582_v56  ;;  %v1589_v16 = vmul.f32 %v2661_v58, %v3309_v29 }
 0x631   : > { %v2665_v63 = vpop.eup %2664  ;;  %1831 = vmatprep.mubr.bf16.mxu1 %v1596_v60  ;;  %v1588_v22 = vmul.f32 %v2663_v61, %v3312_v33  ;;  %v1605_v33 = vsub.s32 2, %v3171_v43 }
 0x632   : > { %v2667_v19 = vpop.eup %2666  ;;  %1880 = vmatprep.mubr.bf16.mxu0 %v1598_v62  ;;  %1832 = vmatmul.mubr.bf16.vlgmr.msra.gmra.mxu1 %v1595_v9  ;;  %v1590_v6 = vmul.f32 %v2665_v63, %v3314_v34 }
 0x633   : > { %v2669_v13 = vpop.eup %2668  ;;  %1881 = vmatmul.mubr.bf16.vlgmr.msra.gmra.mxu0 %v1597_v7  ;;  %v1591_v8 = vmul.f32 %v2667_v19, %v3319_v40  ;;  %v1606_v28 = vrot.slane %v3175_v45, %v1605_v33 }
 0x634   : > { %v2671_v0 = vpop.eup %2670  ;;  %v1593_v1 = vmul.f32 %v2669_v13, %v3321_v41 }
 0x635   : > { %v2673_v2 = vpop.eup %2672  ;;  %v1592_v3 = vmul.f32 %v2671_v0, %v3324_v47  ;;  %v1599_v14 = vpack.c.bf16 %v1591_v8, %v1587_v4 }
 0x636   : > { %v1594_v10 = vmul.f32 %v2673_v2, %v3326_v48  ;;  %v1601_v40 = vpack.c.bf16 %v1593_v1, %v1589_v16 }
 0x637   : > { %v1600_v5 = vpack.c.bf16 %v1592_v3, %v1588_v22 }
 0x638   : > { %v1602_v17 = vpack.c.bf16 %v1594_v10, %v1590_v6 }
 0x639   : > { %1839 = vmatprep.mubr.bf16.mxu1 %v1600_v5 }
 0x63a   : > { %1888 = vmatprep.mubr.bf16.mxu0 %v1602_v17  ;;  %1840 = vmatmul.mubr.bf16.gmra.mxu1 %v1599_v14 }
 0x63b   : > { %1889 = vmatmul.mubr.bf16.gmra.mxu0 %v1601_v40 }
 0x6f2   : > { %v2291_v41 = vpop.f32.mrf.mxu1 }
 0x6f3   : > { %v2319_v47 = vpop.f32.mrf.mxu0 }
 0x6f4   : > { %v2292_v20 = vpop.f32.mrf.mxu1 }
 0x6f5   : > { %v2293_v34 = vadd.f32 %v2292_v20, %v2291_v41  ;;  %v2320_v21 = vpop.f32.mrf.mxu0 }
 0x6f6   : > { %v2294_v48 = vpop.f32.mrf.mxu1  ;;  %v2321_v29 = vadd.f32 %v2320_v21, %v2319_v47  ;;  %v1947_v47 = vsub.s32 5, %v3171_v43 }
 0x6f7   : > { %v1834_v23 = vadd.f32 %v2293_v34, %v1606_v28  ;;  %v2322_v24 = vpop.f32.mrf.mxu0  ;;  %v1955_v34 = vsub.s32 6, %v3171_v43 }
 0x6f8   : > { %v2295_v25 = vpop.f32.mrf.mxu1  ;;  %v1948_v21 = vrot.slane %v3175_v45, %v1947_v47 }
 0x6f9   : > { %v1883_v26 = vadd.f32 %v2321_v29, %v1834_v23  ;;  %v2296_v27 = vadd.f32 %v2295_v25, %v2294_v48  ;;  %v2323_v30 = vpop.f32.mrf.mxu0  ;;  %v1956_v29 = vrot.slane %v3175_v45, %v1955_v34 }
 0x6fa   : > { %v2297_v31 = vpop.f32.mrf.mxu1  ;;  %v2324_v35 = vadd.f32 %v2323_v30, %v2322_v24 }
 0x6fb   : > { %v1837_v32 = vadd.f32 %v2296_v27, %v1606_v28  ;;  %v2325_v36 = vpop.f32.mrf.mxu0  ;;  %v1897_v37 = vadd.f32 %v1883_v26, %v3232_v11 }
 0x6fc   : > { %v2298_v38 = vpop.f32.mrf.mxu1 }
 0x6fd   : > { %v1886_v39 = vadd.f32 %v2324_v35, %v1837_v32  ;;  %v2299_v42 = vadd.f32 %v2298_v38, %v2297_v31  ;;  %v2326_v44 = vpop.f32.mrf.mxu0  ;;  %1901 = vadd.xlane.f32.xlu1 %v1897_v37 }
 0x6fe   : > { %v2300_v46 = vpop.f32.mrf.mxu1  ;;  %v2327_v50 = vadd.f32 %v2326_v44, %v2325_v36 }
 0x6ff   : > { %v1842_v49 = vadd.f32 %v2299_v42, %v1606_v28  ;;  %v2328_v51 = vpop.f32.mrf.mxu0  ;;  %v1898_v52 = vadd.f32 %v1886_v39, %v3234_v12 }
 0x700   : > { %v2301_v53 = vpop.f32.mrf.mxu1 }
 0x701   : > { %v1891_v54 = vadd.f32 %v2327_v50, %v1842_v49  ;;  %v2302_v55 = vadd.f32 %v2301_v53, %v2300_v46  ;;  %v2329_v56 = vpop.f32.mrf.mxu0  ;;  %1903 = vadd.xlane.f32.xlu0 %v1898_v52 }
 0x702   : > { %v2330_v58 = vadd.f32 %v2329_v56, %v2328_v51 }
 0x703   : > { %v1845_v57 = vadd.f32 %v2302_v55, %v1606_v28  ;;  %v1899_v11 = vadd.f32 %v1891_v54, %v3240_v18 }
 0x705   : > { %v1894_v59 = vadd.f32 %v2330_v58, %v1845_v57  ;;  %1905 = vadd.xlane.f32.xlu1 %v1899_v11 }
 0x707   : > { %v1900_v60 = vadd.f32 %v1894_v59, %v3242_v15 }
 0x709   : > { %1907 = vadd.xlane.f32.xlu0 %v1900_v60 }
 0x786   : > { %v1902_v61 = vpop.xlane.xlu1 %1901 }
 0x787   : > { %v1909_v9 = vmul.f32 0.0078125, %v1902_v61 }
 0x789   : > { %v1913_v62 = vsub.f32 %v1897_v37, %v1909_v9 }
 0x78a   : > { %v1904_v63 = vpop.xlane.xlu0 %1903 }
 0x78b   : > { %v1910_v7 = vmul.f32 0.0078125, %v1904_v63  ;;  %v1917_v12 = vmul.f32 %v1913_v62, %v1913_v62 }
 0x78d   : > { %v1914_v19 = vsub.f32 %v1898_v52, %v1910_v7  ;;  %1921 = vadd.xlane.f32.xlu1 %v1917_v12 }
 0x78e   : > { %v1906_v13 = vpop.xlane.xlu1 %1905 }
 0x78f   : > { %v1911_v0 = vmul.f32 0.0078125, %v1906_v13  ;;  %v1918_v8 = vmul.f32 %v1914_v19, %v1914_v19 }
 0x791   : > { %v1915_v2 = vsub.f32 %v1899_v11, %v1911_v0  ;;  %1923 = vadd.xlane.f32.xlu0 %v1918_v8 }
 0x792   : > { %v1908_v22 = vpop.xlane.xlu0 %1907 }
 0x793   : > { %v1912_v18 = vmul.f32 0.0078125, %v1908_v22  ;;  %v1919_v1 = vmul.f32 %v1915_v2, %v1915_v2 }
 0x795   : > { %v1916_v3 = vsub.f32 %v1900_v60, %v1912_v18  ;;  %1925 = vadd.xlane.f32.xlu1 %v1919_v1 }
 0x797   : > { %v1920_v15 = vmul.f32 %v1916_v3, %v1916_v3 }
 0x799   : > { %1927 = vadd.xlane.f32.xlu0 %v1920_v15 }
 0x816   : > { %v1922_v4 = vpop.xlane.xlu1 %1921 }
 0x817   : > { %v1929_v6 = vmul.f32 0.0078125, %v1922_v4 }
 0x819   : > { %v1933_v10 = vadd.f32 1e-05, %v1929_v6 }
 0x81a   : > { %v1924_v16 = vpop.xlane.xlu0 %1923 }
 0x81b   : > { %2674 = vrsqrt.f32 %v1933_v10  ;;  %v1930_v5 = vmul.f32 0.0078125, %v1924_v16 }
 0x81d   : > { %v1934_v17 = vadd.f32 1e-05, %v1930_v5 }
 0x81e   : > { %v1926_v14 = vpop.xlane.xlu1 %1925 }
 0x81f   : > { %2676 = vrsqrt.f32 %v1934_v17  ;;  %v1931_v40 = vmul.f32 0.0078125, %v1926_v14 }
 0x821   : > { %v1935_v33 = vadd.f32 1e-05, %v1931_v40 }
 0x822   : > { %v1928_v41 = vpop.xlane.xlu0 %1927 }
 0x823   : > { %2678 = vrsqrt.f32 %v1935_v33  ;;  %v1932_v28 = vmul.f32 0.0078125, %v1928_v41 }
 0x825   : > { %v1936_v20 = vadd.f32 1e-05, %v1932_v28 }
 0x827   : > { %2680 = vrsqrt.f32 %v1936_v20 }
 0x828   : > { %v2675_v48 = vpop.eup %2674 }
 0x829   : > { %v1941_v23 = vmul.f32 %v2675_v48, %v1913_v62 }
 0x82b   : > { %v1949_v24 = vmul.f32 %v1948_v21, %v1941_v23 }
 0x82c   : > { %v2677_v25 = vpop.eup %2676 }
 0x82d   : > { %v1942_v26 = vmul.f32 %v2677_v25, %v1914_v19  ;;  %v1957_v27 = vadd.f32 %v1956_v29, %v1949_v24 }
 0x82f   : > { %v1950_v30 = vmul.f32 %v1948_v21, %v1942_v26  ;;  %1961 = vst [vmem:[#allocation11] sm:$0xff] %v1957_v27 }
 0x830   : > { %v2679_v31 = vpop.eup %2678 }
 0x831   : > { %v1943_v32 = vmul.f32 %v2679_v31, %v1915_v2  ;;  %v1958_v35 = vadd.f32 %v1956_v29, %v1950_v30 }
 0x833   : > { %v1951_v36 = vmul.f32 %v1948_v21, %v1943_v32  ;;  %1962 = vst [vmem:[#allocation11 + $0x8] sm:$0xff] %v1958_v35 }
 0x834   : > { %v2681_v43 = vpop.eup %2680 }
 0x835   : > { %v1944_v37 = vmul.f32 %v2681_v43, %v1916_v3  ;;  %v1959_v38 = vadd.f32 %v1956_v29, %v1951_v36 }
 0x837   : > { %v1952_v39 = vmul.f32 %v1948_v21, %v1944_v37  ;;  %1963 = vst [vmem:[#allocation11 + $0x10] sm:$0xff] %v1959_v38 }
 0x839   : > { %v1960_v45 = vadd.f32 %v1956_v29, %v1952_v39 }
 0x83b   : > { %1964 = vst [vmem:[#allocation11 + $0x18] sm:$0xff] %v1960_v45 }
 0x83c   : > { %2831 = shalt.err (!%p2828_p2)
}
 0x83d   : > { %s2924_s28 = smov 128   ;;  %s2925_s9 = smov 8  }
 0x83e   : > { %s3417_s10 = sld [smem:[#allocation19_spill]] }
 0x844   : > { %2392 = dma.vmem_to_hbm [thread:$0]  (%p2417_p6), %s1976_s29, 512, %s3417_s10, [#allocation5], %s2924_s28, %s2924_s28, %s2925_s9  }
 0x845   : > { %2879 = dma.done.wait (%p2417_p6), [#allocation5], 512  }
 0x846   : > { %2881 = vsyncadd (%p2417_p6), [#allocation5], 4294966784 }
 0x847 PF: > { %s19_s26 = sadd.s32 1, %s2904_s26   ;;  %s3418_s21 = smov %s2888_s22 }
 0x848   : > { %p16_p11 = scmp.ge.s32.totalorder %s19_s26, 4   ;;  %s3419_s22 = smov %s2892_s23 }
 0x849   : > { %s3420_s23 = smov %s3050_s8  ;;  %s3421_s24 = smov %s2900_s25 }
 0x84a   : > { %s3422_s25 = smov %s3424_s11  ;;  %18 = sbr.rel (!%p16_p11) target bundleno = 10 (0xa), region = 120 }
 0x84f   :  { %1991 = vsyncpa [#allocation4], 1 }
 0x850   :  { %1993 = vsyncpa [#allocation4 + $0x1], 1 }
 0x851   :  { %1994 = vsyncpa [#allocation7], 1 }
 0x852   :  { %1995 = vsyncpa [#allocation5], 1 }
 0x853   :  { %1997 = vsyncpa [#allocation5 + $0x1], 1 }

</bundles_post_ra>
